<compile_context>
chip_gen: v7x
topology: tpu7x:2x2x1
jax: 0.10.0
libtpu: 0.0.40
codegen_flags: <defaults>
</compile_context>

<pallas_src>
import jax
import jax.numpy as jnp
from jax import lax
from jax.experimental import pallas as pl
from jax.experimental.pallas import tpu as pltpu


def _make_sepconv_kernel(C_in, C_out, K, S, P, H, W):
    """Builds the fused SepConv kernel and returns it with stage output sizes."""
    # Stage-1 depthwise (stride S) output size.
    H1 = (H + 2 * P - K) // S + 1
    W1 = (W + 2 * P - K) // S + 1
    # Stage-2 depthwise (stride 1) output size.
    H2 = H1 + 2 * P - K + 1
    W2 = W1 + 2 * P - K + 1

    def kernel(x_ref, dw1_ref, pw1_ref, sb1_ref, dw2_ref, pw2_ref, sb2_ref,
               o_ref, pad1_ref, pad2_ref):
        f32 = jnp.float32

        def zero_border(pad_ref, h, w):
            # Zero only the P-wide border strips; the interior is fully
            # overwritten every grid step so a full memset is wasted stores.
            hp, wp = h + 2 * P, w + 2 * P
            pad_ref[0:P, :, :] = jnp.zeros((P, wp, C_in), f32)
            pad_ref[P + h:, :, :] = jnp.zeros((P, wp, C_in), f32)
            pad_ref[:, 0:P, :] = jnp.zeros((hp, P, C_in), f32)
            pad_ref[:, P + w:, :] = jnp.zeros((hp, P, C_in), f32)

        # ---------- Stage 1: ReLU -> depthwise(K, S, P) -> 1x1 -> BN ----------
        if P > 0:
            zero_border(pad1_ref, H, W)
        pad1_ref[P:P + H, P:P + W, :] = jnp.maximum(x_ref[...].astype(f32), 0.0)

        dw1 = dw1_ref[...]                                    # (K*K, C_in)

        def tap1(kh, kw):
            if S == 1:
                return pad1_ref[kh:kh + H1, kw:kw + W1, :]
            # TODO(synk): strided sublane read; for large shapes restructure to
            # a contiguous read + subsample to avoid non-contiguous vld.
            return pad1_ref[pl.ds(kh, H1, S), pl.ds(kw, W1, S), :]

        acc1 = tap1(0, 0) * dw1[0]                            # init from first tap
        for kh in range(K):
            for kw in range(K):
                if kh == 0 and kw == 0:
                    continue
                acc1 = acc1 + tap1(kh, kw) * dw1[kh * K + kw]  # per-channel lane FMA

        # Pointwise 1x1 conv on the MXU: (H1*W1, C_in) @ (C_in, C_in).
        y1 = jnp.dot(acc1.reshape(H1 * W1, C_in), pw1_ref[...],
                     preferred_element_type=f32).reshape(H1, W1, C_in)
        y1 = y1 * sb1_ref[0] + sb1_ref[1]                     # folded BatchNorm #1

        # ---------- Stage 2: ReLU -> depthwise(K, 1, P) -> 1x1 -> BN ----------
        if P > 0:
            zero_border(pad2_ref, H1, W1)
        pad2_ref[P:P + H1, P:P + W1, :] = jnp.maximum(y1, 0.0)

        dw2 = dw2_ref[...]                                    # (K*K, C_in)
        acc2 = pad2_ref[0:H2, 0:W2, :] * dw2[0]
        for kh in range(K):
            for kw in range(K):
                if kh == 0 and kw == 0:
                    continue
                acc2 = acc2 + pad2_ref[kh:kh + H2, kw:kw + W2, :] * dw2[kh * K + kw]

        # Pointwise 1x1 conv on the MXU: (H2*W2, C_in) @ (C_in, C_out).
        y2 = jnp.dot(acc2.reshape(H2 * W2, C_in), pw2_ref[...],
                     preferred_element_type=f32).reshape(H2, W2, C_out)
        y2 = y2 * sb2_ref[0] + sb2_ref[1]                     # folded BatchNorm #2

        o_ref[...] = y2.astype(o_ref.dtype)

    return kernel, (H1, W1, H2, W2)


def _fold_bn(bn, eps):
    scale = bn["gamma"] / jnp.sqrt(bn["var"] + eps)
    bias = bn["beta"] - bn["mean"] * scale
    return jnp.stack([scale, bias]).astype(jnp.float32)       # (2, C)


def _padded_bytes(*shape, itemsize=4):
    """Bytes of an f32 VMEM buffer after (8, 128) tile padding of the last two dims."""
    if len(shape) == 1:
        return ((shape[0] + 127) // 128) * 128 * itemsize
    lead = 1
    for s in shape[:-2]:
        lead *= s
    sub = ((shape[-2] + 7) // 8) * 8
    lane = ((shape[-1] + 127) // 128) * 128
    return lead * sub * lane * itemsize


def sepconv_forward_nhwc(x_nhwc, params, *, kernel_size, stride, padding, eps=1e-5):
    """SepConv forward on NHWC input/output (the kernel's native layout)."""
    N, H, W, C_in = x_nhwc.shape
    K, S, P = kernel_size, stride, padding
    C_out = params["pw2"].shape[0]

    kernel, (H1, W1, H2, W2) = _make_sepconv_kernel(C_in, C_out, K, S, P, H, W)

    # Fold inference-mode BatchNorm into per-channel scale/bias.
    sb1 = _fold_bn(params["bn1"], eps)
    sb2 = _fold_bn(params["bn2"], eps)

    # Depthwise weights (C,1,K,K) -> (K*K, C); pointwise (O,I,1,1) -> (I, O).
    dw1 = params["dw1"].reshape(C_in, K * K).T.astype(jnp.float32)
    dw2 = params["dw2"].reshape(C_in, K * K).T.astype(jnp.float32)
    pw1 = params["pw1"].reshape(C_in, C_in).T.astype(jnp.float32)
    pw2 = params["pw2"].reshape(C_out, C_in).T.astype(jnp.float32)

    # Explicit VMEM budget: double-buffered input/output blocks + weights,
    # pad scratches, and live f32 temporaries — capped at 64 MiB (v7x limit).
    working = (
        2 * _padded_bytes(H, W, C_in)                          # input (2 bufs)
        + 2 * _padded_bytes(H2, W2, C_out)                     # output (2 bufs)
        + _padded_bytes(H + 2 * P, W + 2 * P, C_in)            # pad1 scratch
        + _padded_bytes(H1 + 2 * P, W1 + 2 * P, C_in)          # pad2 scratch
        + 2 * (2 * _padded_bytes(K * K, C_in)
               + _padded_bytes(C_in, C_in) + _padded_bytes(C_in, C_out)
               + _padded_bytes(2, C_in) + _padded_bytes(2, C_out))  # weights (2 bufs)
        + 2 * (_padded_bytes(H1, W1, C_in) + _padded_bytes(H2, W2, C_out))  # live temps
    )
    vmem_limit = int(min(64 * 1024 * 1024, max(32 * 1024 * 1024, 2 * working)))

    grid_spec = pltpu.PrefetchScalarGridSpec(
        num_scalar_prefetch=0,
        grid=(N,),
        in_specs=[
            pl.BlockSpec((None, H, W, C_in), lambda n: (n, 0, 0, 0)),
            pl.BlockSpec((K * K, C_in), lambda n: (0, 0)),
            pl.BlockSpec((C_in, C_in), lambda n: (0, 0)),
            pl.BlockSpec((2, C_in), lambda n: (0, 0)),
            pl.BlockSpec((K * K, C_in), lambda n: (0, 0)),
            pl.BlockSpec((C_in, C_out), lambda n: (0, 0)),
            pl.BlockSpec((2, C_out), lambda n: (0, 0)),
        ],
        out_specs=pl.BlockSpec((None, H2, W2, C_out), lambda n: (n, 0, 0, 0)),
        scratch_shapes=[
            pltpu.VMEM((H + 2 * P, W + 2 * P, C_in), jnp.float32),    # stage-1 pad
            pltpu.VMEM((H1 + 2 * P, W1 + 2 * P, C_in), jnp.float32),  # stage-2 pad
        ],
    )

    return pl.pallas_call(
        kernel,
        out_shape=jax.ShapeDtypeStruct((N, H2, W2, C_out), x_nhwc.dtype),
        grid_spec=grid_spec,
        compiler_params=pltpu.CompilerParams(
            dimension_semantics=("parallel",),
            vmem_limit_bytes=vmem_limit),
    )(x_nhwc, dw1, pw1, sb1, dw2, pw2, sb2)


def sepconv_forward(x, params, *, kernel_size, stride, padding, eps=1e-5):
    """NCHW entry point matching PyTorch's SepConv.forward(x).

    The kernel works natively in NHWC (channels on the lane dim); callers that
    already keep activations in NHWC should call `sepconv_forward_nhwc` and
    skip the two transposes below (they are full HBM passes for big tensors).
    """
    x_nhwc = jnp.transpose(x, (0, 2, 3, 1))
    out_nhwc = sepconv_forward_nhwc(x_nhwc, params, kernel_size=kernel_size,
                                    stride=stride, padding=padding, eps=eps)
    return jnp.transpose(out_nhwc, (0, 3, 1, 2))


def sepconv_reference(x, params, *, kernel_size, stride, padding, eps=1e-5):
    """Pure-JAX reference (inference-mode BatchNorm), NCHW."""
    dn = ("NCHW", "OIHW", "NCHW")
    hi = lax.Precision.HIGHEST
    C_in = x.shape[1]

    def bn(h, p):
        scale = p["gamma"] / jnp.sqrt(p["var"] + eps)
        bias = p["beta"] - p["mean"] * scale
        return h * scale[None, :, None, None] + bias[None, :, None, None]

    h = jnp.maximum(x, 0.0)
    h = lax.conv_general_dilated(h, params["dw1"], (stride, stride),
                                 [(padding, padding)] * 2, dimension_numbers=dn,
                                 feature_group_count=C_in, precision=hi)
    h = lax.conv_general_dilated(h, params["pw1"], (1, 1), [(0, 0)] * 2,
                                 dimension_numbers=dn, precision=hi)
    h = bn(h, params["bn1"])
    h = jnp.maximum(h, 0.0)
    h = lax.conv_general_dilated(h, params["dw2"], (1, 1),
                                 [(padding, padding)] * 2, dimension_numbers=dn,
                                 feature_group_count=C_in, precision=hi)
    h = lax.conv_general_dilated(h, params["pw2"], (1, 1), [(0, 0)] * 2,
                                 dimension_numbers=dn, precision=hi)
    h = bn(h, params["bn2"])
    return h


if __name__ == "__main__":
    key = jax.random.PRNGKey(0)
    ks = jax.random.split(key, 9)

    N, C_in, C_out, H, W = 2, 4, 16, 16, 16
    K, S, P = 3, 1, 1

    x = jax.random.normal(ks[0], (N, C_in, H, W), jnp.float32)
    params = {
        "dw1": 0.25 * jax.random.normal(ks[1], (C_in, 1, K, K), jnp.float32),
        "pw1": 0.25 * jax.random.normal(ks[2], (C_in, C_in, 1, 1), jnp.float32),
        "bn1": {
            "gamma": 1.0 + 0.1 * jax.random.normal(ks[3], (C_in,), jnp.float32),
            "beta": 0.1 * jax.random.normal(ks[4], (C_in,), jnp.float32),
            "mean": 0.1 * jax.random.normal(ks[5], (C_in,), jnp.float32),
            "var": jax.random.uniform(ks[6], (C_in,), jnp.float32, 0.5, 1.5),
        },
        "dw2": 0.25 * jax.random.normal(ks[7], (C_in, 1, K, K), jnp.float32),
        "pw2": 0.25 * jax.random.normal(ks[8], (C_out, C_in, 1, 1), jnp.float32),
        "bn2": {
            "gamma": jnp.ones((C_out,), jnp.float32),
            "beta": jnp.zeros((C_out,), jnp.float32),
            "mean": jnp.zeros((C_out,), jnp.float32),
            "var": jnp.ones((C_out,), jnp.float32),
        },
    }

    y = sepconv_forward(x, params, kernel_size=K, stride=S, padding=P)
    y = jax.block_until_ready(y)
    assert y.shape == (N, C_out, H, W) and y.dtype == x.dtype

    y_ref = jax.block_until_ready(
        sepconv_reference(x, params, kernel_size=K, stride=S, padding=P))
    # Tolerance allows for MXU matmul pass decomposition vs the HIGHEST-precision
    # lax.conv reference.
    err = float(jnp.max(jnp.abs(y - y_ref)))
    assert err < 2e-3, f"mismatch vs reference: max|diff|={err}"

    print("KERNEL_OK")
</pallas_src>

<mosaic_0001>
module attributes {stable_mosaic.version = 11 : i64} {
  func.func @kernel(%arg0: i32, %arg1: memref<1x16x16x4xf32, #tpu.memory_space<vmem>>, %arg2: memref<9x4xf32, #tpu.memory_space<vmem>>, %arg3: memref<4x4xf32, #tpu.memory_space<vmem>>, %arg4: memref<2x4xf32, #tpu.memory_space<vmem>>, %arg5: memref<9x4xf32, #tpu.memory_space<vmem>>, %arg6: memref<4x16xf32, #tpu.memory_space<vmem>>, %arg7: memref<2x16xf32, #tpu.memory_space<vmem>>, %arg8: memref<1x16x16x16xf32, #tpu.memory_space<vmem>>, %arg9: memref<18x18x4xf32, #tpu.memory_space<vmem>>, %arg10: memref<18x18x4xf32, #tpu.memory_space<vmem>>) attributes {dimension_semantics = [#tpu.dimension_semantics<parallel>], iteration_bounds = array<i64: 2>, scalar_prefetch = 0 : i64, scratch_operands = 2 : i64, tpu.core_type = #tpu.core_type<tc>, window_params = [{transform_indices = @transform_0, window_bounds = array<i64: 1, 16, 16, 4>}, {pipeline_mode = #tpu.pipeline_mode<synchronous>, transform_indices = @transform_1, window_bounds = array<i64: 9, 4>}, {pipeline_mode = #tpu.pipeline_mode<synchronous>, transform_indices = @transform_2, window_bounds = array<i64: 4, 4>}, {pipeline_mode = #tpu.pipeline_mode<synchronous>, transform_indices = @transform_3, window_bounds = array<i64: 2, 4>}, {pipeline_mode = #tpu.pipeline_mode<synchronous>, transform_indices = @transform_4, window_bounds = array<i64: 9, 4>}, {pipeline_mode = #tpu.pipeline_mode<synchronous>, transform_indices = @transform_5, window_bounds = array<i64: 4, 16>}, {pipeline_mode = #tpu.pipeline_mode<synchronous>, transform_indices = @transform_6, window_bounds = array<i64: 2, 16>}, {transform_indices = @transform_7, window_bounds = array<i64: 1, 16, 16, 16>}]} {
    %cst = arith.constant 0.000000e+00 : f32
    %0 = vector.broadcast %cst : f32 to vector<1x18x4xf32>
    %c0 = arith.constant 0 : index
    %c0_0 = arith.constant 0 : index
    %c0_1 = arith.constant 0 : index
    %1 = vector.load %arg9[%c0, %c0_0, %c0_1] : memref<18x18x4xf32, #tpu.memory_space<vmem>>, vector<1x18x4xf32>
    tpu.vector_store %arg9[%c0, %c0_0, %c0_1], %0 {strides = array<i32>} : memref<18x18x4xf32, #tpu.memory_space<vmem>>, vector<1x18x4xf32>,
    %cst_2 = arith.constant 0.000000e+00 : f32
    %2 = vector.broadcast %cst_2 : f32 to vector<1x18x4xf32>
    %c17 = arith.constant 17 : index
    %c0_3 = arith.constant 0 : index
    %c0_4 = arith.constant 0 : index
    %3 = vector.load %arg9[%c17, %c0_3, %c0_4] : memref<18x18x4xf32, #tpu.memory_space<vmem>>, vector<1x18x4xf32>
    tpu.vector_store %arg9[%c17, %c0_3, %c0_4], %2 {strides = array<i32>} : memref<18x18x4xf32, #tpu.memory_space<vmem>>, vector<1x18x4xf32>,
    %cst_5 = arith.constant 0.000000e+00 : f32
    %4 = vector.broadcast %cst_5 : f32 to vector<18x1x4xf32>
    %c0_6 = arith.constant 0 : index
    %c0_7 = arith.constant 0 : index
    %c0_8 = arith.constant 0 : index
    %5 = vector.load %arg9[%c0_6, %c0_7, %c0_8] : memref<18x18x4xf32, #tpu.memory_space<vmem>>, vector<18x1x4xf32>
    tpu.vector_store %arg9[%c0_6, %c0_7, %c0_8], %4 {strides = array<i32>} : memref<18x18x4xf32, #tpu.memory_space<vmem>>, vector<18x1x4xf32>,
    %cst_9 = arith.constant 0.000000e+00 : f32
    %6 = vector.broadcast %cst_9 : f32 to vector<18x1x4xf32>
    %c0_10 = arith.constant 0 : index
    %c17_11 = arith.constant 17 : index
    %c0_12 = arith.constant 0 : index
    %7 = vector.load %arg9[%c0_10, %c17_11, %c0_12] : memref<18x18x4xf32, #tpu.memory_space<vmem>>, vector<18x1x4xf32>
    tpu.vector_store %arg9[%c0_10, %c17_11, %c0_12], %6 {strides = array<i32>} : memref<18x18x4xf32, #tpu.memory_space<vmem>>, vector<18x1x4xf32>,
    %c0_13 = arith.constant 0 : index
    %c0_14 = arith.constant 0 : index
    %c0_15 = arith.constant 0 : index
    %c0_16 = arith.constant 0 : index
    %8 = vector.load %arg1[%c0_13, %c0_14, %c0_15, %c0_16] : memref<1x16x16x4xf32, #tpu.memory_space<vmem>>, vector<1x16x16x4xf32>
    %9 = vector.shape_cast %8 : vector<1x16x16x4xf32> to vector<16x16x4xf32>
    %cst_17 = arith.constant 0.000000e+00 : f32
    %10 = vector.broadcast %cst_17 : f32 to vector<16x16x4xf32>
    %11 = arith.maximumf %9, %10 : vector<16x16x4xf32>
    %c1 = arith.constant 1 : index
    %c1_18 = arith.constant 1 : index
    %c0_19 = arith.constant 0 : index
    %12 = vector.load %arg9[%c1, %c1_18, %c0_19] : memref<18x18x4xf32, #tpu.memory_space<vmem>>, vector<16x16x4xf32>
    tpu.vector_store %arg9[%c1, %c1_18, %c0_19], %11 {strides = array<i32>} : memref<18x18x4xf32, #tpu.memory_space<vmem>>, vector<16x16x4xf32>,
    %c0_20 = arith.constant 0 : index
    %c0_21 = arith.constant 0 : index
    %13 = vector.load %arg2[%c0_20, %c0_21] : memref<9x4xf32, #tpu.memory_space<vmem>>, vector<9x4xf32>
    %c0_22 = arith.constant 0 : index
    %c0_23 = arith.constant 0 : index
    %c0_24 = arith.constant 0 : index
    %14 = vector.load %arg9[%c0_22, %c0_23, %c0_24] : memref<18x18x4xf32, #tpu.memory_space<vmem>>, vector<16x16x4xf32>
    %15 = vector.extract_strided_slice %13 {offsets = [0, 0], sizes = [1, 4], strides = [1, 1]} : vector<9x4xf32> to vector<1x4xf32>
    %16 = vector.shape_cast %15 : vector<1x4xf32> to vector<4xf32>
    %17 = vector.shape_cast %16 : vector<4xf32> to vector<1x1x4xf32>
    %18 = vector.broadcast %17 : vector<1x1x4xf32> to vector<16x16x4xf32>
    %19 = arith.mulf %14, %18 : vector<16x16x4xf32>
    %c0_25 = arith.constant 0 : index
    %c1_26 = arith.constant 1 : index
    %c0_27 = arith.constant 0 : index
    %20 = vector.load %arg9[%c0_25, %c1_26, %c0_27] : memref<18x18x4xf32, #tpu.memory_space<vmem>>, vector<16x16x4xf32>
    %21 = vector.extract_strided_slice %13 {offsets = [1, 0], sizes = [1, 4], strides = [1, 1]} : vector<9x4xf32> to vector<1x4xf32>
    %22 = vector.shape_cast %21 : vector<1x4xf32> to vector<4xf32>
    %23 = vector.shape_cast %22 : vector<4xf32> to vector<1x1x4xf32>
    %24 = vector.broadcast %23 : vector<1x1x4xf32> to vector<16x16x4xf32>
    %25 = arith.mulf %20, %24 : vector<16x16x4xf32>
    %26 = arith.addf %19, %25 : vector<16x16x4xf32>
    %c0_28 = arith.constant 0 : index
    %c2 = arith.constant 2 : index
    %c0_29 = arith.constant 0 : index
    %27 = vector.load %arg9[%c0_28, %c2, %c0_29] : memref<18x18x4xf32, #tpu.memory_space<vmem>>, vector<16x16x4xf32>
    %28 = vector.extract_strided_slice %13 {offsets = [2, 0], sizes = [1, 4], strides = [1, 1]} : vector<9x4xf32> to vector<1x4xf32>
    %29 = vector.shape_cast %28 : vector<1x4xf32> to vector<4xf32>
    %30 = vector.shape_cast %29 : vector<4xf32> to vector<1x1x4xf32>
    %31 = vector.broadcast %30 : vector<1x1x4xf32> to vector<16x16x4xf32>
    %32 = arith.mulf %27, %31 : vector<16x16x4xf32>
    %33 = arith.addf %26, %32 : vector<16x16x4xf32>
    %c1_30 = arith.constant 1 : index
    %c0_31 = arith.constant 0 : index
    %c0_32 = arith.constant 0 : index
    %34 = vector.load %arg9[%c1_30, %c0_31, %c0_32] : memref<18x18x4xf32, #tpu.memory_space<vmem>>, vector<16x16x4xf32>
    %35 = vector.extract_strided_slice %13 {offsets = [3, 0], sizes = [1, 4], strides = [1, 1]} : vector<9x4xf32> to vector<1x4xf32>
    %36 = vector.shape_cast %35 : vector<1x4xf32> to vector<4xf32>
    %37 = vector.shape_cast %36 : vector<4xf32> to vector<1x1x4xf32>
    %38 = vector.broadcast %37 : vector<1x1x4xf32> to vector<16x16x4xf32>
    %39 = arith.mulf %34, %38 : vector<16x16x4xf32>
    %40 = arith.addf %33, %39 : vector<16x16x4xf32>
    %c1_33 = arith.constant 1 : index
    %c1_34 = arith.constant 1 : index
    %c0_35 = arith.constant 0 : index
    %41 = vector.load %arg9[%c1_33, %c1_34, %c0_35] : memref<18x18x4xf32, #tpu.memory_space<vmem>>, vector<16x16x4xf32>
    %42 = vector.extract_strided_slice %13 {offsets = [4, 0], sizes = [1, 4], strides = [1, 1]} : vector<9x4xf32> to vector<1x4xf32>
    %43 = vector.shape_cast %42 : vector<1x4xf32> to vector<4xf32>
    %44 = vector.shape_cast %43 : vector<4xf32> to vector<1x1x4xf32>
    %45 = vector.broadcast %44 : vector<1x1x4xf32> to vector<16x16x4xf32>
    %46 = arith.mulf %41, %45 : vector<16x16x4xf32>
    %47 = arith.addf %40, %46 : vector<16x16x4xf32>
    %c1_36 = arith.constant 1 : index
    %c2_37 = arith.constant 2 : index
    %c0_38 = arith.constant 0 : index
    %48 = vector.load %arg9[%c1_36, %c2_37, %c0_38] : memref<18x18x4xf32, #tpu.memory_space<vmem>>, vector<16x16x4xf32>
    %49 = vector.extract_strided_slice %13 {offsets = [5, 0], sizes = [1, 4], strides = [1, 1]} : vector<9x4xf32> to vector<1x4xf32>
    %50 = vector.shape_cast %49 : vector<1x4xf32> to vector<4xf32>
    %51 = vector.shape_cast %50 : vector<4xf32> to vector<1x1x4xf32>
    %52 = vector.broadcast %51 : vector<1x1x4xf32> to vector<16x16x4xf32>
    %53 = arith.mulf %48, %52 : vector<16x16x4xf32>
    %54 = arith.addf %47, %53 : vector<16x16x4xf32>
    %c2_39 = arith.constant 2 : index
    %c0_40 = arith.constant 0 : index
    %c0_41 = arith.constant 0 : index
    %55 = vector.load %arg9[%c2_39, %c0_40, %c0_41] : memref<18x18x4xf32, #tpu.memory_space<vmem>>, vector<16x16x4xf32>
    %56 = vector.extract_strided_slice %13 {offsets = [6, 0], sizes = [1, 4], strides = [1, 1]} : vector<9x4xf32> to vector<1x4xf32>
    %57 = vector.shape_cast %56 : vector<1x4xf32> to vector<4xf32>
    %58 = vector.shape_cast %57 : vector<4xf32> to vector<1x1x4xf32>
    %59 = vector.broadcast %58 : vector<1x1x4xf32> to vector<16x16x4xf32>
    %60 = arith.mulf %55, %59 : vector<16x16x4xf32>
    %61 = arith.addf %54, %60 : vector<16x16x4xf32>
    %c2_42 = arith.constant 2 : index
    %c1_43 = arith.constant 1 : index
    %c0_44 = arith.constant 0 : index
    %62 = vector.load %arg9[%c2_42, %c1_43, %c0_44] : memref<18x18x4xf32, #tpu.memory_space<vmem>>, vector<16x16x4xf32>
    %63 = vector.extract_strided_slice %13 {offsets = [7, 0], sizes = [1, 4], strides = [1, 1]} : vector<9x4xf32> to vector<1x4xf32>
    %64 = vector.shape_cast %63 : vector<1x4xf32> to vector<4xf32>
    %65 = vector.shape_cast %64 : vector<4xf32> to vector<1x1x4xf32>
    %66 = vector.broadcast %65 : vector<1x1x4xf32> to vector<16x16x4xf32>
    %67 = arith.mulf %62, %66 : vector<16x16x4xf32>
    %68 = arith.addf %61, %67 : vector<16x16x4xf32>
    %c2_45 = arith.constant 2 : index
    %c2_46 = arith.constant 2 : index
    %c0_47 = arith.constant 0 : index
    %69 = vector.load %arg9[%c2_45, %c2_46, %c0_47] : memref<18x18x4xf32, #tpu.memory_space<vmem>>, vector<16x16x4xf32>
    %70 = vector.extract_strided_slice %13 {offsets = [8, 0], sizes = [1, 4], strides = [1, 1]} : vector<9x4xf32> to vector<1x4xf32>
    %71 = vector.shape_cast %70 : vector<1x4xf32> to vector<4xf32>
    %72 = vector.shape_cast %71 : vector<4xf32> to vector<1x1x4xf32>
    %73 = vector.broadcast %72 : vector<1x1x4xf32> to vector<16x16x4xf32>
    %74 = arith.mulf %69, %73 : vector<16x16x4xf32>
    %75 = arith.addf %68, %74 : vector<16x16x4xf32>
    %76 = vector.shape_cast %75 : vector<16x16x4xf32> to vector<256x4xf32>
    %c0_48 = arith.constant 0 : index
    %c0_49 = arith.constant 0 : index
    %77 = vector.load %arg3[%c0_48, %c0_49] : memref<4x4xf32, #tpu.memory_space<vmem>>, vector<4x4xf32>
    %cst_50 = arith.constant dense<0.000000e+00> : vector<256x4xf32>
    %78 = tpu.matmul %76, %77, %cst_50 {dimension_numbers = #tpu.dot_dimension_numbers<[1], [0], [0], [1], [0, 0, 1, 1], [], []>} : vector<256x4xf32>, vector<4x4xf32>, vector<256x4xf32> -> vector<256x4xf32>
    %79 = vector.shape_cast %78 : vector<256x4xf32> to vector<16x16x4xf32>
    %c0_51 = arith.constant 0 : index
    %c0_52 = arith.constant 0 : index
    %80 = vector.load %arg4[%c0_51, %c0_52] : memref<2x4xf32, #tpu.memory_space<vmem>>, vector<1x4xf32>
    %81 = vector.shape_cast %80 : vector<1x4xf32> to vector<4xf32>
    %82 = vector.shape_cast %81 : vector<4xf32> to vector<1x1x4xf32>
    %83 = vector.broadcast %82 : vector<1x1x4xf32> to vector<16x16x4xf32>
    %84 = arith.mulf %79, %83 : vector<16x16x4xf32>
    %c1_53 = arith.constant 1 : index
    %c0_54 = arith.constant 0 : index
    %85 = vector.load %arg4[%c1_53, %c0_54] : memref<2x4xf32, #tpu.memory_space<vmem>>, vector<1x4xf32>
    %86 = vector.shape_cast %85 : vector<1x4xf32> to vector<4xf32>
    %87 = vector.shape_cast %86 : vector<4xf32> to vector<1x1x4xf32>
    %88 = vector.broadcast %87 : vector<1x1x4xf32> to vector<16x16x4xf32>
    %89 = arith.addf %84, %88 : vector<16x16x4xf32>
    %cst_55 = arith.constant 0.000000e+00 : f32
    %90 = vector.broadcast %cst_55 : f32 to vector<1x18x4xf32>
    %c0_56 = arith.constant 0 : index
    %c0_57 = arith.constant 0 : index
    %c0_58 = arith.constant 0 : index
    %91 = vector.load %arg10[%c0_56, %c0_57, %c0_58] : memref<18x18x4xf32, #tpu.memory_space<vmem>>, vector<1x18x4xf32>
    tpu.vector_store %arg10[%c0_56, %c0_57, %c0_58], %90 {strides = array<i32>} : memref<18x18x4xf32, #tpu.memory_space<vmem>>, vector<1x18x4xf32>,
    %cst_59 = arith.constant 0.000000e+00 : f32
    %92 = vector.broadcast %cst_59 : f32 to vector<1x18x4xf32>
    %c17_60 = arith.constant 17 : index
    %c0_61 = arith.constant 0 : index
    %c0_62 = arith.constant 0 : index
    %93 = vector.load %arg10[%c17_60, %c0_61, %c0_62] : memref<18x18x4xf32, #tpu.memory_space<vmem>>, vector<1x18x4xf32>
    tpu.vector_store %arg10[%c17_60, %c0_61, %c0_62], %92 {strides = array<i32>} : memref<18x18x4xf32, #tpu.memory_space<vmem>>, vector<1x18x4xf32>,
    %cst_63 = arith.constant 0.000000e+00 : f32
    %94 = vector.broadcast %cst_63 : f32 to vector<18x1x4xf32>
    %c0_64 = arith.constant 0 : index
    %c0_65 = arith.constant 0 : index
    %c0_66 = arith.constant 0 : index
    %95 = vector.load %arg10[%c0_64, %c0_65, %c0_66] : memref<18x18x4xf32, #tpu.memory_space<vmem>>, vector<18x1x4xf32>
    tpu.vector_store %arg10[%c0_64, %c0_65, %c0_66], %94 {strides = array<i32>} : memref<18x18x4xf32, #tpu.memory_space<vmem>>, vector<18x1x4xf32>,
    %cst_67 = arith.constant 0.000000e+00 : f32
    %96 = vector.broadcast %cst_67 : f32 to vector<18x1x4xf32>
    %c0_68 = arith.constant 0 : index
    %c17_69 = arith.constant 17 : index
    %c0_70 = arith.constant 0 : index
    %97 = vector.load %arg10[%c0_68, %c17_69, %c0_70] : memref<18x18x4xf32, #tpu.memory_space<vmem>>, vector<18x1x4xf32>
    tpu.vector_store %arg10[%c0_68, %c17_69, %c0_70], %96 {strides = array<i32>} : memref<18x18x4xf32, #tpu.memory_space<vmem>>, vector<18x1x4xf32>,
    %cst_71 = arith.constant 0.000000e+00 : f32
    %98 = vector.broadcast %cst_71 : f32 to vector<16x16x4xf32>
    %99 = arith.maximumf %89, %98 : vector<16x16x4xf32>
    %c1_72 = arith.constant 1 : index
    %c1_73 = arith.constant 1 : index
    %c0_74 = arith.constant 0 : index
    %100 = vector.load %arg10[%c1_72, %c1_73, %c0_74] : memref<18x18x4xf32, #tpu.memory_space<vmem>>, vector<16x16x4xf32>
    tpu.vector_store %arg10[%c1_72, %c1_73, %c0_74], %99 {strides = array<i32>} : memref<18x18x4xf32, #tpu.memory_space<vmem>>, vector<16x16x4xf32>,
    %c0_75 = arith.constant 0 : index
    %c0_76 = arith.constant 0 : index
    %101 = vector.load %arg5[%c0_75, %c0_76] : memref<9x4xf32, #tpu.memory_space<vmem>>, vector<9x4xf32>
    %c0_77 = arith.constant 0 : index
    %c0_78 = arith.constant 0 : index
    %c0_79 = arith.constant 0 : index
    %102 = vector.load %arg10[%c0_77, %c0_78, %c0_79] : memref<18x18x4xf32, #tpu.memory_space<vmem>>, vector<16x16x4xf32>
    %103 = vector.extract_strided_slice %101 {offsets = [0, 0], sizes = [1, 4], strides = [1, 1]} : vector<9x4xf32> to vector<1x4xf32>
    %104 = vector.shape_cast %103 : vector<1x4xf32> to vector<4xf32>
    %105 = vector.shape_cast %104 : vector<4xf32> to vector<1x1x4xf32>
    %106 = vector.broadcast %105 : vector<1x1x4xf32> to vector<16x16x4xf32>
    %107 = arith.mulf %102, %106 : vector<16x16x4xf32>
    %c0_80 = arith.constant 0 : index
    %c1_81 = arith.constant 1 : index
    %c0_82 = arith.constant 0 : index
    %108 = vector.load %arg10[%c0_80, %c1_81, %c0_82] : memref<18x18x4xf32, #tpu.memory_space<vmem>>, vector<16x16x4xf32>
    %109 = vector.extract_strided_slice %101 {offsets = [1, 0], sizes = [1, 4], strides = [1, 1]} : vector<9x4xf32> to vector<1x4xf32>
    %110 = vector.shape_cast %109 : vector<1x4xf32> to vector<4xf32>
    %111 = vector.shape_cast %110 : vector<4xf32> to vector<1x1x4xf32>
    %112 = vector.broadcast %111 : vector<1x1x4xf32> to vector<16x16x4xf32>
    %113 = arith.mulf %108, %112 : vector<16x16x4xf32>
    %114 = arith.addf %107, %113 : vector<16x16x4xf32>
    %c0_83 = arith.constant 0 : index
    %c2_84 = arith.constant 2 : index
    %c0_85 = arith.constant 0 : index
    %115 = vector.load %arg10[%c0_83, %c2_84, %c0_85] : memref<18x18x4xf32, #tpu.memory_space<vmem>>, vector<16x16x4xf32>
    %116 = vector.extract_strided_slice %101 {offsets = [2, 0], sizes = [1, 4], strides = [1, 1]} : vector<9x4xf32> to vector<1x4xf32>
    %117 = vector.shape_cast %116 : vector<1x4xf32> to vector<4xf32>
    %118 = vector.shape_cast %117 : vector<4xf32> to vector<1x1x4xf32>
    %119 = vector.broadcast %118 : vector<1x1x4xf32> to vector<16x16x4xf32>
    %120 = arith.mulf %115, %119 : vector<16x16x4xf32>
    %121 = arith.addf %114, %120 : vector<16x16x4xf32>
    %c1_86 = arith.constant 1 : index
    %c0_87 = arith.constant 0 : index
    %c0_88 = arith.constant 0 : index
    %122 = vector.load %arg10[%c1_86, %c0_87, %c0_88] : memref<18x18x4xf32, #tpu.memory_space<vmem>>, vector<16x16x4xf32>
    %123 = vector.extract_strided_slice %101 {offsets = [3, 0], sizes = [1, 4], strides = [1, 1]} : vector<9x4xf32> to vector<1x4xf32>
    %124 = vector.shape_cast %123 : vector<1x4xf32> to vector<4xf32>
    %125 = vector.shape_cast %124 : vector<4xf32> to vector<1x1x4xf32>
    %126 = vector.broadcast %125 : vector<1x1x4xf32> to vector<16x16x4xf32>
    %127 = arith.mulf %122, %126 : vector<16x16x4xf32>
    %128 = arith.addf %121, %127 : vector<16x16x4xf32>
    %c1_89 = arith.constant 1 : index
    %c1_90 = arith.constant 1 : index
    %c0_91 = arith.constant 0 : index
    %129 = vector.load %arg10[%c1_89, %c1_90, %c0_91] : memref<18x18x4xf32, #tpu.memory_space<vmem>>, vector<16x16x4xf32>
    %130 = vector.extract_strided_slice %101 {offsets = [4, 0], sizes = [1, 4], strides = [1, 1]} : vector<9x4xf32> to vector<1x4xf32>
    %131 = vector.shape_cast %130 : vector<1x4xf32> to vector<4xf32>
    %132 = vector.shape_cast %131 : vector<4xf32> to vector<1x1x4xf32>
    %133 = vector.broadcast %132 : vector<1x1x4xf32> to vector<16x16x4xf32>
    %134 = arith.mulf %129, %133 : vector<16x16x4xf32>
    %135 = arith.addf %128, %134 : vector<16x16x4xf32>
    %c1_92 = arith.constant 1 : index
    %c2_93 = arith.constant 2 : index
    %c0_94 = arith.constant 0 : index
    %136 = vector.load %arg10[%c1_92, %c2_93, %c0_94] : memref<18x18x4xf32, #tpu.memory_space<vmem>>, vector<16x16x4xf32>
    %137 = vector.extract_strided_slice %101 {offsets = [5, 0], sizes = [1, 4], strides = [1, 1]} : vector<9x4xf32> to vector<1x4xf32>
    %138 = vector.shape_cast %137 : vector<1x4xf32> to vector<4xf32>
    %139 = vector.shape_cast %138 : vector<4xf32> to vector<1x1x4xf32>
    %140 = vector.broadcast %139 : vector<1x1x4xf32> to vector<16x16x4xf32>
    %141 = arith.mulf %136, %140 : vector<16x16x4xf32>
    %142 = arith.addf %135, %141 : vector<16x16x4xf32>
    %c2_95 = arith.constant 2 : index
    %c0_96 = arith.constant 0 : index
    %c0_97 = arith.constant 0 : index
    %143 = vector.load %arg10[%c2_95, %c0_96, %c0_97] : memref<18x18x4xf32, #tpu.memory_space<vmem>>, vector<16x16x4xf32>
    %144 = vector.extract_strided_slice %101 {offsets = [6, 0], sizes = [1, 4], strides = [1, 1]} : vector<9x4xf32> to vector<1x4xf32>
    %145 = vector.shape_cast %144 : vector<1x4xf32> to vector<4xf32>
    %146 = vector.shape_cast %145 : vector<4xf32> to vector<1x1x4xf32>
    %147 = vector.broadcast %146 : vector<1x1x4xf32> to vector<16x16x4xf32>
    %148 = arith.mulf %143, %147 : vector<16x16x4xf32>
    %149 = arith.addf %142, %148 : vector<16x16x4xf32>
    %c2_98 = arith.constant 2 : index
    %c1_99 = arith.constant 1 : index
    %c0_100 = arith.constant 0 : index
    %150 = vector.load %arg10[%c2_98, %c1_99, %c0_100] : memref<18x18x4xf32, #tpu.memory_space<vmem>>, vector<16x16x4xf32>
    %151 = vector.extract_strided_slice %101 {offsets = [7, 0], sizes = [1, 4], strides = [1, 1]} : vector<9x4xf32> to vector<1x4xf32>
    %152 = vector.shape_cast %151 : vector<1x4xf32> to vector<4xf32>
    %153 = vector.shape_cast %152 : vector<4xf32> to vector<1x1x4xf32>
    %154 = vector.broadcast %153 : vector<1x1x4xf32> to vector<16x16x4xf32>
    %155 = arith.mulf %150, %154 : vector<16x16x4xf32>
    %156 = arith.addf %149, %155 : vector<16x16x4xf32>
    %c2_101 = arith.constant 2 : index
    %c2_102 = arith.constant 2 : index
    %c0_103 = arith.constant 0 : index
    %157 = vector.load %arg10[%c2_101, %c2_102, %c0_103] : memref<18x18x4xf32, #tpu.memory_space<vmem>>, vector<16x16x4xf32>
    %158 = vector.extract_strided_slice %101 {offsets = [8, 0], sizes = [1, 4], strides = [1, 1]} : vector<9x4xf32> to vector<1x4xf32>
    %159 = vector.shape_cast %158 : vector<1x4xf32> to vector<4xf32>
    %160 = vector.shape_cast %159 : vector<4xf32> to vector<1x1x4xf32>
    %161 = vector.broadcast %160 : vector<1x1x4xf32> to vector<16x16x4xf32>
    %162 = arith.mulf %157, %161 : vector<16x16x4xf32>
    %163 = arith.addf %156, %162 : vector<16x16x4xf32>
    %164 = vector.shape_cast %163 : vector<16x16x4xf32> to vector<256x4xf32>
    %c0_104 = arith.constant 0 : index
    %c0_105 = arith.constant 0 : index
    %165 = vector.load %arg6[%c0_104, %c0_105] : memref<4x16xf32, #tpu.memory_space<vmem>>, vector<4x16xf32>
    %cst_106 = arith.constant dense<0.000000e+00> : vector<256x16xf32>
    %166 = tpu.matmul %164, %165, %cst_106 {dimension_numbers = #tpu.dot_dimension_numbers<[1], [0], [0], [1], [0, 0, 1, 1], [], []>} : vector<256x4xf32>, vector<4x16xf32>, vector<256x16xf32> -> vector<256x16xf32>
    %167 = vector.shape_cast %166 : vector<256x16xf32> to vector<16x16x16xf32>
    %c0_107 = arith.constant 0 : index
    %c0_108 = arith.constant 0 : index
    %168 = vector.load %arg7[%c0_107, %c0_108] : memref<2x16xf32, #tpu.memory_space<vmem>>, vector<1x16xf32>
    %169 = vector.shape_cast %168 : vector<1x16xf32> to vector<16xf32>
    %170 = vector.shape_cast %169 : vector<16xf32> to vector<1x1x16xf32>
    %171 = vector.broadcast %170 : vector<1x1x16xf32> to vector<16x16x16xf32>
    %172 = arith.mulf %167, %171 : vector<16x16x16xf32>
    %c1_109 = arith.constant 1 : index
    %c0_110 = arith.constant 0 : index
    %173 = vector.load %arg7[%c1_109, %c0_110] : memref<2x16xf32, #tpu.memory_space<vmem>>, vector<1x16xf32>
    %174 = vector.shape_cast %173 : vector<1x16xf32> to vector<16xf32>
    %175 = vector.shape_cast %174 : vector<16xf32> to vector<1x1x16xf32>
    %176 = vector.broadcast %175 : vector<1x1x16xf32> to vector<16x16x16xf32>
    %177 = arith.addf %172, %176 : vector<16x16x16xf32>
    %c0_111 = arith.constant 0 : index
    %c0_112 = arith.constant 0 : index
    %c0_113 = arith.constant 0 : index
    %c0_114 = arith.constant 0 : index
    %178 = vector.load %arg8[%c0_111, %c0_112, %c0_113, %c0_114] : memref<1x16x16x16xf32, #tpu.memory_space<vmem>>, vector<1x16x16x16xf32>
    %179 = vector.shape_cast %178 : vector<1x16x16x16xf32> to vector<16x16x16xf32>
    %180 = vector.shape_cast %177 : vector<16x16x16xf32> to vector<1x16x16x16xf32>
    tpu.vector_store %arg8[%c0_111, %c0_112, %c0_113, %c0_114], %180 {strides = array<i32>} : memref<1x16x16x16xf32, #tpu.memory_space<vmem>>, vector<1x16x16x16xf32>,
    return
  }
  func.func @transform_0(%arg0: i32) -> (i32, i32, i32, i32) {
    %c0_i32 = arith.constant 0 : i32
    %c0_i32_0 = arith.constant 0 : i32
    %c0_i32_1 = arith.constant 0 : i32
    %c0_i32_2 = arith.constant 0 : i32
    return %arg0, %c0_i32, %c0_i32_0, %c0_i32_1 : i32, i32, i32, i32
  }
  func.func @transform_1(%arg0: i32) -> (i32, i32) {
    %c0_i32 = arith.constant 0 : i32
    %c0_i32_0 = arith.constant 0 : i32
    %c0_i32_1 = arith.constant 0 : i32
    return %c0_i32, %c0_i32_0 : i32, i32
  }
  func.func @transform_2(%arg0: i32) -> (i32, i32) {
    %c0_i32 = arith.constant 0 : i32
    %c0_i32_0 = arith.constant 0 : i32
    %c0_i32_1 = arith.constant 0 : i32
    return %c0_i32, %c0_i32_0 : i32, i32
  }
  func.func @transform_3(%arg0: i32) -> (i32, i32) {
    %c0_i32 = arith.constant 0 : i32
    %c0_i32_0 = arith.constant 0 : i32
    %c0_i32_1 = arith.constant 0 : i32
    return %c0_i32, %c0_i32_0 : i32, i32
  }
  func.func @transform_4(%arg0: i32) -> (i32, i32) {
    %c0_i32 = arith.constant 0 : i32
    %c0_i32_0 = arith.constant 0 : i32
    %c0_i32_1 = arith.constant 0 : i32
    return %c0_i32, %c0_i32_0 : i32, i32
  }
  func.func @transform_5(%arg0: i32) -> (i32, i32) {
    %c0_i32 = arith.constant 0 : i32
    %c0_i32_0 = arith.constant 0 : i32
    %c0_i32_1 = arith.constant 0 : i32
    return %c0_i32, %c0_i32_0 : i32, i32
  }
  func.func @transform_6(%arg0: i32) -> (i32, i32) {
    %c0_i32 = arith.constant 0 : i32
    %c0_i32_0 = arith.constant 0 : i32
    %c0_i32_1 = arith.constant 0 : i32
    return %c0_i32, %c0_i32_0 : i32, i32
  }
  func.func @transform_7(%arg0: i32) -> (i32, i32, i32, i32) {
    %c0_i32 = arith.constant 0 : i32
    %c0_i32_0 = arith.constant 0 : i32
    %c0_i32_1 = arith.constant 0 : i32
    %c0_i32_2 = arith.constant 0 : i32
    return %arg0, %c0_i32, %c0_i32_0, %c0_i32_1 : i32, i32, i32, i32
  }
}

</mosaic_0001>

<bundles_post_ra>
// kernel: tpu_custom_call.1
= control target key start
LH: loop header
LB: loop body
LE: loop exit
PB: predicated region body
PF: predicated region fallthrough
CT: control target
= control target key end

     0   :  { %12 = vsyncpa [#allocation5], 0  ;;  %s5527_s0 = inlined_call_operand.vmem [shape: f32[2,16,16,4], index: 0, kind: input, shape index: {}]   ;;  %s5528_s1 = inlined_call_operand.vmem [shape: f32[9,4], index: 1, kind: input, shape index: {}]   ;;  %s5529_s2 = inlined_call_operand.vmem [shape: f32[4,4], index: 2, kind: input, shape index: {}]   ;;  %s5530_s3 = inlined_call_operand.vmem [shape: f32[2,4], index: 3, kind: input, shape index: {}]   ;;  %s5531_s4 = inlined_call_operand.vmem [shape: f32[9,4], index: 4, kind: input, shape index: {}]   ;;  %s5532_s5 = inlined_call_operand.vmem [shape: f32[4,16], index: 5, kind: input, shape index: {}]   ;;  %s5533_s6 = inlined_call_operand.vmem [shape: f32[2,16], index: 6, kind: input, shape index: {}]   ;;  %s5534_s7 = inlined_call_operand.hbm [shape: f32[2,16,16,16], index: 7, kind: output, shape index: {}]  }
   0x1   :  { %14 = vsyncpa [#allocation5 + $0x1], 0  ;;  %s3584_s24 = smov 0   ;;  %s3586_s25 = smov 0  }
   0x2   :  { %s3588_s26 = smov 0   ;;  %s3590_s27 = smov 0  }
   0x3 LB: > { %s3605_s28 = sadd.s32 4294967295, %s3538_s27   ;;  %s3178_s29 = sadd.s32 4294967294, %s3538_s27   ;;  %s3538_s27 = sphi %s3590_s27, %s5540_s27   ;;  %s3534_s26 = sphi %s3588_s26, %s5539_s26   ;;  %s3530_s25 = sphi %s3586_s25, %s5538_s25   ;;  %s3526_s24 = sphi %s3584_s24, %s5537_s24  }
   0x4   : > { %s3609_s30 = sadd.s32 1, %s3538_s27   ;;  %s179_s8 = sadd.s32 1, %s3534_s26 }
   0x5   : > { %s176_s9 = ssub.s32 %s3538_s27, %s3609_s30  ;;  %p189_p0 = scmp.ne.s32.totalorder %s3534_s26, %s3530_s25 }
   0x6   : > { %p177_p1 = scmp.eq.s32.totalorder %s176_s9, 0  ;;  %p190_p2 = scmp.eq.s32.totalorder %s3605_s28, 1 }
   0x7   : > { %p195_p3 = scmp.ne.s32.totalorder %s3530_s25, %s3526_s24  ;;  %p196_p4 = scmp.eq.s32.totalorder %s3178_s29, 1 }
   0x8   : > { %s3620_s10 = scalar_select %p177_p1, %s3534_s26, %s179_s8  }
   0x9   : > { %p3622_p5 = por %p190_p2, %p189_p0  ;;  %p3626_p6 = por %p196_p4, %p195_p3 }
   0xa   : > { %p3181_p7 = scmp.ge.s32.totalorder %s3538_s27, 1  ;;  %p240_p8 = scmp.lt.s32.totalorder %s3538_s27, 3 }
   0xc   : > { %p241_p9 = pnand %p3181_p7, %p240_p8 }
   0xd   : > { %v1291_v0 = vld [vmem:[%s5529_s2] sm:$0xf] (!%p241_p9)  ;;  %vm1388_vm0 = vcmask (!%p241_p9), 1043456   ;;  %p272_p10 = scmp.lt.s32.totalorder (!%p241_p9), %s3605_s28, 1  ;;  %vm277_vm1 = vcmask (!%p241_p9), 31744   ;;  %v454_v1 = vlaneseq (!%p241_p9)  ;;  %v3540_v2 = vmov (!%p241_p9), 0.0  }
   0xe   : > { %244 = sbr.rel (%p241_p9) target bundleno = 706 (0x2c2), region = 48  ;;  %3330 = vmatprep.subr.msk.mxu0 (!%p241_p9), %vm1388_vm0, %v1291_v0  ;;  %278 = vst.msk [vmem:[#allocation2] sm:$0xff] (!%p241_p9), %vm277_vm1, %v3540_v2  ;;  %279 = vst.msk [vmem:[#allocation2 + $0x8] sm:$0xff] (!%p241_p9), %vm277_vm1, %v3540_v2  ;;  %vm286_vm2 = vcmask (!%p241_p9), 24576   ;;  %vm280_vm3 = vcmask (!%p241_p9), 25600   ;;  %v3808_v4 = vld [vmem:[%s5528_s1] sm:$0xff] (!%p241_p9) }
   0xf   : > { %283 = vst.msk [vmem:[#allocation2 + $0x198] sm:$0xff] (!%p241_p9), %vm277_vm1, %v3540_v2  ;;  %284 = vst.msk [vmem:[#allocation2 + $0x1a0] sm:$0xff] (!%p241_p9), %vm277_vm1, %v3540_v2  ;;  %3331 = vmatpush3.msk.msra.mxu0 (!%p241_p9), %vm1388_vm0, %v1291_v0  ;;  %v3665_v3 = vshrl.u32 (!%p241_p9), %v454_v1, 7  ;;  %s269_s14 = sand.u32 (!%p241_p9), 1, %s3530_s25   ;;  %vm3069_vm4 = vcmask (!%p241_p9), 130048   ;;  %s3541_s13 = smov (!%p241_p9), [#allocation4]  }
  0x10   : > { %1691 = vst.msk [vmem:[#allocation3] sm:$0xff] (!%p241_p9), %vm277_vm1, %v3540_v2  ;;  %1692 = vst.msk [vmem:[#allocation3 + $0x8] sm:$0xff] (!%p241_p9), %vm277_vm1, %v3540_v2  ;;  %s3182_s17 = sshll.u32 (!%p241_p9), %s269_s14, 8 }
  0x11   : > { %1695 = vst.msk [vmem:[#allocation3 + $0x198] sm:$0xff] (!%p241_p9), %vm277_vm1, %v3540_v2  ;;  %1696 = vst.msk [vmem:[#allocation3 + $0x1a0] sm:$0xff] (!%p241_p9), %vm277_vm1, %v3540_v2  ;;  %v456_v5 = vsub.s32 (!%p241_p9), 0, %v3665_v3  ;;  %v524_v6 = vsub.s32 (!%p241_p9), 1, %v3665_v3  ;;  %v624_v7 = vsub.s32 (!%p241_p9), 2, %v3665_v3  ;;  %v724_v8 = vsub.s32 (!%p241_p9), 3, %v3665_v3 }
  0x12   : > { %287 = vst.msk [vmem:[#allocation2] sm:$0x1] (!%p241_p9), %vm286_vm2, %v3540_v2  ;;  %288 = vst.msk [vmem:[#allocation2 + $0x18] sm:$0x1] (!%p241_p9), %vm286_vm2, %v3540_v2  ;;  %v824_v9 = vsub.s32 (!%p241_p9), 4, %v3665_v3  ;;  %v924_v10 = vsub.s32 (!%p241_p9), 5, %v3665_v3 }
  0x13   : > { %289 = vst.msk [vmem:[#allocation2 + $0x30] sm:$0x1] (!%p241_p9), %vm286_vm2, %v3540_v2  ;;  %290 = vst.msk [vmem:[#allocation2 + $0x48] sm:$0x1] (!%p241_p9), %vm286_vm2, %v3540_v2  ;;  %v3836_v14 = vrot.slane (!%p241_p9), %v3808_v4, %v456_v5  ;;  %v3841_v15 = vrot.slane (!%p241_p9), %v3808_v4, %v524_v6  ;;  %v1025_v16 = vsub.s32 (!%p241_p9), 6, %v3665_v3  ;;  %v3848_v21 = vrot.slane (!%p241_p9), %v3808_v4, %v624_v7  ;;  %s5349_s20 = scalar_lea.vmem (!%p241_p9), [#allocation4], %s3182_s17 }
  0x14   : > { %291 = vst.msk [vmem:[#allocation2 + $0x60] sm:$0x1] (!%p241_p9), %vm286_vm2, %v3540_v2  ;;  %292 = vst.msk [vmem:[#allocation2 + $0x78] sm:$0x1] (!%p241_p9), %vm286_vm2, %v3540_v2  ;;  %v3855_v27 = vrot.slane (!%p241_p9), %v3808_v4, %v724_v8  ;;  %v3860_v28 = vrot.slane (!%p241_p9), %v3808_v4, %v824_v9  ;;  %v1125_v29 = vsub.s32 (!%p241_p9), 7, %v3665_v3  ;;  %v3870_v33 = vrot.slane (!%p241_p9), %v3808_v4, %v924_v10  ;;  %s3116_s22 = sshll.u32 (!%p241_p9), %s5349_s20, 4  ;;  %s5477_s22 = int_to_ptr.vmem [resolvable:$true] %s3116_s22 }
  0x15   : > { %s3657_s15 = scalar_select %p272_p10, %s3605_s28, 1  ;;  %293 = vst.msk [vmem:[#allocation2 + $0x90] sm:$0x1] %vm286_vm2, %v3540_v2  ;;  %294 = vst.msk [vmem:[#allocation2 + $0xa8] sm:$0x1] %vm286_vm2, %v3540_v2  ;;  %v490_v25 = vld [vmem:[#allocation2 + $0x1] sm:$0xff]  ;;  %v3897_v1 = vrot.slane %v3808_v4, %v1025_v16 }
  0x16   : > { %295 = vst.msk [vmem:[#allocation2 + $0xc0] sm:$0x1] %vm286_vm2, %v3540_v2  ;;  %296 = vst.msk [vmem:[#allocation2 + $0xd8] sm:$0x1] %vm286_vm2, %v3540_v2  ;;  %v590_v26 = vld [vmem:[#allocation2 + $0x2] sm:$0xff]  ;;  %v526_v32 = vmul.f32 %v3841_v15, %v490_v25  ;;  %s3476_s9 = scalar_lea.vmem %s5477_s22, 4096 }
  0x17   : > { %297 = vst.msk [vmem:[#allocation2 + $0xf0] sm:$0x1] %vm286_vm2, %v3540_v2  ;;  %298 = vst.msk [vmem:[#allocation2 + $0x108] sm:$0x1] %vm286_vm2, %v3540_v2  ;;  %s3262_s18 = sshll.u32 %s3657_s15, 8  ;;  %v423_v30 = vld [vmem:[#allocation2 + $0x8] sm:$0xff]  ;;  %v626_v45 = vmul.f32 %v3848_v21, %v590_v26  ;;  %p3477_p11 = scmp.ne.s32.totalorder %s5477_s22, %s3476_s9 }
  0x18   : > { %299 = vst.msk [vmem:[#allocation2 + $0x120] sm:$0x1] %vm286_vm2, %v3540_v2  ;;  %300 = vst.msk [vmem:[#allocation2 + $0x138] sm:$0x1] %vm286_vm2, %v3540_v2  ;;  %s3826_s21 = scalar_lea.vmem %s5527_s0, %s3262_s18  ;;  %v459_v34 = vmul.f32 %v3836_v14, %v423_v30  ;;  %s3480_s15 = sshll.u32 %s3541_s13, 4  ;;  %s3481_s15 = int_to_ptr.vmem [resolvable:$false] %s3480_s15 }
  0x19   : > { %301 = vst.msk [vmem:[#allocation2 + $0x150] sm:$0x1] %vm286_vm2, %v3540_v2  ;;  %302 = vst.msk [vmem:[#allocation2 + $0x168] sm:$0x1] %vm286_vm2, %v3540_v2  ;;  %v323_v11 = vld [vmem:[%s3826_s21] sm:$0xff]  ;;  %v324_v12 = vld [vmem:[%s3826_s21 + $0x8] sm:$0xff]  ;;  %p3478_p12 = pnand %p3477_p11, %p3622_p5  ;;  %p3483_p0 = scmp.lt.s32.totalorder %s5477_s22, %s3481_s15 }
  0x1a   : > { %303 = vst.msk [vmem:[#allocation2 + $0x180] sm:$0x1] %vm286_vm2, %v3540_v2  ;;  %306 = vst.msk [vmem:[#allocation2 + $0x29] sm:$0x1] %vm286_vm2, %v3540_v2  ;;  %v325_v13 = vld [vmem:[%s3826_s21 + $0x10] sm:$0xff]  ;;  %v326_v17 = vld [vmem:[%s3826_s21 + $0x18] sm:$0xff] }
  0x1b   : > { %307 = vst.msk [vmem:[#allocation2 + $0x41] sm:$0x1] %vm286_vm2, %v3540_v2  ;;  %308 = vst.msk [vmem:[#allocation2 + $0x59] sm:$0x1] %vm286_vm2, %v3540_v2  ;;  %v355_v18 = vmax.f32 %v323_v11, 0.0  ;;  %v356_v19 = vmax.f32 %v324_v12, 0.0  ;;  %p3479_p13 = pneg %p3478_p12 }
  0x1c   : > { %309 = vst.msk [vmem:[#allocation2 + $0x71] sm:$0x1] %vm286_vm2, %v3540_v2  ;;  %310 = vst.msk [vmem:[#allocation2 + $0x89] sm:$0x1] %vm286_vm2, %v3540_v2  ;;  %v357_v20 = vmax.f32 %v325_v13, 0.0  ;;  %v327_v22 = vld [vmem:[%s3826_s21 + $0x20] sm:$0xff] }
  0x1d   : > { %311 = vst.msk [vmem:[#allocation2 + $0xa1] sm:$0x1] %vm286_vm2, %v3540_v2  ;;  %312 = vst.msk [vmem:[#allocation2 + $0xb9] sm:$0x1] %vm286_vm2, %v3540_v2  ;;  %v328_v23 = vld [vmem:[%s3826_s21 + $0x28] sm:$0xff]  ;;  %v358_v24 = vmax.f32 %v326_v17, 0.0 }
  0x1e   : > { %313 = vst.msk [vmem:[#allocation2 + $0xd1] sm:$0x1] %vm286_vm2, %v3540_v2  ;;  %314 = vst.msk [vmem:[#allocation2 + $0xe9] sm:$0x1] %vm286_vm2, %v3540_v2  ;;  %v422_v31 = vld [vmem:[#allocation2] sm:$0xff]  ;;  %v359_v36 = vmax.f32 %v327_v22, 0.0 }
  0x1f   : > { %315 = vst.msk [vmem:[#allocation2 + $0x101] sm:$0x1] %vm286_vm2, %v3540_v2  ;;  %316 = vst.msk [vmem:[#allocation2 + $0x119] sm:$0x1] %vm286_vm2, %v3540_v2  ;;  %v329_v37 = vld [vmem:[%s3826_s21 + $0x30] sm:$0xff]  ;;  %v458_v38 = vmul.f32 %v3836_v14, %v422_v31  ;;  %v360_v41 = vmax.f32 %v328_v23, 0.0 }
  0x20   : > { %317 = vst.msk [vmem:[#allocation2 + $0x131] sm:$0x1] %vm286_vm2, %v3540_v2  ;;  %318 = vst.msk [vmem:[#allocation2 + $0x149] sm:$0x1] %vm286_vm2, %v3540_v2  ;;  %v330_v42 = vld [vmem:[%s3826_s21 + $0x38] sm:$0xff]  ;;  %v361_v43 = vmax.f32 %v329_v37, 0.0 }
  0x21   : > { %319 = vst.msk [vmem:[#allocation2 + $0x161] sm:$0x1] %vm286_vm2, %v3540_v2  ;;  %320 = vst.msk [vmem:[#allocation2 + $0x179] sm:$0x1] %vm286_vm2, %v3540_v2  ;;  %v331_v44 = vld [vmem:[%s3826_s21 + $0x40] sm:$0xff]  ;;  %v362_v47 = vmax.f32 %v330_v42, 0.0  ;;  %v558_v52 = vadd.f32 %v526_v32, %v458_v38 }
  0x22   : > { %321 = vst.msk [vmem:[#allocation2 + $0x191] sm:$0x1] %vm286_vm2, %v3540_v2  ;;  %1699 = vst.msk [vmem:[#allocation3 + $0x18] sm:$0x1] %vm286_vm2, %v3540_v2  ;;  %v332_v48 = vld [vmem:[%s3826_s21 + $0x48] sm:$0xff]  ;;  %v363_v49 = vmax.f32 %v331_v44, 0.0 }
  0x23   : > { %1700 = vst.msk [vmem:[#allocation3 + $0x30] sm:$0x1] %vm286_vm2, %v3540_v2  ;;  %1701 = vst.msk [vmem:[#allocation3 + $0x48] sm:$0x1] %vm286_vm2, %v3540_v2  ;;  %v333_v50 = vld [vmem:[%s3826_s21 + $0x50] sm:$0xff]  ;;  %v334_v51 = vld [vmem:[%s3826_s21 + $0x58] sm:$0xff] }
  0x24   : > { %1702 = vst.msk [vmem:[#allocation3 + $0x60] sm:$0x1] %vm286_vm2, %v3540_v2  ;;  %1703 = vst.msk [vmem:[#allocation3 + $0x78] sm:$0x1] %vm286_vm2, %v3540_v2  ;;  %v364_v54 = vmax.f32 %v332_v48, 0.0  ;;  %v365_v55 = vmax.f32 %v333_v50, 0.0 }
  0x25   : > { %1704 = vst.msk [vmem:[#allocation3 + $0x90] sm:$0x1] %vm286_vm2, %v3540_v2  ;;  %1705 = vst.msk [vmem:[#allocation3 + $0xa8] sm:$0x1] %vm286_vm2, %v3540_v2  ;;  %v335_v56 = vld [vmem:[%s3826_s21 + $0x60] sm:$0xff]  ;;  %v336_v57 = vld [vmem:[%s3826_s21 + $0x68] sm:$0xff] }
  0x26   : > { %1706 = vst.msk [vmem:[#allocation3 + $0xc0] sm:$0x1] %vm286_vm2, %v3540_v2  ;;  %1707 = vst.msk [vmem:[#allocation3 + $0xd8] sm:$0x1] %vm286_vm2, %v3540_v2  ;;  %v337_v58 = vld [vmem:[%s3826_s21 + $0x70] sm:$0xff]  ;;  %v366_v59 = vmax.f32 %v334_v51, 0.0 }
  0x27   : > { %1708 = vst.msk [vmem:[#allocation3 + $0xf0] sm:$0x1] %vm286_vm2, %v3540_v2  ;;  %1709 = vst.msk [vmem:[#allocation3 + $0x108] sm:$0x1] %vm286_vm2, %v3540_v2  ;;  %v367_v60 = vmax.f32 %v335_v56, 0.0  ;;  %v368_v61 = vmax.f32 %v336_v57, 0.0 }
  0x28   : > { %1710 = vst.msk [vmem:[#allocation3 + $0x120] sm:$0x1] %vm286_vm2, %v3540_v2  ;;  %1711 = vst.msk [vmem:[#allocation3 + $0x138] sm:$0x1] %vm286_vm2, %v3540_v2  ;;  %v338_v62 = vld [vmem:[%s3826_s21 + $0x78] sm:$0xff]  ;;  %v369_v63 = vmax.f32 %v337_v58, 0.0 }
  0x29   : > { %1712 = vst.msk [vmem:[#allocation3 + $0x150] sm:$0x1] %vm286_vm2, %v3540_v2  ;;  %1713 = vst.msk [vmem:[#allocation3 + $0x168] sm:$0x1] %vm286_vm2, %v3540_v2  ;;  %v339_v0 = vld [vmem:[%s3826_s21 + $0x80] sm:$0xff]  ;;  %v370_v11 = vmax.f32 %v338_v62, 0.0 }
  0x2a   : > { %1714 = vst.msk [vmem:[#allocation3 + $0x180] sm:$0x1] %vm286_vm2, %v3540_v2  ;;  %1717 = vst.msk [vmem:[#allocation3 + $0x29] sm:$0x1] %vm286_vm2, %v3540_v2  ;;  %v340_v12 = vld [vmem:[%s3826_s21 + $0x88] sm:$0xff]  ;;  %v371_v13 = vmax.f32 %v339_v0, 0.0 }
  0x2b   : > { %1718 = vst.msk [vmem:[#allocation3 + $0x41] sm:$0x1] %vm286_vm2, %v3540_v2  ;;  %1719 = vst.msk [vmem:[#allocation3 + $0x59] sm:$0x1] %vm286_vm2, %v3540_v2  ;;  %v341_v17 = vld [vmem:[%s3826_s21 + $0x90] sm:$0xff]  ;;  %v343_v23 = vld [vmem:[%s3826_s21 + $0xa0] sm:$0xff] }
  0x2c   : > { %1720 = vst.msk [vmem:[#allocation3 + $0x71] sm:$0x1] %vm286_vm2, %v3540_v2  ;;  %1721 = vst.msk [vmem:[#allocation3 + $0x89] sm:$0x1] %vm286_vm2, %v3540_v2  ;;  %v345_v25 = vld [vmem:[%s3826_s21 + $0xb0] sm:$0xff]  ;;  %v375_v31 = vmax.f32 %v343_v23, 0.0 }
  0x2d   : > { %1722 = vst.msk [vmem:[#allocation3 + $0xa1] sm:$0x1] %vm286_vm2, %v3540_v2  ;;  %1723 = vst.msk [vmem:[#allocation3 + $0xb9] sm:$0x1] %vm286_vm2, %v3540_v2  ;;  %s3482_s16 = scalar_lea.vmem %s3481_s15, 8192 }
  0x2e   : > { %1724 = vst.msk [vmem:[#allocation3 + $0xd1] sm:$0x1] %vm286_vm2, %v3540_v2  ;;  %1725 = vst.msk [vmem:[#allocation3 + $0xe9] sm:$0x1] %vm286_vm2, %v3540_v2  ;;  %p3484_p1 = scmp.lt.s32.totalorder %s3482_s16, %s3476_s9 }
  0x2f   : > { %1726 = vst.msk [vmem:[#allocation3 + $0x101] sm:$0x1] %vm286_vm2, %v3540_v2  ;;  %1727 = vst.msk [vmem:[#allocation3 + $0x119] sm:$0x1] %vm286_vm2, %v3540_v2 }
  0x30   : > { %1728 = vst.msk [vmem:[#allocation3 + $0x131] sm:$0x1] %vm286_vm2, %v3540_v2  ;;  %1729 = vst.msk [vmem:[#allocation3 + $0x149] sm:$0x1] %vm286_vm2, %v3540_v2  ;;  %p3485_p2 = por %p3484_p1, %p3483_p0 }
  0x31   : > { %1730 = vst.msk [vmem:[#allocation3 + $0x161] sm:$0x1] %vm286_vm2, %v3540_v2  ;;  %1731 = vst.msk [vmem:[#allocation3 + $0x179] sm:$0x1] %vm286_vm2, %v3540_v2 }
  0x32   : > { %1732 = vst.msk [vmem:[#allocation3 + $0x191] sm:$0x1] %vm286_vm2, %v3540_v2  ;;  %304 = vst.msk [vmem:[#allocation2 + $0x198] sm:$0x1] %vm286_vm2, %v3540_v2  ;;  %p3486_p3 = pnand %p3485_p2, %p3479_p13 }
  0x33   : > { %281 = vst.msk [vmem:[#allocation2 + $0x10] sm:$0x3] %vm280_vm3, %v3540_v2  ;;  %285 = vst.msk [vmem:[#allocation2 + $0x1a8] sm:$0x3] %vm280_vm3, %v3540_v2 }
  0x34   : > { %1693 = vst.msk [vmem:[#allocation3 + $0x10] sm:$0x3] %vm280_vm3, %v3540_v2  ;;  %1697 = vst.msk [vmem:[#allocation3 + $0x1a8] sm:$0x3] %vm280_vm3, %v3540_v2 }
  0x35   : > { %1698 = vst.msk [vmem:[#allocation3] sm:$0x1] %vm286_vm2, %v3540_v2  ;;  %1715 = vst.msk [vmem:[#allocation3 + $0x198] sm:$0x1] %vm286_vm2, %v3540_v2 }
  0x36   : > { %305 = vst.msk [vmem:[#allocation2 + $0x11] sm:$0x1] %vm286_vm2, %v3540_v2  ;;  %322 = vst.msk [vmem:[#allocation2 + $0x1a9] sm:$0x1] %vm286_vm2, %v3540_v2 }
  0x37   : > { %1716 = vst.msk [vmem:[#allocation3 + $0x11] sm:$0x1] %vm286_vm2, %v3540_v2  ;;  %1733 = vst.msk [vmem:[#allocation3 + $0x1a9] sm:$0x1] %vm286_vm2, %v3540_v2  ;;  %v3902_v2 = vrot.slane %v3808_v4, %v1125_v29  ;;  %v372_v4 = vmax.f32 %v340_v12, 0.0 }
  0x38   : > { %388 = vst.msk [vmem:[#allocation2 + $0x19] sm:$0xff] %vm277_vm1, %v355_v18  ;;  %389 = vst.msk [vmem:[#allocation2 + $0x21] sm:$0xff] %vm277_vm1, %v356_v19  ;;  %v342_v18 = vld [vmem:[%s3826_s21 + $0x98] sm:$0xff]  ;;  %v658_v19 = vadd.f32 %v626_v45, %v558_v52 }
  0x39   : > { %390 = vst.msk [vmem:[#allocation2 + $0x31] sm:$0xff] %vm277_vm1, %v357_v20  ;;  %391 = vst.msk [vmem:[#allocation2 + $0x39] sm:$0xff] %vm277_vm1, %v358_v24  ;;  %v373_v20 = vmax.f32 %v341_v17, 0.0  ;;  %v374_v22 = vmax.f32 %v342_v18, 0.0  ;;  %v344_v24 = vld [vmem:[%s3826_s21 + $0xa8] sm:$0xff] }
  0x3a   : > { %v491_v35 = vld [vmem:[#allocation2 + $0x9] sm:$0xff]  ;;  %392 = vst.msk [vmem:[#allocation2 + $0x49] sm:$0xff] %vm277_vm1, %v359_v36  ;;  %393 = vst.msk [vmem:[#allocation2 + $0x51] sm:$0xff] %vm277_vm1, %v360_v41  ;;  %v376_v32 = vmax.f32 %v344_v24, 0.0 }
  0x3b   : > { %v527_v39 = vmul.f32 %v3841_v15, %v491_v35  ;;  %394 = vst.msk [vmem:[#allocation2 + $0x61] sm:$0xff] %vm277_vm1, %v361_v43  ;;  %395 = vst.msk [vmem:[#allocation2 + $0x69] sm:$0xff] %vm277_vm1, %v362_v47  ;;  %v3921_v35 = vld [vmem:[%s5528_s1 + $0x8] ss:$0 sm:$0xff] }
  0x3c   : > { %396 = vst.msk [vmem:[#allocation2 + $0x79] sm:$0xff] %vm277_vm1, %v363_v49  ;;  %397 = vst.msk [vmem:[#allocation2 + $0x81] sm:$0xff] %vm277_vm1, %v364_v54 }
  0x3d   : > { %v591_v40 = vld [vmem:[#allocation2 + $0xa] sm:$0xff]  ;;  %v559_v53 = vadd.f32 %v527_v39, %v459_v34  ;;  %398 = vst.msk [vmem:[#allocation2 + $0x91] sm:$0xff] %vm277_vm1, %v365_v55  ;;  %399 = vst.msk [vmem:[#allocation2 + $0x99] sm:$0xff] %vm277_vm1, %v366_v59  ;;  %v377_v34 = vmax.f32 %v345_v25, 0.0 }
  0x3e   : > { %v627_v46 = vmul.f32 %v3848_v21, %v591_v40  ;;  %400 = vst.msk [vmem:[#allocation2 + $0xa9] sm:$0xff] %vm277_vm1, %v367_v60  ;;  %401 = vst.msk [vmem:[#allocation2 + $0xb1] sm:$0xff] %vm277_vm1, %v368_v61 }
  0x3f   : > { %402 = vst.msk [vmem:[#allocation2 + $0xc1] sm:$0xff] %vm277_vm1, %v369_v63  ;;  %v690_v26 = vld [vmem:[#allocation2 + $0x18] sm:$0xff]  ;;  %403 = vst.msk [vmem:[#allocation2 + $0xc9] sm:$0xff] %vm277_vm1, %v370_v11  ;;  %v691_v45 = vld [vmem:[#allocation2 + $0x20] sm:$0xff] }
  0x40   : > { %v790_v30 = vld [vmem:[#allocation2 + $0x19] sm:$0xff]  ;;  %404 = vst.msk [vmem:[#allocation2 + $0xd9] sm:$0xff] %vm277_vm1, %v371_v13  ;;  %v726_v36 = vmul.f32 %v3855_v27, %v690_v26  ;;  %v991_v39 = vld [vmem:[#allocation2 + $0x30] sm:$0xff]  ;;  %v659_v40 = vadd.f32 %v627_v46, %v559_v53  ;;  %v460_v41 = vmul.f32 %v690_v26, %v3836_v14  ;;  %405 = vst.msk [vmem:[#allocation2 + $0xe1] sm:$0xff] %vm277_vm1, %v372_v4 }
  0x41   : > { %v826_v37 = vmul.f32 %v3860_v28, %v790_v30  ;;  %v890_v38 = vld [vmem:[#allocation2 + $0x1a] sm:$0xff]  ;;  %406 = vst.msk [vmem:[#allocation2 + $0xf1] sm:$0xff] %vm277_vm1, %v373_v20  ;;  %407 = vst.msk [vmem:[#allocation2 + $0xf9] sm:$0xff] %vm277_vm1, %v374_v22  ;;  %v1027_v43 = vmul.f32 %v3897_v1, %v991_v39  ;;  %v1091_v44 = vld [vmem:[#allocation2 + $0x31] sm:$0xff]  ;;  %v528_v48 = vmul.f32 %v790_v30, %v3841_v15 }
  0x42   : > { %v926_v42 = vmul.f32 %v3870_v33, %v890_v38  ;;  %v791_v47 = vld [vmem:[#allocation2 + $0x21] sm:$0xff]  ;;  %408 = vst.msk [vmem:[#allocation2 + $0x109] sm:$0xff] %vm277_vm1, %v375_v31  ;;  %409 = vst.msk [vmem:[#allocation2 + $0x111] sm:$0xff] %vm277_vm1, %v376_v32  ;;  %v758_v46 = vadd.f32 %v726_v36, %v658_v19  ;;  %v1127_v49 = vmul.f32 %v3902_v2, %v1091_v44  ;;  %v1191_v50 = vld [vmem:[#allocation2 + $0x32] sm:$0xff] }
  0x43   : > { %410 = vst.msk [vmem:[#allocation2 + $0x121] sm:$0xff] %vm277_vm1, %v377_v34  ;;  %v727_v51 = vmul.f32 %v3855_v27, %v691_v45  ;;  %v827_v52 = vmul.f32 %v3860_v28, %v791_v47  ;;  %v891_v53 = vld [vmem:[#allocation2 + $0x22] sm:$0xff]  ;;  %v3938_v54 = vld [vmem:[#allocation2 + $0x38] sm:$0xff]  ;;  %v1227_v55 = vmul.f32 %v3921_v35, %v1191_v50  ;;  %v560_v58 = vadd.f32 %v528_v48, %v460_v41  ;;  %v3958_v25 = vld [vmem:[#allocation2 + $0x4a] sm:$0xff] }
  0x44   : > { %v927_v56 = vmul.f32 %v3870_v33, %v891_v53  ;;  %v1028_v57 = vmul.f32 %v3897_v1, %v3938_v54  ;;  %v858_v59 = vadd.f32 %v826_v37, %v758_v46  ;;  %v1092_v61 = vld [vmem:[#allocation2 + $0x39] sm:$0xff]  ;;  %v628_v63 = vmul.f32 %v890_v38, %v3848_v21  ;;  %v3950_v18 = vld [vmem:[#allocation2 + $0x48] sm:$0xff]  ;;  %v3969_v48 = vld [vmem:[#allocation2 + $0x50] sm:$0xff] }
  0x45   : > { %v759_v60 = vadd.f32 %v727_v51, %v659_v40  ;;  %v1192_v62 = vld [vmem:[#allocation2 + $0x3a] sm:$0xff]  ;;  %v728_v0 = vmul.f32 %v991_v39, %v3855_v27  ;;  %v1128_v11 = vmul.f32 %v3902_v2, %v1092_v61  ;;  %v828_v13 = vmul.f32 %v1091_v44, %v3860_v28  ;;  %v3954_v23 = vld [vmem:[#allocation2 + $0x49] sm:$0xff] }
  0x46   : > { %v1228_v12 = vmul.f32 %v3921_v35, %v1192_v62  ;;  %v928_v17 = vmul.f32 %v1191_v50, %v3870_v33  ;;  %v958_v19 = vadd.f32 %v926_v42, %v858_v59  ;;  %v660_v20 = vadd.f32 %v628_v63, %v560_v58 }
  0x47   : > { %v859_v4 = vadd.f32 %v827_v52, %v759_v60  ;;  %v1029_v22 = vmul.f32 %v3897_v1, %v3950_v18  ;;  %v1129_v24 = vmul.f32 %v3902_v2, %v3954_v23  ;;  %v461_v26 = vmul.f32 %v691_v45, %v3836_v14  ;;  %v3973_v52 = vld [vmem:[#allocation2 + $0x51] sm:$0xff] }
  0x48   : > { %v529_v30 = vmul.f32 %v791_v47, %v3841_v15  ;;  %v629_v31 = vmul.f32 %v891_v53, %v3848_v21  ;;  %v1059_v32 = vadd.f32 %v1027_v43, %v958_v19  ;;  %v760_v36 = vadd.f32 %v728_v0, %v660_v20 }
  0x49   : > { %v959_v34 = vadd.f32 %v927_v56, %v859_v4  ;;  %v1229_v37 = vmul.f32 %v3921_v35, %v3958_v25  ;;  %v729_v40 = vmul.f32 %v3938_v54, %v3855_v27  ;;  %v829_v41 = vmul.f32 %v1092_v61, %v3860_v28 }
  0x4a   : > { %v561_v38 = vadd.f32 %v529_v30, %v461_v26  ;;  %v929_v42 = vmul.f32 %v1192_v62, %v3870_v33  ;;  %v1159_v45 = vadd.f32 %v1127_v49, %v1059_v32  ;;  %v860_v46 = vadd.f32 %v828_v13, %v760_v36  ;;  %v3992_v30 = vld [vmem:[#allocation2 + $0x61] sm:$0xff] }
  0x4b   : > { %v1060_v47 = vadd.f32 %v1028_v57, %v959_v34  ;;  %v1030_v43 = vmul.f32 %v3897_v1, %v3969_v48  ;;  %v462_v53 = vmul.f32 %v991_v39, %v3836_v14  ;;  %v530_v56 = vmul.f32 %v1091_v44, %v3841_v15  ;;  %v1194_v57 = vld [vmem:[#allocation2 + $0x52] sm:$0xff]  ;;  %v3999_v32 = vld [vmem:[#allocation2 + $0x62] sm:$0xff] }
  0x4c   : > { %v661_v51 = vadd.f32 %v629_v31, %v561_v38  ;;  %v630_v58 = vmul.f32 %v1191_v50, %v3848_v21  ;;  %v1259_v59 = vadd.f32 %v1227_v55, %v1159_v45  ;;  %v960_v63 = vadd.f32 %v928_v17, %v860_v46 }
  0x4d   : > { %v1160_v60 = vadd.f32 %v1128_v11, %v1060_v47  ;;  %v1130_v49 = vmul.f32 %v3902_v2, %v3973_v52  ;;  %v1230_v13 = vmul.f32 %v3921_v35, %v1194_v57  ;;  %v562_v19 = vadd.f32 %v530_v56, %v462_v53  ;;  %v3988_v11 = vld [vmem:[#allocation2 + $0x60] sm:$0xff] }
  0x4e   : > { %v761_v0 = vadd.f32 %v729_v40, %v661_v51  ;;  %v730_v4 = vmul.f32 %v3950_v18, %v3855_v27  ;;  %3332 = vmatprep.mubr.msk.f32.mxu0 %vm277_vm1, %v1259_v59  ;;  %v1061_v44 = vadd.f32 %v1029_v22, %v960_v63  ;;  %v830_v50 = vmul.f32 %v3954_v23, %v3860_v28  ;;  %v4010_v51 = vld [vmem:[#allocation2 + $0x68] sm:$0xff] }
  0x4f   : > { %v1260_v39 = vadd.f32 %v1228_v12, %v1160_v60  ;;  %v930_v55 = vmul.f32 %v3958_v25, %v3870_v33  ;;  %v662_v20 = vadd.f32 %v630_v58, %v562_v19  ;;  %v1031_v26 = vmul.f32 %v3897_v1, %v3988_v11  ;;  %v4021_v59 = vld [vmem:[#allocation2 + $0x6a] sm:$0xff] }
  0x50   : > { %v861_v17 = vadd.f32 %v829_v41, %v761_v0  ;;  %v463_v31 = vmul.f32 %v3938_v54, %v3836_v14  ;;  %v1161_v12 = vadd.f32 %v1129_v24, %v1061_v44  ;;  %v1131_v22 = vmul.f32 %v3902_v2, %v3992_v30 }
  0x51   : > { %3333 = vmatmul.mubr.msk.f32.vlgmr.msra.gmra.mrb[0].mxu0 %vm277_vm1, %v1260_v39  ;;  %v531_v34 = vmul.f32 %v1092_v61, %v3841_v15  ;;  %v631_v36 = vmul.f32 %v1192_v62, %v3848_v21  ;;  %v762_v40 = vadd.f32 %v730_v4, %v662_v20  ;;  %v1231_v41 = vmul.f32 %v3921_v35, %v3999_v32 }
  0x52   : > { %v961_v38 = vadd.f32 %v929_v42, %v861_v17  ;;  %v731_v54 = vmul.f32 %v3969_v48, %v3855_v27  ;;  %v1261_v45 = vadd.f32 %v1229_v37, %v1161_v12  ;;  %v831_v24 = vmul.f32 %v3973_v52, %v3860_v28  ;;  %v4014_v42 = vld [vmem:[#allocation2 + $0x69] sm:$0xff]  ;;  %v4041_v12 = vld [vmem:[#allocation2 + $0x79] sm:$0xff] }
  0x53   : > { %v563_v47 = vadd.f32 %v531_v34, %v463_v31  ;;  %v931_v46 = vmul.f32 %v1194_v57, %v3870_v33  ;;  %v862_v53 = vadd.f32 %v830_v50, %v762_v40  ;;  %v1032_v62 = vmul.f32 %v3897_v1, %v4010_v51  ;;  %v4043_v34 = vld [vmem:[#allocation2 + $0x7a] sm:$0xff] }
  0x54   : > { %v1062_v61 = vadd.f32 %v1030_v43, %v961_v38  ;;  %v464_v56 = vmul.f32 %v3950_v18, %v3836_v14  ;;  %3335 = vmatprep.mubr.msk.f32.mxu0 %vm277_vm1, %v1261_v45  ;;  %v1132_v58 = vmul.f32 %v3902_v2, %v4014_v42  ;;  %v532_v43 = vmul.f32 %v3954_v23, %v3841_v15  ;;  %v4035_v23 = vld [vmem:[#allocation2 + $0x78] sm:$0xff] }
  0x55   : > { %v663_v37 = vadd.f32 %v631_v36, %v563_v47  ;;  %v632_v60 = vmul.f32 %v3958_v25, %v3848_v21  ;;  %v962_v0 = vadd.f32 %v930_v55, %v862_v53  ;;  %v1232_v19 = vmul.f32 %v3921_v35, %v4021_v59 }
  0x56   : > { %v1162_v63 = vadd.f32 %v1130_v49, %v1062_v61  ;;  %v732_v18 = vmul.f32 %v3988_v11, %v3855_v27  ;;  %v564_v39 = vadd.f32 %v532_v43, %v464_v56  ;;  %v832_v44 = vmul.f32 %v3992_v30, %v3860_v28  ;;  %v4065_v43 = vld [vmem:[#allocation2 + $0x81] sm:$0xff] }
  0x57   : > { %v763_v4 = vadd.f32 %v731_v54, %v663_v37  ;;  %v932_v50 = vmul.f32 %v3999_v32, %v3870_v33  ;;  %v1063_v25 = vadd.f32 %v1031_v26, %v962_v0  ;;  %v1033_v49 = vmul.f32 %v3897_v1, %v4035_v23 }
  0x58   : > { %v1262_v17 = vadd.f32 %v1230_v13, %v1162_v63  ;;  %v465_v55 = vmul.f32 %v3969_v48, %v3836_v14  ;;  %v664_v31 = vadd.f32 %v632_v60, %v564_v39  ;;  %v533_v36 = vmul.f32 %v3973_v52, %v3841_v15  ;;  %v4067_v60 = vld [vmem:[#allocation2 + $0x82] sm:$0xff] }
  0x59   : > { %v863_v20 = vadd.f32 %v831_v24, %v763_v4  ;;  %v633_v38 = vmul.f32 %v1194_v57, %v3848_v21  ;;  %v1163_v13 = vadd.f32 %v1131_v22, %v1063_v25  ;;  %v1133_v26 = vmul.f32 %v3902_v2, %v4041_v12  ;;  %v4057_v24 = vld [vmem:[#allocation2 + $0x80] sm:$0xff] }
  0x5a   : > { %3336 = vmatmul.mubr.msk.f32.gmra.mrb[2].mxu0 %vm277_vm1, %v1262_v17  ;;  %v1233_v48 = vmul.f32 %v3921_v35, %v4043_v34  ;;  %v733_v40 = vmul.f32 %v4010_v51, %v3855_v27  ;;  %v764_v45 = vadd.f32 %v732_v18, %v664_v31  ;;  %v565_v47 = vadd.f32 %v533_v36, %v465_v55  ;;  %v4080_v17 = vld [vmem:[#allocation2 + $0x90] sm:$0xff] }
  0x5b   : > { %v963_v54 = vadd.f32 %v931_v46, %v863_v20  ;;  %v833_v52 = vmul.f32 %v4014_v42, %v3860_v28  ;;  %v1263_v57 = vadd.f32 %v1231_v41, %v1163_v13  ;;  %v933_v22 = vmul.f32 %v4021_v59, %v3870_v33  ;;  %v4090_v36 = vld [vmem:[#allocation2 + $0x91] sm:$0xff] }
  0x5c   : > { %v1034_v61 = vmul.f32 %v3897_v1, %v4057_v24  ;;  %v466_v53 = vmul.f32 %v3988_v11, %v3836_v14  ;;  %v864_v37 = vadd.f32 %v832_v44, %v764_v45  ;;  %v665_v46 = vadd.f32 %v633_v38, %v565_v47  ;;  %v4092_v38 = vld [vmem:[#allocation2 + $0x92] sm:$0xff] }
  0x5d   : > { %v1064_v56 = vadd.f32 %v1032_v62, %v963_v54  ;;  %v534_v63 = vmul.f32 %v3992_v30, %v3841_v15  ;;  %3338 = vmatprep.mubr.msk.f32.mxu0 %vm277_vm1, %v1263_v57  ;;  %v1134_v41 = vmul.f32 %v3902_v2, %v4065_v43  ;;  %v1234_v0 = vmul.f32 %v3921_v35, %v4067_v60 }
  0x5e   : > { %v634_v11 = vmul.f32 %v3999_v32, %v3848_v21  ;;  %v734_v62 = vmul.f32 %v4035_v23, %v3855_v27  ;;  %v964_v4 = vadd.f32 %v932_v50, %v864_v37  ;;  %v765_v39 = vadd.f32 %v733_v40, %v665_v46 }
  0x5f   : > { %v1164_v18 = vadd.f32 %v1132_v58, %v1064_v56  ;;  %v566_v44 = vadd.f32 %v534_v63, %v466_v53  ;;  %v834_v30 = vmul.f32 %v4041_v12, %v3860_v28  ;;  %v934_v25 = vmul.f32 %v4043_v34, %v3870_v33 }
  0x60   : > { %v1035_v55 = vmul.f32 %v3897_v1, %v4080_v17  ;;  %v467_v32 = vmul.f32 %v4010_v51, %v3836_v14  ;;  %v1065_v31 = vadd.f32 %v1033_v49, %v964_v4  ;;  %v865_v58 = vadd.f32 %v833_v52, %v765_v39  ;;  %v4105_v52 = vld [vmem:[#allocation2 + $0x98] sm:$0xff] }
  0x61   : > { %v1264_v20 = vadd.f32 %v1232_v19, %v1164_v18  ;;  %v666_v50 = vadd.f32 %v634_v11, %v566_v44  ;;  %v1135_v13 = vmul.f32 %v3902_v2, %v4090_v36  ;;  %v1235_v40 = vmul.f32 %v3921_v35, %v4092_v38 }
  0x62   : > { %v535_v54 = vmul.f32 %v4014_v42, %v3841_v15  ;;  %v635_v51 = vmul.f32 %v4021_v59, %v3848_v21  ;;  %v1165_v19 = vadd.f32 %v1133_v26, %v1065_v31  ;;  %v965_v49 = vadd.f32 %v933_v22, %v865_v58  ;;  %v4113_v22 = vld [vmem:[#allocation2 + $0x99] sm:$0xff] }
  0x63   : > { %3339 = vmatmul.mubr.msk.f32.gmra.mrb[4].mxu0 %vm277_vm1, %v1264_v20  ;;  %v766_v45 = vadd.f32 %v734_v62, %v666_v50  ;;  %v735_v47 = vmul.f32 %v4057_v24, %v3855_v27  ;;  %v835_v53 = vmul.f32 %v4065_v43, %v3860_v28  ;;  %v935_v42 = vmul.f32 %v4067_v60, %v3870_v33  ;;  %v4119_v62 = vld [vmem:[#allocation2 + $0x9a] sm:$0xff]  ;;  %v4134_v20 = vld [vmem:[#allocation2 + $0xa8] sm:$0xff] }
  0x64   : > { %v567_v57 = vadd.f32 %v535_v54, %v467_v32  ;;  %v1036_v59 = vmul.f32 %v3897_v1, %v4105_v52  ;;  %v1265_v56 = vadd.f32 %v1233_v48, %v1165_v19  ;;  %v1066_v37 = vadd.f32 %v1034_v61, %v965_v49  ;;  %v4140_v54 = vld [vmem:[#allocation2 + $0xa9] sm:$0xff] }
  0x65   : > { %v866_v26 = vadd.f32 %v834_v30, %v766_v45  ;;  %v468_v46 = vmul.f32 %v4035_v23, %v3836_v14  ;;  %v1136_v11 = vmul.f32 %v3902_v2, %v4113_v22  ;;  %v536_v18 = vmul.f32 %v4041_v12, %v3841_v15 }
  0x66   : > { %v667_v63 = vadd.f32 %v635_v51, %v567_v57  ;;  %v636_v4 = vmul.f32 %v4043_v34, %v3848_v21  ;;  %3341 = vmatprep.mubr.msk.f32.mxu0 %vm277_vm1, %v1265_v56  ;;  %v1166_v48 = vadd.f32 %v1134_v41, %v1066_v37  ;;  %v1236_v39 = vmul.f32 %v3921_v35, %v4119_v62  ;;  %v4142_v51 = vld [vmem:[#allocation2 + $0xaa] sm:$0xff] }
  0x67   : > { %v966_v61 = vadd.f32 %v934_v25, %v866_v26  ;;  %v736_v23 = vmul.f32 %v4080_v17, %v3855_v27  ;;  %v568_v30 = vadd.f32 %v536_v18, %v468_v46  ;;  %v836_v32 = vmul.f32 %v4090_v36, %v3860_v28  ;;  %v4157_v56 = vld [vmem:[#allocation2 + $0xb0] sm:$0xff] }
  0x68   : > { %v767_v44 = vadd.f32 %v735_v47, %v667_v63  ;;  %v936_v12 = vmul.f32 %v4092_v38, %v3870_v33  ;;  %v1266_v34 = vadd.f32 %v1234_v0, %v1166_v48  ;;  %v1037_v41 = vmul.f32 %v3897_v1, %v4134_v20  ;;  %v4165_v18 = vld [vmem:[#allocation2 + $0xb1] sm:$0xff] }
  0x69   : > { %v1067_v31 = vadd.f32 %v1035_v55, %v966_v61  ;;  %v469_v25 = vmul.f32 %v4057_v24, %v3836_v14  ;;  %v668_v50 = vadd.f32 %v636_v4, %v568_v30  ;;  %v537_v19 = vmul.f32 %v4065_v43, %v3841_v15  ;;  %v4167_v4 = vld [vmem:[#allocation2 + $0xb2] sm:$0xff] }
  0x6a   : > { %v867_v58 = vadd.f32 %v835_v53, %v767_v44  ;;  %v637_v49 = vmul.f32 %v4067_v60, %v3848_v21  ;;  %3342 = vmatmul.mubr.msk.f32.gmra.mrb[6].mxu0 %vm277_vm1, %v1266_v34  ;;  %v1137_v55 = vmul.f32 %v3902_v2, %v4140_v54  ;;  %v1237_v24 = vmul.f32 %v3921_v35, %v4142_v51  ;;  %v4180_v34 = vld [vmem:[#allocation2 + $0xc0] sm:$0xff] }
  0x6b   : > { %v1167_v0 = vadd.f32 %v1135_v13, %v1067_v31  ;;  %v737_v45 = vmul.f32 %v4105_v52, %v3855_v27  ;;  %v768_v57 = vadd.f32 %v736_v23, %v668_v50  ;;  %v569_v53 = vadd.f32 %v537_v19, %v469_v25  ;;  %v4190_v19 = vld [vmem:[#allocation2 + $0xc1] sm:$0xff] }
  0x6c   : > { %v967_v47 = vadd.f32 %v935_v42, %v867_v58  ;;  %v837_v43 = vmul.f32 %v4113_v22, %v3860_v28  ;;  %v937_v13 = vmul.f32 %v4119_v62, %v3870_v33  ;;  %v1038_v37 = vmul.f32 %v3897_v1, %v4157_v56 }
  0x6d   : > { %v1267_v60 = vadd.f32 %v1235_v40, %v1167_v0  ;;  %v470_v26 = vmul.f32 %v4080_v17, %v3836_v14  ;;  %v868_v63 = vadd.f32 %v836_v32, %v768_v57  ;;  %v669_v42 = vadd.f32 %v637_v49, %v569_v53  ;;  %v4192_v49 = vld [vmem:[#allocation2 + $0xc2] sm:$0xff] }
  0x6e   : > { %v1068_v46 = vadd.f32 %v1036_v59, %v967_v47  ;;  %v538_v48 = vmul.f32 %v4090_v36, %v3841_v15  ;;  %v1138_v40 = vmul.f32 %v3902_v2, %v4165_v18  ;;  %v1238_v61 = vmul.f32 %v3921_v35, %v4167_v4 }
  0x6f   : > { %3344 = vmatprep.mubr.msk.f32.mxu0 %vm277_vm1, %v1267_v60  ;;  %v638_v17 = vmul.f32 %v4092_v38, %v3848_v21  ;;  %v738_v59 = vmul.f32 %v4134_v20, %v3855_v27  ;;  %v968_v44 = vadd.f32 %v936_v12, %v868_v63  ;;  %v769_v30 = vadd.f32 %v737_v45, %v669_v42 }
  0x70   : > { %v1168_v23 = vadd.f32 %v1136_v11, %v1068_v46  ;;  %v570_v32 = vadd.f32 %v538_v48, %v470_v26  ;;  %v838_v36 = vmul.f32 %v4140_v54, %v3860_v28  ;;  %v938_v31 = vmul.f32 %v4142_v51, %v3870_v33 }
  0x71   : > { %v1039_v25 = vmul.f32 %v3897_v1, %v4180_v34  ;;  %v471_v38 = vmul.f32 %v4105_v52, %v3836_v14  ;;  %v1069_v50 = vadd.f32 %v1037_v41, %v968_v44  ;;  %v869_v11 = vadd.f32 %v837_v43, %v769_v30  ;;  %v4205_v43 = vld [vmem:[#allocation2 + $0xc8] sm:$0xff] }
  0x72   : > { %v1268_v58 = vadd.f32 %v1236_v39, %v1168_v23  ;;  %v670_v12 = vadd.f32 %v638_v17, %v570_v32  ;;  %v1139_v0 = vmul.f32 %v3902_v2, %v4190_v19  ;;  %v1239_v45 = vmul.f32 %v3921_v35, %v4192_v49 }
  0x73   : > { %v539_v47 = vmul.f32 %v4113_v22, %v3841_v15  ;;  %v639_v52 = vmul.f32 %v4119_v62, %v3848_v21  ;;  %v1169_v39 = vadd.f32 %v1137_v55, %v1069_v50  ;;  %v969_v41 = vadd.f32 %v937_v13, %v869_v11  ;;  %v4213_v13 = vld [vmem:[#allocation2 + $0xc9] sm:$0xff] }
  0x74   : > { %3345 = vmatmul.mubr.msk.f32.gmra.mrb[8].mxu0 %vm277_vm1, %v1268_v58  ;;  %v770_v57 = vadd.f32 %v738_v59, %v670_v12  ;;  %v739_v53 = vmul.f32 %v4157_v56, %v3855_v27  ;;  %v839_v26 = vmul.f32 %v4165_v18, %v3860_v28  ;;  %v939_v22 = vmul.f32 %v4167_v4, %v3870_v33  ;;  %v4219_v59 = vld [vmem:[#allocation2 + $0xca] sm:$0xff]  ;;  %v4234_v58 = vld [vmem:[#allocation2 + $0xd8] sm:$0xff] }
  0x75   : > { %v571_v60 = vadd.f32 %v539_v47, %v471_v38  ;;  %v1040_v62 = vmul.f32 %v3897_v1, %v4205_v43  ;;  %v1269_v46 = vadd.f32 %v1237_v24, %v1169_v39  ;;  %v1070_v63 = vadd.f32 %v1038_v37, %v969_v41  ;;  %v4240_v47 = vld [vmem:[#allocation2 + $0xd9] sm:$0xff] }
  0x76   : > { %v870_v55 = vadd.f32 %v838_v36, %v770_v57  ;;  %v472_v42 = vmul.f32 %v4134_v20, %v3836_v14  ;;  %v1140_v17 = vmul.f32 %v3902_v2, %v4213_v13  ;;  %v540_v23 = vmul.f32 %v4140_v54, %v3841_v15 }
  0x77   : > { %v671_v48 = vadd.f32 %v639_v52, %v571_v60  ;;  %v640_v44 = vmul.f32 %v4142_v51, %v3848_v21  ;;  %3347 = vmatprep.mubr.msk.f32.mxu0 %vm277_vm1, %v1269_v46  ;;  %v1170_v24 = vadd.f32 %v1138_v40, %v1070_v63  ;;  %v1240_v30 = vmul.f32 %v3921_v35, %v4219_v59  ;;  %v4242_v52 = vld [vmem:[#allocation2 + $0xda] sm:$0xff] }
  0x78   : > { %v970_v37 = vadd.f32 %v938_v31, %v870_v55  ;;  %v740_v20 = vmul.f32 %v4180_v34, %v3855_v27  ;;  %v572_v36 = vadd.f32 %v540_v23, %v472_v42  ;;  %v840_v38 = vmul.f32 %v4190_v19, %v3860_v28  ;;  %v4257_v46 = vld [vmem:[#allocation2 + $0xe0] sm:$0xff] }
  0x79   : > { %v771_v32 = vadd.f32 %v739_v53, %v671_v48  ;;  %v940_v54 = vmul.f32 %v4192_v49, %v3870_v33  ;;  %v1270_v51 = vadd.f32 %v1238_v61, %v1170_v24  ;;  %v1041_v40 = vmul.f32 %v3897_v1, %v4234_v58  ;;  %v4265_v23 = vld [vmem:[#allocation2 + $0xe1] sm:$0xff] }
  0x7a   : > { %v1071_v50 = vadd.f32 %v1039_v25, %v970_v37  ;;  %v473_v31 = vmul.f32 %v4157_v56, %v3836_v14  ;;  %v672_v12 = vadd.f32 %v640_v44, %v572_v36  ;;  %v541_v39 = vmul.f32 %v4165_v18, %v3841_v15  ;;  %v4267_v44 = vld [vmem:[#allocation2 + $0xe2] sm:$0xff] }
  0x7b   : > { %v871_v11 = vadd.f32 %v839_v26, %v771_v32  ;;  %v641_v41 = vmul.f32 %v4167_v4, %v3848_v21  ;;  %3348 = vmatmul.mubr.msk.f32.gmra.mrb[10].mxu0 %vm277_vm1, %v1270_v51  ;;  %v1141_v25 = vmul.f32 %v3902_v2, %v4240_v47  ;;  %v1241_v56 = vmul.f32 %v3921_v35, %v4242_v52  ;;  %v4280_v51 = vld [vmem:[#allocation2 + $0xf0] sm:$0xff] }
  0x7c   : > { %v1171_v61 = vadd.f32 %v1139_v0, %v1071_v50  ;;  %v741_v57 = vmul.f32 %v4205_v43, %v3855_v27  ;;  %v772_v60 = vadd.f32 %v740_v20, %v672_v12  ;;  %v573_v26 = vadd.f32 %v541_v39, %v473_v31  ;;  %v4290_v39 = vld [vmem:[#allocation2 + $0xf1] sm:$0xff] }
  0x7d   : > { %v971_v53 = vadd.f32 %v939_v22, %v871_v11  ;;  %v841_v18 = vmul.f32 %v4213_v13, %v3860_v28  ;;  %v941_v0 = vmul.f32 %v4219_v59, %v3870_v33  ;;  %v1042_v63 = vmul.f32 %v3897_v1, %v4257_v46 }
  0x7e   : > { %v1271_v4 = vadd.f32 %v1239_v45, %v1171_v61  ;;  %v474_v55 = vmul.f32 %v4180_v34, %v3836_v14  ;;  %v872_v48 = vadd.f32 %v840_v38, %v772_v60  ;;  %v673_v22 = vadd.f32 %v641_v41, %v573_v26  ;;  %v4292_v41 = vld [vmem:[#allocation2 + $0xf2] sm:$0xff] }
  0x7f   : > { %v1072_v42 = vadd.f32 %v1040_v62, %v971_v53  ;;  %v542_v24 = vmul.f32 %v4190_v19, %v3841_v15  ;;  %v1142_v45 = vmul.f32 %v3902_v2, %v4265_v23  ;;  %v1242_v37 = vmul.f32 %v3921_v35, %v4267_v44 }
  0x80   : > { %3350 = vmatprep.mubr.msk.f32.mxu0 %vm277_vm1, %v1271_v4  ;;  %v642_v34 = vmul.f32 %v4192_v49, %v3848_v21  ;;  %v742_v62 = vmul.f32 %v4234_v58, %v3855_v27  ;;  %v972_v32 = vadd.f32 %v940_v54, %v872_v48  ;;  %v773_v36 = vadd.f32 %v741_v57, %v673_v22 }
  0x81   : > { %v1172_v20 = vadd.f32 %v1140_v17, %v1072_v42  ;;  %v574_v38 = vadd.f32 %v542_v24, %v474_v55  ;;  %v842_v19 = vmul.f32 %v4240_v47, %v3860_v28  ;;  %v942_v50 = vmul.f32 %v4242_v52, %v3870_v33 }
  0x82   : > { %v1043_v31 = vmul.f32 %v3897_v1, %v4280_v51  ;;  %v475_v49 = vmul.f32 %v4205_v43, %v3836_v14  ;;  %v1073_v12 = vadd.f32 %v1041_v40, %v972_v32  ;;  %v873_v17 = vadd.f32 %v841_v18, %v773_v36  ;;  %v4305_v18 = vld [vmem:[#allocation2 + $0xf8] sm:$0xff] }
  0x83   : > { %v1272_v11 = vadd.f32 %v1240_v30, %v1172_v20  ;;  %v674_v54 = vadd.f32 %v642_v34, %v574_v38  ;;  %v1143_v61 = vmul.f32 %v3902_v2, %v4290_v39  ;;  %v1243_v57 = vmul.f32 %v3921_v35, %v4292_v41 }
  0x84   : > { %v543_v53 = vmul.f32 %v4213_v13, %v3841_v15  ;;  %v643_v43 = vmul.f32 %v4219_v59, %v3848_v21  ;;  %v1173_v30 = vadd.f32 %v1141_v25, %v1073_v12  ;;  %v973_v40 = vadd.f32 %v941_v0, %v873_v17  ;;  %v4313_v0 = vld [vmem:[#allocation2 + $0xf9] sm:$0xff] }
  0x85   : > { %3351 = vmatmul.mubr.msk.f32.gmra.mrb[12].mxu0 %vm277_vm1, %v1272_v11  ;;  %v774_v60 = vadd.f32 %v742_v62, %v674_v54  ;;  %v743_v26 = vmul.f32 %v4257_v46, %v3855_v27  ;;  %v843_v55 = vmul.f32 %v4265_v23, %v3860_v28  ;;  %v943_v13 = vmul.f32 %v4267_v44, %v3870_v33  ;;  %v4319_v62 = vld [vmem:[#allocation2 + $0xfa] sm:$0xff] }
  0x86   : > { %v575_v4 = vadd.f32 %v543_v53, %v475_v49  ;;  %v1044_v59 = vmul.f32 %v3897_v1, %v4305_v18  ;;  %v1273_v42 = vadd.f32 %v1241_v56, %v1173_v30  ;;  %v1074_v48 = vadd.f32 %v1042_v63, %v973_v40  ;;  %v4340_v53 = vld [vmem:[#allocation2 + $0x109] sm:$0xff] }
  0x87   : > { %v874_v25 = vadd.f32 %v842_v19, %v774_v60  ;;  %v476_v22 = vmul.f32 %v4234_v58, %v3836_v14  ;;  %v1144_v34 = vmul.f32 %v3902_v2, %v4313_v0  ;;  %v544_v20 = vmul.f32 %v4240_v47, %v3841_v15 }
  0x88   : > { %v675_v24 = vadd.f32 %v643_v43, %v575_v4  ;;  %v644_v32 = vmul.f32 %v4242_v52, %v3848_v21  ;;  %3353 = vmatprep.mubr.msk.f32.mxu0 %vm277_vm1, %v1273_v42  ;;  %v1174_v56 = vadd.f32 %v1142_v45, %v1074_v48  ;;  %v1244_v36 = vmul.f32 %v3921_v35, %v4319_v62  ;;  %v4334_v52 = vld [vmem:[#allocation2 + $0x108] sm:$0xff] }
  0x89   : > { %v974_v63 = vadd.f32 %v942_v50, %v874_v25  ;;  %v744_v58 = vmul.f32 %v4280_v51, %v3855_v27  ;;  %v576_v19 = vadd.f32 %v544_v20, %v476_v22  ;;  %v844_v49 = vmul.f32 %v4290_v39, %v3860_v28  ;;  %v4342_v43 = vld [vmem:[#allocation2 + $0x10a] sm:$0xff] }
  0x8a   : > { %v775_v38 = vadd.f32 %v743_v26, %v675_v24  ;;  %v944_v47 = vmul.f32 %v4292_v41, %v3870_v33  ;;  %v1274_v11 = vadd.f32 %v1242_v37, %v1174_v56  ;;  %v1045_v50 = vmul.f32 %v3897_v1, %v4334_v52  ;;  %v346_v37 = vld [vmem:[%s3826_s21 + $0xb8] sm:$0xff] }
  0x8b   : > { %v1075_v45 = vadd.f32 %v1043_v31, %v974_v63  ;;  %v477_v12 = vmul.f32 %v4257_v46, %v3836_v14  ;;  %v676_v54 = vadd.f32 %v644_v32, %v576_v19  ;;  %v545_v30 = vmul.f32 %v4265_v23, %v3841_v15  ;;  %v4364_v56 = vld [vmem:[#allocation2 + $0x111] sm:$0xff] }
  0x8c   : > { %v875_v17 = vadd.f32 %v843_v55, %v775_v38  ;;  %v645_v40 = vmul.f32 %v4267_v44, %v3848_v21  ;;  %3354 = vmatmul.mubr.msk.f32.gmra.mrb[14].mxu0 %vm277_vm1, %v1274_v11  ;;  %v1145_v60 = vmul.f32 %v3902_v2, %v4340_v53  ;;  %v1245_v46 = vmul.f32 %v3921_v35, %v4342_v43  ;;  %v4358_v44 = vld [vmem:[#allocation2 + $0x110] sm:$0xff] }
  0x8d   : > { %v1175_v31 = vadd.f32 %v1143_v61, %v1075_v45  ;;  %v745_v26 = vmul.f32 %v4305_v18, %v3855_v27  ;;  %v776_v55 = vadd.f32 %v744_v58, %v676_v54  ;;  %v577_v42 = vadd.f32 %v545_v30, %v477_v12 }
  0x8e   : > { %v975_v4 = vadd.f32 %v943_v13, %v875_v17  ;;  %v845_v23 = vmul.f32 %v4313_v0, %v3860_v28  ;;  %v945_v61 = vmul.f32 %v4319_v62, %v3870_v33  ;;  %v1046_v25 = vmul.f32 %v3897_v1, %v4358_v44  ;;  %v4366_v13 = vld [vmem:[#allocation2 + $0x112] sm:$0xff] }
  0x8f   : > { %v1275_v48 = vadd.f32 %v1243_v57, %v1175_v31  ;;  %v378_v22 = vmax.f32 %v346_v37, 0.0  ;;  %v876_v20 = vadd.f32 %v844_v49, %v776_v55  ;;  %v677_v32 = vadd.f32 %v645_v40, %v577_v42  ;;  %v348_v37 = vld [vmem:[%s3826_s21 + $0xc8] sm:$0xff] }
  0x90   : > { %v1076_v24 = vadd.f32 %v1044_v59, %v975_v4  ;;  %v478_v63 = vmul.f32 %v4280_v51, %v3836_v14  ;;  %v1146_v57 = vmul.f32 %v3902_v2, %v4364_v56  ;;  %v1246_v58 = vmul.f32 %v3921_v35, %v4366_v13 }
  0x91   : > { %3356 = vmatprep.mubr.msk.f32.mxu0 %vm277_vm1, %v1275_v48  ;;  %411 = vst.msk [vmem:[#allocation2 + $0x129] sm:$0xff] %vm277_vm1, %v378_v22  ;;  %v546_v59 = vmul.f32 %v4290_v39, %v3841_v15  ;;  %v646_v38 = vmul.f32 %v4292_v41, %v3848_v21  ;;  %v976_v51 = vadd.f32 %v944_v47, %v876_v20  ;;  %v4388_v41 = vld [vmem:[#allocation2 + $0x120] sm:$0xff]  ;;  %v380_v48 = vmax.f32 %v348_v37, 0.0 }
  0x92   : > { %v1176_v19 = vadd.f32 %v1144_v34, %v1076_v24  ;;  %v777_v49 = vadd.f32 %v745_v26, %v677_v32  ;;  %v746_v11 = vmul.f32 %v4334_v52, %v3855_v27  ;;  %v846_v12 = vmul.f32 %v4340_v53, %v3860_v28  ;;  %v347_v47 = vld [vmem:[%s3826_s21 + $0xc0] sm:$0xff] }
  0x93   : > { %v578_v45 = vadd.f32 %v546_v59, %v478_v63  ;;  %v946_v17 = vmul.f32 %v4342_v43, %v3870_v33  ;;  %v479_v39 = vmul.f32 %v4305_v18, %v3836_v14  ;;  %v1077_v30 = vadd.f32 %v1045_v50, %v976_v51  ;;  %413 = vst.msk [vmem:[#allocation2 + $0x141] sm:$0xff] %vm277_vm1, %v380_v48 }
  0x94   : > { %v1276_v54 = vadd.f32 %v1244_v36, %v1176_v19  ;;  %v877_v40 = vadd.f32 %v845_v23, %v777_v49  ;;  %v547_v34 = vmul.f32 %v4313_v0, %v3841_v15  ;;  %v1047_v26 = vmul.f32 %v3897_v1, %v4388_v41 }
  0x95   : > { %v678_v31 = vadd.f32 %v646_v38, %v578_v45  ;;  %v647_v4 = vmul.f32 %v4319_v62, %v3848_v21  ;;  %v747_v18 = vmul.f32 %v4358_v44, %v3855_v27  ;;  %v1177_v36 = vadd.f32 %v1145_v60, %v1077_v30  ;;  %v1111_v62 = vld [vmem:[#allocation2 + $0x121] sm:$0xff] }
  0x96   : > { %3357 = vmatmul.mubr.msk.f32.gmra.mrb[16].mxu0 %vm277_vm1, %v1276_v54  ;;  %v977_v50 = vadd.f32 %v945_v61, %v877_v40  ;;  %v579_v55 = vadd.f32 %v547_v34, %v479_v39  ;;  %v847_v0 = vmul.f32 %v4364_v56, %v3860_v28  ;;  %v379_v23 = vmax.f32 %v347_v47, 0.0  ;;  %v349_v47 = vld [vmem:[%s3826_s21 + $0xd0] sm:$0xff] }
  0x97   : > { %v778_v42 = vadd.f32 %v746_v11, %v678_v31  ;;  %v480_v22 = vmul.f32 %v4334_v52, %v3836_v14  ;;  %v1277_v24 = vadd.f32 %v1245_v46, %v1177_v36  ;;  %v548_v60 = vmul.f32 %v4340_v53, %v3841_v15 }
  0x98   : > { %v1078_v20 = vadd.f32 %v1046_v25, %v977_v50  ;;  %v4405_v32 = vld [vmem:[#allocation2 + $0x122] sm:$0xff]  ;;  %v679_v63 = vadd.f32 %v647_v4, %v579_v55  ;;  %v1147_v59 = vmul.f32 %v3902_v2, %v1111_v62  ;;  %v947_v19 = vmul.f32 %v4366_v13, %v3870_v33  ;;  %412 = vst.msk [vmem:[#allocation2 + $0x139] sm:$0xff] %vm277_vm1, %v379_v23 }
  0x99   : > { %v878_v61 = vadd.f32 %v846_v12, %v778_v42  ;;  %v1247_v38 = vmul.f32 %v3921_v35, %v4405_v32  ;;  %v1012_v51 = vld [vmem:[#allocation2 + $0x128] sm:$0xff]  ;;  %3359 = vmatprep.mubr.msk.f32.mxu0 %vm277_vm1, %v1277_v24  ;;  %v580_v49 = vadd.f32 %v548_v60, %v480_v22  ;;  %v648_v39 = vmul.f32 %v4342_v43, %v3848_v21 }
  0x9a   : > { %v1178_v52 = vadd.f32 %v1146_v57, %v1078_v20  ;;  %v779_v46 = vadd.f32 %v747_v18, %v679_v63  ;;  %v1048_v53 = vmul.f32 %v3897_v1, %v1012_v51  ;;  %v1112_v25 = vld [vmem:[#allocation2 + $0x129] sm:$0xff]  ;;  %v748_v54 = vmul.f32 %v4388_v41, %v3855_v27  ;;  %v350_v18 = vld [vmem:[%s3826_s21 + $0xd8] sm:$0xff] }
  0x9b   : > { %v978_v11 = vadd.f32 %v946_v17, %v878_v61  ;;  %v1148_v45 = vmul.f32 %v3902_v2, %v1112_v25  ;;  %v1212_v12 = vld [vmem:[#allocation2 + $0x12a] sm:$0xff]  ;;  %v481_v34 = vmul.f32 %v4358_v44, %v3836_v14  ;;  %v680_v31 = vadd.f32 %v648_v39, %v580_v49 }
  0x9c   : > { %v1278_v30 = vadd.f32 %v1246_v58, %v1178_v52  ;;  %v879_v40 = vadd.f32 %v847_v0, %v779_v46  ;;  %v1248_v57 = vmul.f32 %v3921_v35, %v1212_v12  ;;  %v848_v17 = vmul.f32 %v1111_v62, %v3860_v28 }
  0x9d   : > { %v1079_v37 = vadd.f32 %v1047_v26, %v978_v11  ;;  %v549_v4 = vmul.f32 %v4364_v56, %v3841_v15  ;;  %v948_v58 = vmul.f32 %v4405_v32, %v3870_v33  ;;  %v649_v36 = vmul.f32 %v4366_v13, %v3848_v21 }
  0x9e   : > { %3360 = vmatmul.mubr.msk.f32.gmra.mrb[18].mxu0 %vm277_vm1, %v1278_v30  ;;  %v979_v43 = vadd.f32 %v947_v19, %v879_v40  ;;  %v749_v44 = vmul.f32 %v1012_v51, %v3855_v27  ;;  %v780_v26 = vadd.f32 %v748_v54, %v680_v31  ;;  %v381_v0 = vmax.f32 %v349_v47, 0.0  ;;  %v351_v47 = vld [vmem:[%s3826_s21 + $0xe0] sm:$0xff] }
  0x9f   : > { %v1179_v50 = vadd.f32 %v1147_v59, %v1079_v37  ;;  %v581_v55 = vadd.f32 %v549_v4, %v481_v34  ;;  %v4437_v23 = vld [vmem:[#allocation2 + $0x138] sm:$0xff]  ;;  %v382_v56 = vmax.f32 %v350_v18, 0.0  ;;  %v482_v48 = vmul.f32 %v4388_v41, %v3836_v14  ;;  %v1014_v11 = vld [vmem:[#allocation2 + $0x140] sm:$0xff] }
  0xa0   : > { %v1080_v42 = vadd.f32 %v1048_v53, %v979_v43  ;;  %v550_v22 = vmul.f32 %v1111_v62, %v3841_v15  ;;  %v880_v20 = vadd.f32 %v848_v17, %v780_v26  ;;  %v1049_v13 = vmul.f32 %v3897_v1, %v4437_v23  ;;  %414 = vst.msk [vmem:[#allocation2 + $0x151] sm:$0xff] %vm277_vm1, %v381_v0  ;;  %v1113_v60 = vld [vmem:[#allocation2 + $0x139] sm:$0xff]  ;;  %v352_v17 = vld [vmem:[%s3826_s21 + $0xe8] sm:$0xff] }
  0xa1   : > { %v1279_v24 = vadd.f32 %v1247_v38, %v1179_v50  ;;  %v4445_v61 = vld [vmem:[#allocation2 + $0x13a] sm:$0xff]  ;;  %v681_v59 = vadd.f32 %v649_v36, %v581_v55  ;;  %v849_v19 = vmul.f32 %v1112_v25, %v3860_v28  ;;  %v949_v52 = vmul.f32 %v1212_v12, %v3870_v33  ;;  %415 = vst.msk [vmem:[#allocation2 + $0x159] sm:$0xff] %vm277_vm1, %v382_v56  ;;  %v1214_v36 = vld [vmem:[#allocation2 + $0x142] sm:$0xff] }
  0xa2   : > { %v1180_v63 = vadd.f32 %v1148_v45, %v1080_v42  ;;  %v980_v41 = vadd.f32 %v948_v58, %v880_v20  ;;  %v1149_v62 = vmul.f32 %v3902_v2, %v1113_v60  ;;  %v1249_v38 = vmul.f32 %v3921_v35, %v4445_v61 }
  0xa3   : > { %3362 = vmatprep.mubr.msk.f32.mxu0 %vm277_vm1, %v1279_v24  ;;  %v582_v46 = vadd.f32 %v550_v22, %v482_v48  ;;  %v781_v49 = vadd.f32 %v749_v44, %v681_v59  ;;  %v650_v45 = vmul.f32 %v4405_v32, %v3848_v21  ;;  %v750_v39 = vmul.f32 %v4437_v23, %v3855_v27 }
  0xa4   : > { %v1280_v53 = vadd.f32 %v1248_v57, %v1180_v63  ;;  %v1081_v54 = vadd.f32 %v1049_v13, %v980_v41  ;;  %v1050_v30 = vmul.f32 %v3897_v1, %v1014_v11  ;;  %v850_v40 = vmul.f32 %v1113_v60, %v3860_v28  ;;  %v1114_v57 = vld [vmem:[#allocation2 + $0x141] sm:$0xff] }
  0xa5   : > { %v483_v34 = vmul.f32 %v1012_v51, %v3836_v14  ;;  %v881_v35 = vadd.f32 %v849_v19, %v781_v49  ;;  %v682_v37 = vadd.f32 %v650_v45, %v582_v46  ;;  %v551_v31 = vmul.f32 %v1112_v25, %v3841_v15  ;;  %v4473_v25 = vld [vmem:[%s5528_s1 + $0x8] ss:$0 sm:$0xff] }
  0xa6   : > { %3363 = vmatmul.mubr.msk.f32.gmra.mrb[20].mxu0 %vm277_vm1, %v1280_v53  ;;  %v651_v32 = vmul.f32 %v1212_v12, %v3848_v21  ;;  %v1181_v4 = vadd.f32 %v1149_v62, %v1081_v54  ;;  %v1150_v18 = vmul.f32 %v3902_v2, %v1114_v57  ;;  %v950_v43 = vmul.f32 %v4445_v61, %v3870_v33 }
  0xa7   : > { %v751_v58 = vmul.f32 %v1014_v11, %v3855_v27  ;;  %v981_v51 = vadd.f32 %v949_v52, %v881_v35  ;;  %v782_v44 = vadd.f32 %v750_v39, %v682_v37  ;;  %v583_v50 = vadd.f32 %v551_v31, %v483_v34  ;;  %v4476_v0 = vld [vmem:[#allocation2 + $0x150] sm:$0xff] }
  0xa8   : > { %v383_v26 = vmax.f32 %v351_v47, 0.0  ;;  %v1281_v55 = vadd.f32 %v1249_v38, %v1181_v4  ;;  %v1250_v12 = vmul.f32 %v4473_v25, %v1214_v36  ;;  %v851_v42 = vmul.f32 %v1114_v57, %v3860_v28  ;;  %v1115_v20 = vld [vmem:[#allocation2 + $0x151] sm:$0xff]  ;;  %v1116_v49 = vld [vmem:[#allocation2 + $0x159] sm:$0xff] }
  0xa9   : > { %v384_v56 = vmax.f32 %v352_v17, 0.0  ;;  %v1082_v48 = vadd.f32 %v1050_v30, %v981_v51  ;;  %v882_v22 = vadd.f32 %v850_v40, %v782_v44  ;;  %v1051_v24 = vmul.f32 %v3897_v1, %v4476_v0  ;;  %v1215_v13 = vld [vmem:[#allocation2 + $0x152] sm:$0xff]  ;;  %v1216_v35 = vld [vmem:[#allocation2 + $0x15a] sm:$0xff] }
  0xaa   : > { %v683_v63 = vadd.f32 %v651_v32, %v583_v50  ;;  %416 = vst.msk [vmem:[#allocation2 + $0x169] sm:$0xff] %vm277_vm1, %v383_v26  ;;  %3365 = vmatprep.mubr.msk.f32.mxu0 %vm277_vm1, %v1281_v55  ;;  %v1151_v59 = vmul.f32 %v3902_v2, %v1115_v20  ;;  %v1251_v19 = vmul.f32 %v4473_v25, %v1215_v13  ;;  %v1016_v53 = vld [vmem:[#allocation2 + $0x158] sm:$0xff]  ;;  %v353_v31 = vld [vmem:[%s3826_s21 + $0xf0] sm:$0xff] }
  0xab   : > { %v951_v52 = vmul.f32 %v1214_v36, %v3870_v33  ;;  %417 = vst.msk [vmem:[#allocation2 + $0x171] sm:$0xff] %vm277_vm1, %v384_v56  ;;  %v484_v41 = vmul.f32 %v4437_v23, %v3836_v14  ;;  %v1182_v62 = vadd.f32 %v1150_v18, %v1082_v48  ;;  %v982_v38 = vadd.f32 %v950_v43, %v882_v22  ;;  %v354_v32 = vld [vmem:[%s3826_s21 + $0xf8] sm:$0xff]  ;;  %s3263_s21 = sshll.u32 %s3605_s28, 12  ;;  %s5486_s28 = scalar_lea.sflag [#allocation5], %s269_s14 }
  0xac   : > { %v783_v46 = vadd.f32 %v751_v58, %v683_v63  ;;  %v552_v45 = vmul.f32 %v1113_v60, %v3841_v15  ;;  %v1052_v39 = vmul.f32 %v3897_v1, %v1016_v53  ;;  %v1152_v54 = vmul.f32 %v3902_v2, %v1116_v49  ;;  %s5475_s8 = scalar_lea.hbm %s5534_s7, %s3263_s21 }
  0xad   : > { %v652_v30 = vmul.f32 %v4445_v61, %v3848_v21  ;;  %v752_v40 = vmul.f32 %v4476_v0, %v3855_v27  ;;  %v1282_v23 = vadd.f32 %v1250_v12, %v1182_v62  ;;  %v1083_v34 = vadd.f32 %v1051_v24, %v982_v38 }
  0xae   : > { %v883_v47 = vadd.f32 %v851_v42, %v783_v46  ;;  %v584_v37 = vadd.f32 %v552_v45, %v484_v41  ;;  %v1252_v17 = vmul.f32 %v4473_v25, %v1216_v35  ;;  %v485_v60 = vmul.f32 %v1014_v11, %v3836_v14 }
  0xaf   : > { %v553_v4 = vmul.f32 %v1114_v57, %v3841_v15  ;;  %v653_v18 = vmul.f32 %v1214_v36, %v3848_v21  ;;  %3366 = vmatmul.mubr.msk.f32.gmra.mrb[22].mxu0 %vm277_vm1, %v1282_v23  ;;  %v1183_v61 = vadd.f32 %v1151_v59, %v1083_v34  ;;  %v852_v51 = vmul.f32 %v1115_v20, %v3860_v28 }
  0xb0   : > { %v983_v43 = vadd.f32 %v951_v52, %v883_v47  ;;  %v684_v58 = vadd.f32 %v652_v30, %v584_v37  ;;  %v753_v50 = vmul.f32 %v1016_v53, %v3855_v27  ;;  %v385_v26 = vmax.f32 %v353_v31, 0.0 }
  0xb1   : > { %v585_v44 = vadd.f32 %v553_v4, %v485_v60  ;;  %v386_v55 = vmax.f32 %v354_v32, 0.0  ;;  %v1283_v12 = vadd.f32 %v1251_v19, %v1183_v61  ;;  %v952_v11 = vmul.f32 %v1215_v13, %v3870_v33  ;;  %v1017_v57 = vld [vmem:[#allocation2 + $0x168] sm:$0xff] }
  0xb2   : > { %v1084_v42 = vadd.f32 %v1052_v39, %v983_v43  ;;  %v784_v56 = vadd.f32 %v752_v40, %v684_v58  ;;  %v1117_v48 = vld [vmem:[#allocation2 + $0x169] sm:$0xff]  ;;  %v853_v22 = vmul.f32 %v1116_v49, %v3860_v28  ;;  %v953_v24 = vmul.f32 %v1216_v35, %v3870_v33  ;;  %418 = vst.msk [vmem:[#allocation2 + $0x181] sm:$0xff] %vm277_vm1, %v385_v26  ;;  %v1118_v47 = vld [vmem:[#allocation2 + $0x171] sm:$0xff] }
  0xb3   : > { %v685_v36 = vadd.f32 %v653_v18, %v585_v44  ;;  %419 = vst.msk [vmem:[#allocation2 + $0x189] sm:$0xff] %vm277_vm1, %v386_v55  ;;  %3368 = vmatprep.mubr.msk.f32.mxu0 %vm277_vm1, %v1283_v12  ;;  %v1053_v19 = vmul.f32 %v3897_v1, %v1017_v57  ;;  %v1153_v52 = vmul.f32 %v3902_v2, %v1117_v48  ;;  %v1217_v41 = vld [vmem:[#allocation2 + $0x16a] sm:$0xff]  ;;  %v1218_v58 = vld [vmem:[#allocation2 + $0x172] sm:$0xff] }
  0xb4   : > { %v1184_v63 = vadd.f32 %v1152_v54, %v1084_v42  ;;  %v884_v59 = vadd.f32 %v852_v51, %v784_v56  ;;  %v1018_v38 = vld [vmem:[#allocation2 + $0x170] sm:$0xff]  ;;  %v486_v46 = vmul.f32 %v4476_v0, %v3836_v14  ;;  %v554_v45 = vmul.f32 %v1115_v20, %v3841_v15 }
  0xb5   : > { %v785_v62 = vadd.f32 %v753_v50, %v685_v36  ;;  %v654_v39 = vmul.f32 %v1215_v13, %v3848_v21  ;;  %v1253_v23 = vmul.f32 %v4473_v25, %v1217_v41  ;;  %v1054_v54 = vmul.f32 %v3897_v1, %v1018_v38 }
  0xb6   : > { %v1284_v30 = vadd.f32 %v1252_v17, %v1184_v63  ;;  %v984_v40 = vadd.f32 %v952_v11, %v884_v59  ;;  %v586_v37 = vadd.f32 %v554_v45, %v486_v46  ;;  %v754_v31 = vmul.f32 %v1017_v57, %v3855_v27 }
  0xb7   : > { %v885_v34 = vadd.f32 %v853_v22, %v785_v62  ;;  %v487_v32 = vmul.f32 %v1016_v53, %v3836_v14  ;;  %v1154_v20 = vmul.f32 %v3902_v2, %v1118_v47  ;;  %v555_v13 = vmul.f32 %v1116_v49, %v3841_v15 }
  0xb8   : > { %3369 = vmatmul.mubr.msk.f32.gmra.mrb[24].mxu0 %vm277_vm1, %v1284_v30  ;;  %v1085_v0 = vadd.f32 %v1053_v19, %v984_v40  ;;  %v655_v17 = vmul.f32 %v1216_v35, %v3848_v21  ;;  %v686_v4 = vadd.f32 %v654_v39, %v586_v37  ;;  %v854_v18 = vmul.f32 %v1117_v48, %v3860_v28 }
  0xb9   : > { %v985_v60 = vadd.f32 %v953_v24, %v885_v34  ;;  %v755_v61 = vmul.f32 %v1018_v38, %v3855_v27  ;;  %v587_v51 = vadd.f32 %v555_v13, %v487_v32  ;;  %v488_v53 = vmul.f32 %v1017_v57, %v3836_v14  ;;  %v1019_v35 = vld [vmem:[#allocation2 + $0x180] sm:$0xff]  ;;  %v1021_v32 = vld [vmem:[#allocation2 + $0x198] sm:$0xff] }
  0xba   : > { %v1185_v43 = vadd.f32 %v1153_v52, %v1085_v0  ;;  %v556_v44 = vmul.f32 %v1117_v48, %v3841_v15  ;;  %v1254_v26 = vmul.f32 %v4473_v25, %v1218_v58  ;;  %v786_v55 = vadd.f32 %v754_v31, %v686_v4  ;;  %v1119_v24 = vld [vmem:[#allocation2 + $0x181] sm:$0xff] }
  0xbb   : > { %v1086_v50 = vadd.f32 %v1054_v54, %v985_v60  ;;  %v954_v49 = vmul.f32 %v1217_v41, %v3870_v33  ;;  %v687_v42 = vadd.f32 %v655_v17, %v587_v51  ;;  %v855_v56 = vmul.f32 %v1118_v47, %v3860_v28  ;;  %v1219_v48 = vld [vmem:[#allocation2 + $0x182] sm:$0xff] }
  0xbc   : > { %v1285_v12 = vadd.f32 %v1253_v23, %v1185_v43  ;;  %v886_v36 = vadd.f32 %v854_v18, %v786_v55  ;;  %v1055_v22 = vmul.f32 %v3897_v1, %v1019_v35  ;;  %v955_v57 = vmul.f32 %v1218_v58, %v3870_v33  ;;  %v1020_v30 = vld [vmem:[#allocation2 + $0x188] sm:$0xff]  ;;  %v1121_v43 = vld [vmem:[#allocation2 + $0x199] sm:$0xff] }
  0xbd   : > { %v1186_v11 = vadd.f32 %v1154_v20, %v1086_v50  ;;  %v787_v63 = vadd.f32 %v755_v61, %v687_v42  ;;  %v588_v59 = vadd.f32 %v556_v44, %v488_v53  ;;  %v656_v19 = vmul.f32 %v1217_v41, %v3848_v21  ;;  %v1120_v54 = vld [vmem:[#allocation2 + $0x189] sm:$0xff] }
  0xbe   : > { %3371 = vmatprep.mubr.msk.f32.mxu0 %vm277_vm1, %v1285_v12  ;;  %v756_v52 = vmul.f32 %v1019_v35, %v3855_v27  ;;  %v986_v46 = vadd.f32 %v954_v49, %v886_v36  ;;  %v1155_v45 = vmul.f32 %v3902_v2, %v1119_v24  ;;  %v1255_v39 = vmul.f32 %v4473_v25, %v1219_v48  ;;  %v1220_v61 = vld [vmem:[#allocation2 + $0x18a] sm:$0xff]  ;;  %v1122_v36 = vld [vmem:[#allocation2 + $0x1a1] sm:$0xff] }
  0xbf   : > { %v1286_v62 = vadd.f32 %v1254_v26, %v1186_v11  ;;  %v887_v40 = vadd.f32 %v855_v56, %v787_v63  ;;  %v1056_v23 = vmul.f32 %v3897_v1, %v1020_v30  ;;  %v688_v34 = vadd.f32 %v656_v19, %v588_v59 }
  0xc0   : > { %v856_v37 = vmul.f32 %v1119_v24, %v3860_v28  ;;  %v1087_v31 = vadd.f32 %v1055_v22, %v986_v46  ;;  %v1156_v41 = vmul.f32 %v3902_v2, %v1120_v54  ;;  %v489_v0 = vmul.f32 %v1018_v38, %v3836_v14 }
  0xc1   : > { %3372 = vmatmul.mubr.msk.f32.gmra.mrb[26].mxu0 %vm277_vm1, %v1286_v62  ;;  %v557_v20 = vmul.f32 %v1118_v47, %v3841_v15  ;;  %v987_v13 = vadd.f32 %v955_v57, %v887_v40  ;;  %v788_v17 = vadd.f32 %v756_v52, %v688_v34  ;;  %v956_v60 = vmul.f32 %v1219_v48, %v3870_v33  ;;  %v1221_v15 = vld [vmem:[#allocation2 + $0x19a] sm:$0xff]  ;;  %v1222_v57 = vld [vmem:[#allocation2 + $0x1a2] sm:$0xff] }
  0xc2   : > { %v657_v4 = vmul.f32 %v1218_v58, %v3848_v21  ;;  %v1187_v18 = vadd.f32 %v1155_v45, %v1087_v31  ;;  %v757_v53 = vmul.f32 %v1020_v30, %v3855_v27  ;;  %v1256_v50 = vmul.f32 %v4473_v25, %v1220_v61  ;;  %v1022_v58 = vld [vmem:[#allocation2 + $0x1a0] sm:$0xff]  ;;  %v1869_v31 = vld [vmem:[#allocation3 + $0x1] sm:$0xff] }
  0xc3   : > { %v589_v51 = vadd.f32 %v557_v20, %v489_v0  ;;  %v1088_v44 = vadd.f32 %v1056_v23, %v987_v13  ;;  %v888_v26 = vadd.f32 %v856_v37, %v788_v17  ;;  %v1057_v14 = vmul.f32 %v3897_v1, %v1021_v32  ;;  %v4579_v45 = vld [vmem:[%s5530_s3 + $0x1] ss:$0 sm:$0xff]  ;;  %v1801_v37 = vld [vmem:[#allocation3] sm:$0xff]  ;;  %v1802_v32 = vld [vmem:[#allocation3 + $0x8] sm:$0xff] }
  0xc4   : > { %v1287_v38 = vadd.f32 %v1255_v39, %v1187_v18  ;;  %v857_v55 = vmul.f32 %v1120_v54, %v3860_v28  ;;  %v1157_v21 = vmul.f32 %v3902_v2, %v1121_v43  ;;  %v957_v27 = vmul.f32 %v1220_v61, %v3870_v33  ;;  %v1870_v0 = vld [vmem:[#allocation3 + $0x9] sm:$0xff] }
  0xc5   : > { %v689_v47 = vadd.f32 %v657_v4, %v589_v51  ;;  %v1188_v49 = vadd.f32 %v1156_v41, %v1088_v44  ;;  %v988_v35 = vadd.f32 %v956_v60, %v888_v26  ;;  %v1257_v11 = vmul.f32 %v4473_v25, %v1221_v15  ;;  %v1970_v61 = vld [vmem:[#allocation3 + $0xa] sm:$0xff] }
  0xc6   : > { %3374 = vmatprep.mubr.msk.f32.mxu0 %vm277_vm1, %v1287_v38  ;;  %v1058_v24 = vmul.f32 %v3897_v1, %v1022_v58  ;;  %v1158_v63 = vmul.f32 %v3902_v2, %v1122_v36  ;;  %v1258_v52 = vmul.f32 %v4473_v25, %v1222_v57  ;;  %v2670_v1 = vld [vmem:[%s5532_s5] sm:$0xf] }
  0xc7   : > { %v789_v12 = vadd.f32 %v757_v53, %v689_v47  ;;  %v1288_v42 = vadd.f32 %v1256_v50, %v1188_v49  ;;  %v1089_v56 = vadd.f32 %v1057_v14, %v988_v35  ;;  %3380 = vmatprep.subr.msk.mxu1 %vm1388_vm0, %v2670_v1  ;;  %v4569_v2 = vld [vmem:[%s5530_s3] ss:$0 sm:$0xff] }
  0xc8   : > { %3381 = vmatpush3.msk.msra.mxu1 %vm1388_vm0, %v2670_v1  ;;  %v4574_v25 = vld [vmem:[%s5531_s4] sm:$0xff] }
  0xc9   : > { %v889_v22 = vadd.f32 %v857_v55, %v789_v12  ;;  %3375 = vmatmul.mubr.msk.f32.gmra.mrb[28].mxu0 %vm277_vm1, %v1288_v42  ;;  %v1189_v28 = vadd.f32 %v1157_v21, %v1089_v56  ;;  %v4586_v23 = vrot.slane %v4574_v25, %v456_v5  ;;  %v4591_v54 = vrot.slane %v4574_v25, %v524_v6  ;;  %v1969_v6 = vld [vmem:[#allocation3 + $0x2] sm:$0xff] }
  0xca   : > { %v4600_v60 = vrot.slane %v4574_v25, %v624_v7  ;;  %v4614_v15 = vrot.slane %v4574_v25, %v724_v8  ;;  %v4620_v35 = vrot.slane %v4574_v25, %v824_v9 }
  0xcb   : > { %v989_v48 = vadd.f32 %v957_v27, %v889_v22  ;;  %v1289_v59 = vadd.f32 %v1257_v11, %v1189_v28  ;;  %v1837_v17 = vmul.f32 %v4586_v23, %v1801_v37  ;;  %v1905_v5 = vmul.f32 %v4591_v54, %v1869_v31  ;;  %v4654_v31 = vld [vmem:[%s5531_s4 + $0x8] ss:$0 sm:$0xff] }
  0xcc   : > { %v1838_v4 = vmul.f32 %v4586_v23, %v1802_v32  ;;  %v1906_v18 = vmul.f32 %v4591_v54, %v1870_v0  ;;  %v2005_v50 = vmul.f32 %v4600_v60, %v1969_v6  ;;  %v2006_v14 = vmul.f32 %v4600_v60, %v1970_v61 }
  0xcd   : > { %v1090_v19 = vadd.f32 %v1058_v24, %v989_v48  ;;  %3377 = vmatprep.mubr.msk.f32.mxu0 %vm277_vm1, %v1289_v59  ;;  %v1937_v44 = vadd.f32 %v1905_v5, %v1837_v17  ;;  %v4628_v11 = vrot.slane %v4574_v25, %v924_v10  ;;  %v4639_v10 = vrot.slane %v4574_v25, %v1025_v16 }
  0xce   : > { %v1938_v26 = vadd.f32 %v1906_v18, %v1838_v4  ;;  %v4648_v37 = vrot.slane %v4574_v25, %v1125_v29 }
  0xcf   : > { %v1190_v33 = vadd.f32 %v1158_v63, %v1090_v19  ;;  %v2037_v49 = vadd.f32 %v2005_v50, %v1937_v44 }
  0xd0   : > { %v2038_v42 = vadd.f32 %v2006_v14, %v1938_v26 }
  0xd1   : > { %v1290_v62 = vadd.f32 %v1258_v52, %v1190_v33 }
  0xd3   : > { %3378 = vmatmul.mubr.msk.f32.gmra.mrb[30].mxu0 %vm277_vm1, %v1290_v62 }
 0x124   : > { %v3334_v46 = vpop.f32.mrb[0].mxu0 }
 0x125   : > { %v1623_v39 = vmul.f32 %v3334_v46, %v4569_v2  ;;  %v1458_v30 = vpop.f32.mrb[1].mxu0 }
 0x126   : > { %v1622_v40 = vmul.f32 %v4569_v2, %v1458_v30 }
 0x127   : > { %v1660_v34 = vadd.f32 %v4579_v45, %v1623_v39 }
 0x128   : > { %v1659_v41 = vadd.f32 %v4579_v45, %v1622_v40 }
 0x129   : > { %v1735_v20 = vmax.f32 %v1660_v34, 0.0 }
 0x12a   : > { %v1734_v13 = vmax.f32 %v1659_v41, 0.0 }
 0x12b   : > { %1768 = vst.msk [vmem:[#allocation3 + $0x21] sm:$0xff] %vm277_vm1, %v1735_v20 }
 0x12c   : > { %1767 = vst.msk [vmem:[#allocation3 + $0x19] sm:$0xff] %vm277_vm1, %v1734_v13 }
 0x12d   : > { %v3337_v43 = vpop.f32.mrb[2].mxu0 }
 0x12e   : > { %v1625_v51 = vmul.f32 %v3337_v43, %v4569_v2  ;;  %v1468_v53 = vpop.f32.mrb[3].mxu0 }
 0x12f   : > { %v1624_v7 = vmul.f32 %v4569_v2, %v1468_v53 }
 0x130   : > { %v1662_v38 = vadd.f32 %v4579_v45, %v1625_v51 }
 0x131   : > { %v1661_v47 = vadd.f32 %v4579_v45, %v1624_v7 }
 0x132   : > { %v1737_v55 = vmax.f32 %v1662_v38, 0.0  ;;  %v2170_v21 = vld [vmem:[#allocation3 + $0x21] sm:$0xff] }
 0x133   : > { %v1736_v58 = vmax.f32 %v1661_v47, 0.0  ;;  %v2069_v12 = vld [vmem:[#allocation3 + $0x18] sm:$0xff]  ;;  %v1908_v56 = vmul.f32 %v2170_v21, %v4591_v54  ;;  %v2070_v36 = vld [vmem:[#allocation3 + $0x20] sm:$0xff]  ;;  %v2206_v19 = vmul.f32 %v4620_v35, %v2170_v21 }
 0x134   : > { %v2169_v27 = vld [vmem:[#allocation3 + $0x19] sm:$0xff]  ;;  %1770 = vst.msk [vmem:[#allocation3 + $0x39] sm:$0xff] %vm277_vm1, %v1737_v55  ;;  %v2105_v8 = vmul.f32 %v4614_v15, %v2069_v12  ;;  %v1839_v9 = vmul.f32 %v2069_v12, %v4586_v23  ;;  %v2106_v24 = vmul.f32 %v4614_v15, %v2070_v36  ;;  %v1840_v57 = vmul.f32 %v2070_v36, %v4586_v23  ;;  %v2270_v52 = vld [vmem:[#allocation3 + $0x22] sm:$0xff] }
 0x135   : > { %1769 = vst.msk [vmem:[#allocation3 + $0x31] sm:$0xff] %vm277_vm1, %v1736_v58  ;;  %v2269_v22 = vld [vmem:[#allocation3 + $0x1a] sm:$0xff]  ;;  %v1907_v28 = vmul.f32 %v2169_v27, %v4591_v54  ;;  %v2205_v59 = vmul.f32 %v4620_v35, %v2169_v27  ;;  %v2008_v0 = vmul.f32 %v2270_v52, %v4600_v60  ;;  %v2306_v13 = vmul.f32 %v4628_v11, %v2270_v52 }
 0x136   : > { %v3340_v48 = vpop.f32.mrb[4].mxu0  ;;  %v2137_v63 = vadd.f32 %v2105_v8, %v2037_v49  ;;  %v2138_v1 = vadd.f32 %v2106_v24, %v2038_v42  ;;  %v1940_v39 = vadd.f32 %v1908_v56, %v1840_v57  ;;  %v2305_v34 = vmul.f32 %v4628_v11, %v2269_v22 }
 0x137   : > { %v1627_v33 = vmul.f32 %v3340_v48, %v4569_v2  ;;  %v1478_v62 = vpop.f32.mrb[5].mxu0  ;;  %v1939_v46 = vadd.f32 %v1907_v28, %v1839_v9  ;;  %v2007_v32 = vmul.f32 %v2269_v22, %v4600_v60 }
 0x138   : > { %v1626_v30 = vmul.f32 %v4569_v2, %v1478_v62  ;;  %v2237_v40 = vadd.f32 %v2205_v59, %v2137_v63  ;;  %v2238_v41 = vadd.f32 %v2206_v19, %v2138_v1  ;;  %v2040_v6 = vadd.f32 %v2008_v0, %v1940_v39 }
 0x139   : > { %v1664_v16 = vadd.f32 %v4579_v45, %v1627_v33  ;;  %v2039_v5 = vadd.f32 %v2007_v32, %v1939_v46 }
 0x13a   : > { %v1663_v20 = vadd.f32 %v4579_v45, %v1626_v30  ;;  %v2337_v17 = vadd.f32 %v2305_v34, %v2237_v40  ;;  %v2338_v51 = vadd.f32 %v2306_v13, %v2238_v41 }
 0x13b   : > { %v1739_v3 = vmax.f32 %v1664_v16, 0.0  ;;  %v2471_v29 = vld [vmem:[#allocation3 + $0x39] sm:$0xff] }
 0x13c   : > { %v4660_v25 = vld [vmem:[#allocation3 + $0x3a] sm:$0xff]  ;;  %v1738_v4 = vmax.f32 %v1663_v20, 0.0  ;;  %v2370_v18 = vld [vmem:[#allocation3 + $0x30] sm:$0xff]  ;;  %v2507_v53 = vmul.f32 %v4648_v37, %v2471_v29  ;;  %v2208_v38 = vmul.f32 %v2471_v29, %v4620_v35 }
 0x13d   : > { %v2470_v61 = vld [vmem:[#allocation3 + $0x31] sm:$0xff]  ;;  %v2607_v44 = vmul.f32 %v4654_v31, %v4660_v25  ;;  %1772 = vst.msk [vmem:[#allocation3 + $0x51] sm:$0xff] %vm277_vm1, %v1739_v3  ;;  %v2406_v50 = vmul.f32 %v4639_v10, %v2370_v18  ;;  %v2107_v14 = vmul.f32 %v2370_v18, %v4614_v15  ;;  %v3343_v47 = vpop.f32.mrb[6].mxu0  ;;  %v1841_v24 = vmul.f32 %v2370_v18, %v4586_v23 }
 0x13e   : > { %v2570_v43 = vld [vmem:[#allocation3 + $0x32] sm:$0xff]  ;;  %v2506_v7 = vmul.f32 %v4648_v37, %v2470_v61  ;;  %1771 = vst.msk [vmem:[#allocation3 + $0x49] sm:$0xff] %vm277_vm1, %v1738_v4  ;;  %v2207_v21 = vmul.f32 %v2470_v61, %v4620_v35  ;;  %v1629_v12 = vmul.f32 %v3343_v47, %v4569_v2  ;;  %v1488_v27 = vpop.f32.mrb[7].mxu0  ;;  %v1909_v63 = vmul.f32 %v2470_v61, %v4591_v54 }
 0x13f   : > { %v2371_v26 = vld [vmem:[#allocation3 + $0x38] sm:$0xff]  ;;  %v2606_v55 = vmul.f32 %v4654_v31, %v2570_v43  ;;  %v2438_v42 = vadd.f32 %v2406_v50, %v2337_v17  ;;  %v2139_v56 = vadd.f32 %v2107_v14, %v2039_v5  ;;  %v2307_v8 = vmul.f32 %v2570_v43, %v4628_v11 }
 0x140   : > { %v2407_v49 = vmul.f32 %v4639_v10, %v2371_v26  ;;  %v2108_v58 = vmul.f32 %v2371_v26, %v4614_v15  ;;  %v1628_v36 = vmul.f32 %v4569_v2, %v1488_v27  ;;  %v1666_v28 = vadd.f32 %v4579_v45, %v1629_v12 }
 0x141   : > { %v2538_v57 = vadd.f32 %v2506_v7, %v2438_v42  ;;  %v2239_v48 = vadd.f32 %v2207_v21, %v2139_v56  ;;  %v2308_v33 = vmul.f32 %v4660_v25, %v4628_v11  ;;  %v1941_v46 = vadd.f32 %v1909_v63, %v1841_v24 }
 0x142   : > { %v2439_v9 = vadd.f32 %v2407_v49, %v2338_v51  ;;  %v2140_v22 = vadd.f32 %v2108_v58, %v2040_v6  ;;  %v1665_v59 = vadd.f32 %v4579_v45, %v1628_v36  ;;  %v1741_v62 = vmax.f32 %v1666_v28, 0.0 }
 0x143   : > { %v2638_v1 = vadd.f32 %v2606_v55, %v2538_v57  ;;  %v2009_v39 = vmul.f32 %v2570_v43, %v4600_v60  ;;  %v2339_v34 = vadd.f32 %v2307_v8, %v2239_v48  ;;  %v1842_v41 = vmul.f32 %v2371_v26, %v4586_v23 }
 0x144   : > { %v2539_v19 = vadd.f32 %v2507_v53, %v2439_v9  ;;  %v2240_v52 = vadd.f32 %v2208_v38, %v2140_v22  ;;  %v1740_v30 = vmax.f32 %v1665_v59, 0.0  ;;  %v4685_v16 = vld [vmem:[#allocation3 + $0x51] sm:$0xff]  ;;  %1774 = vst.msk [vmem:[#allocation3 + $0x69] sm:$0xff] %vm277_vm1, %v1741_v62  ;;  %v1910_v17 = vmul.f32 %v2471_v29, %v4591_v54 }
 0x145   : > { %3382 = vmatprep.mubr.msk.f32.mxu1 %vm277_vm1, %v2638_v1  ;;  %v2372_v32 = vld [vmem:[#allocation3 + $0x48] sm:$0xff]  ;;  %v2041_v3 = vadd.f32 %v2009_v39, %v1941_v46  ;;  %v2373_v4 = vld [vmem:[#allocation3 + $0x50] sm:$0xff]  ;;  %v2509_v18 = vmul.f32 %v4648_v37, %v4685_v16  ;;  %v2010_v47 = vmul.f32 %v4660_v25, %v4600_v60  ;;  %v2210_v25 = vmul.f32 %v4685_v16, %v4620_v35 }
 0x146   : > { %v2639_v40 = vadd.f32 %v2607_v44, %v2539_v19  ;;  %v2472_v0 = vld [vmem:[#allocation3 + $0x49] sm:$0xff]  ;;  %v2340_v13 = vadd.f32 %v2308_v33, %v2240_v52  ;;  %1773 = vst.msk [vmem:[#allocation3 + $0x61] sm:$0xff] %vm277_vm1, %v1740_v30  ;;  %v2408_v5 = vmul.f32 %v4639_v10, %v2372_v32  ;;  %v2109_v61 = vmul.f32 %v2372_v32, %v4614_v15  ;;  %v2573_v14 = vld [vmem:[#allocation3 + $0x52] sm:$0xff] }
 0x147   : > { %v4690_v20 = vld [vmem:[#allocation3 + $0x4a] sm:$0xff]  ;;  %v2508_v6 = vmul.f32 %v4648_v37, %v2472_v0  ;;  %v3346_v43 = vpop.f32.mrb[8].mxu0  ;;  %v2409_v29 = vmul.f32 %v4639_v10, %v2373_v4  ;;  %v2209_v53 = vmul.f32 %v2472_v0, %v4620_v35  ;;  %v1942_v44 = vadd.f32 %v1910_v17, %v1842_v41 }
 0x148   : > { %3383 = vmatmul.mubr.msk.f32.vlgmr.msra.gmra.mrb[0].mxu1 %vm277_vm1, %v2639_v40  ;;  %v2608_v51 = vmul.f32 %v4654_v31, %v4690_v20  ;;  %v1631_v50 = vmul.f32 %v3346_v43, %v4569_v2  ;;  %v1498_v7 = vpop.f32.mrb[9].mxu0  ;;  %v2440_v26 = vadd.f32 %v2408_v5, %v2339_v34  ;;  %v2141_v38 = vadd.f32 %v2109_v61, %v2041_v3 }
 0x149   : > { %v1630_v55 = vmul.f32 %v4569_v2, %v1498_v7  ;;  %v2441_v49 = vadd.f32 %v2409_v29, %v2340_v13  ;;  %v2309_v21 = vmul.f32 %v4690_v20, %v4628_v11  ;;  %v2110_v58 = vmul.f32 %v2373_v4, %v4614_v15 }
 0x14a   : > { %v1668_v12 = vadd.f32 %v4579_v45, %v1631_v50  ;;  %v2540_v27 = vadd.f32 %v2508_v6, %v2440_v26  ;;  %v2241_v42 = vadd.f32 %v2209_v53, %v2141_v38  ;;  %v2042_v56 = vadd.f32 %v2010_v47, %v1942_v44 }
 0x14b   : > { %v1667_v8 = vadd.f32 %v4579_v45, %v1630_v55  ;;  %v2541_v36 = vadd.f32 %v2509_v18, %v2441_v49  ;;  %v2609_v9 = vmul.f32 %v4654_v31, %v2573_v14  ;;  %v4716_v48 = vld [vmem:[#allocation3 + $0x69] sm:$0xff]  ;;  %v2310_v1 = vmul.f32 %v2573_v14, %v4628_v11 }
 0x14c   : > { %v1743_v22 = vmax.f32 %v1668_v12, 0.0  ;;  %v2640_v24 = vadd.f32 %v2608_v51, %v2540_v27  ;;  %v2341_v28 = vadd.f32 %v2309_v21, %v2241_v42  ;;  %v2142_v57 = vadd.f32 %v2110_v58, %v2042_v56  ;;  %v4718_v63 = vld [vmem:[#allocation3 + $0x6a] sm:$0xff] }
 0x14d   : > { %v1742_v59 = vmax.f32 %v1667_v8, 0.0  ;;  %v2641_v19 = vadd.f32 %v2609_v9, %v2541_v36  ;;  %v4720_v52 = vld [vmem:[#allocation3 + $0x60] sm:$0xff]  ;;  %v1843_v46 = vmul.f32 %v2372_v32, %v4586_v23  ;;  %v4732_v40 = vld [vmem:[#allocation3 + $0x68] sm:$0xff]  ;;  %v2511_v34 = vmul.f32 %v4648_v37, %v4716_v48 }
 0x14e   : > { %v4722_v33 = vld [vmem:[#allocation3 + $0x61] sm:$0xff]  ;;  %1776 = vst.msk [vmem:[#allocation3 + $0x81] sm:$0xff] %vm277_vm1, %v1743_v22  ;;  %3385 = vmatprep.mubr.msk.f32.mxu1 %vm277_vm1, %v2640_v24  ;;  %v2410_v39 = vmul.f32 %v4639_v10, %v4720_v52  ;;  %v2242_v30 = vadd.f32 %v2210_v25, %v2142_v57  ;;  %v2611_v41 = vmul.f32 %v4654_v31, %v4718_v63  ;;  %v3349_v13 = vpop.f32.mrb[10].mxu0 }
 0x14f   : > { %v4724_v62 = vld [vmem:[#allocation3 + $0x62] sm:$0xff]  ;;  %1775 = vst.msk [vmem:[#allocation3 + $0x79] sm:$0xff] %vm277_vm1, %v1742_v59  ;;  %3386 = vmatmul.mubr.msk.f32.gmra.mrb[2].mxu1 %vm277_vm1, %v2641_v19  ;;  %v2510_v32 = vmul.f32 %v4648_v37, %v4722_v33  ;;  %v2411_v17 = vmul.f32 %v4639_v10, %v4732_v40  ;;  %v1911_v5 = vmul.f32 %v2472_v0, %v4591_v54  ;;  %v1508_v18 = vpop.f32.mrb[11].mxu0 }
 0x150   : > { %v2610_v3 = vmul.f32 %v4654_v31, %v4724_v62  ;;  %v1633_v6 = vmul.f32 %v3349_v13, %v4569_v2  ;;  %v2442_v61 = vadd.f32 %v2410_v39, %v2341_v28  ;;  %v2342_v43 = vadd.f32 %v2310_v1, %v2242_v30 }
 0x151   : > { %v2011_v51 = vmul.f32 %v4690_v20, %v4600_v60  ;;  %v1632_v29 = vmul.f32 %v4569_v2, %v1508_v18  ;;  %v1943_v53 = vadd.f32 %v1911_v5, %v1843_v46  ;;  %v2111_v44 = vmul.f32 %v4720_v52, %v4614_v15 }
 0x152   : > { %v1844_v50 = vmul.f32 %v2373_v4, %v4586_v23  ;;  %v1670_v7 = vadd.f32 %v4579_v45, %v1633_v6  ;;  %v2542_v26 = vadd.f32 %v2510_v32, %v2442_v61  ;;  %v2443_v0 = vadd.f32 %v2411_v17, %v2342_v43 }
 0x153   : > { %v1912_v38 = vmul.f32 %v4685_v16, %v4591_v54  ;;  %v1669_v47 = vadd.f32 %v4579_v45, %v1632_v29  ;;  %v2043_v55 = vadd.f32 %v2011_v51, %v1943_v53  ;;  %v2012_v20 = vmul.f32 %v2573_v14, %v4600_v60 }
 0x154   : > { %v2112_v49 = vmul.f32 %v4732_v40, %v4614_v15  ;;  %v1745_v21 = vmax.f32 %v1670_v7, 0.0  ;;  %v2642_v58 = vadd.f32 %v2610_v3, %v2542_v26  ;;  %v2543_v12 = vadd.f32 %v2511_v34, %v2443_v0 }
 0x155   : > { %v1944_v27 = vadd.f32 %v1912_v38, %v1844_v50  ;;  %v1744_v4 = vmax.f32 %v1669_v47, 0.0  ;;  %v2143_v42 = vadd.f32 %v2111_v44, %v2043_v55  ;;  %v2211_v56 = vmul.f32 %v4722_v33, %v4620_v35  ;;  %v4765_v8 = vld [vmem:[#allocation3 + $0x81] sm:$0xff] }
 0x156   : > { %v2311_v16 = vmul.f32 %v4724_v62, %v4628_v11  ;;  %1778 = vst.msk [vmem:[#allocation3 + $0x99] sm:$0xff] %vm277_vm1, %v1745_v21  ;;  %3388 = vmatprep.mubr.msk.f32.mxu1 %vm277_vm1, %v2642_v58  ;;  %v2643_v14 = vadd.f32 %v2611_v41, %v2543_v12  ;;  %v4769_v36 = vld [vmem:[#allocation3 + $0x78] sm:$0xff]  ;;  %v2212_v24 = vmul.f32 %v4716_v48, %v4620_v35  ;;  %v4784_v1 = vld [vmem:[#allocation3 + $0x80] sm:$0xff] }
 0x157   : > { %v4771_v9 = vld [vmem:[#allocation3 + $0x79] sm:$0xff]  ;;  %v2044_v22 = vadd.f32 %v2012_v20, %v1944_v27  ;;  %v2312_v28 = vmul.f32 %v4718_v63, %v4628_v11  ;;  %1777 = vst.msk [vmem:[#allocation3 + $0x91] sm:$0xff] %vm277_vm1, %v1744_v4  ;;  %v2243_v57 = vadd.f32 %v2211_v56, %v2143_v42  ;;  %v2412_v59 = vmul.f32 %v4639_v10, %v4769_v36 }
 0x158   : > { %v4773_v25 = vld [vmem:[#allocation3 + $0x7a] sm:$0xff]  ;;  %v2512_v19 = vmul.f32 %v4648_v37, %v4771_v9  ;;  %v2513_v46 = vmul.f32 %v4648_v37, %v4765_v8  ;;  %v3352_v39 = vpop.f32.mrb[12].mxu0  ;;  %3389 = vmatmul.mubr.msk.f32.gmra.mrb[4].mxu1 %vm277_vm1, %v2643_v14  ;;  %v1845_v41 = vmul.f32 %v4720_v52, %v4586_v23  ;;  %v1913_v13 = vmul.f32 %v4722_v33, %v4591_v54 }
 0x159   : > { %v2612_v30 = vmul.f32 %v4654_v31, %v4773_v25  ;;  %v2144_v34 = vadd.f32 %v2112_v49, %v2044_v22  ;;  %v1635_v32 = vmul.f32 %v3352_v39, %v4569_v2  ;;  %v1518_v3 = vpop.f32.mrb[13].mxu0  ;;  %v2343_v17 = vadd.f32 %v2311_v16, %v2243_v57 }
 0x15a   : > { %v2413_v5 = vmul.f32 %v4639_v10, %v4784_v1  ;;  %v2013_v6 = vmul.f32 %v4724_v62, %v4600_v60  ;;  %v1634_v18 = vmul.f32 %v4569_v2, %v1518_v3  ;;  %v1945_v43 = vadd.f32 %v1913_v13, %v1845_v41  ;;  %v4809_v62 = vld [vmem:[#allocation3 + $0x82] sm:$0xff] }
 0x15b   : > { %v2244_v61 = vadd.f32 %v2212_v24, %v2144_v34  ;;  %v2113_v52 = vmul.f32 %v4769_v36, %v4614_v15  ;;  %v1672_v51 = vadd.f32 %v4579_v45, %v1635_v32  ;;  %v2444_v33 = vadd.f32 %v2412_v59, %v2343_v17 }
 0x15c   : > { %v2213_v29 = vmul.f32 %v4771_v9, %v4620_v35  ;;  %v1846_v53 = vmul.f32 %v4732_v40, %v4586_v23  ;;  %v1671_v44 = vadd.f32 %v4579_v45, %v1634_v18  ;;  %v2045_v7 = vadd.f32 %v2013_v6, %v1945_v43 }
 0x15d   : > { %v2344_v50 = vadd.f32 %v2312_v28, %v2244_v61  ;;  %v1914_v26 = vmul.f32 %v4716_v48, %v4591_v54  ;;  %v1747_v0 = vmax.f32 %v1672_v51, 0.0  ;;  %v2544_v38 = vadd.f32 %v2512_v19, %v2444_v33  ;;  %v4851_v61 = vld [vmem:[#allocation3 + $0x99] sm:$0xff] }
 0x15e   : > { %v2014_v47 = vmul.f32 %v4718_v63, %v4600_v60  ;;  %v2114_v55 = vmul.f32 %v4784_v1, %v4614_v15  ;;  %v1746_v20 = vmax.f32 %v1671_v44, 0.0  ;;  %v2145_v40 = vadd.f32 %v2113_v52, %v2045_v7  ;;  %v4817_v21 = vld [vmem:[#allocation3 + $0x90] sm:$0xff]  ;;  %v4841_v13 = vld [vmem:[#allocation3 + $0x98] sm:$0xff] }
 0x15f   : > { %v2445_v49 = vadd.f32 %v2413_v5, %v2344_v50  ;;  %v4819_v58 = vld [vmem:[#allocation3 + $0x91] sm:$0xff]  ;;  %v1946_v12 = vadd.f32 %v1914_v26, %v1846_v53  ;;  %1780 = vst.msk [vmem:[#allocation3 + $0xb1] sm:$0xff] %vm277_vm1, %v1747_v0  ;;  %v2644_v27 = vadd.f32 %v2612_v30, %v2544_v38  ;;  %v2613_v48 = vmul.f32 %v4654_v31, %v4809_v62  ;;  %v3355_v63 = vpop.f32.mrb[14].mxu0  ;;  %v4853_v52 = vld [vmem:[#allocation3 + $0x9a] sm:$0xff] }
 0x160   : > { %1779 = vst.msk [vmem:[#allocation3 + $0xa9] sm:$0xff] %vm277_vm1, %v1746_v20  ;;  %v2245_v42 = vadd.f32 %v2213_v29, %v2145_v40  ;;  %v2313_v56 = vmul.f32 %v4773_v25, %v4628_v11  ;;  %v4827_v16 = vld [vmem:[#allocation3 + $0x92] sm:$0xff]  ;;  %v1637_v22 = vmul.f32 %v3355_v63, %v4569_v2  ;;  %v1528_v24 = vpop.f32.mrb[15].mxu0  ;;  %v2414_v28 = vmul.f32 %v4639_v10, %v4817_v21 }
 0x161   : > { %v2545_v4 = vadd.f32 %v2513_v46, %v2445_v49  ;;  %v2046_v14 = vadd.f32 %v2014_v47, %v1946_v12  ;;  %3391 = vmatprep.mubr.msk.f32.mxu1 %vm277_vm1, %v2644_v27  ;;  %v2514_v57 = vmul.f32 %v4648_v37, %v4819_v58  ;;  %v2214_v59 = vmul.f32 %v4765_v8, %v4620_v35 }
 0x162   : > { %v1636_v19 = vmul.f32 %v4569_v2, %v1528_v24  ;;  %v2345_v39 = vadd.f32 %v2313_v56, %v2245_v42  ;;  %v1674_v34 = vadd.f32 %v4579_v45, %v1637_v22  ;;  %v2614_v41 = vmul.f32 %v4654_v31, %v4827_v16 }
 0x163   : > { %v2645_v46 = vadd.f32 %v2613_v48, %v2545_v4  ;;  %v2146_v30 = vadd.f32 %v2114_v55, %v2046_v14  ;;  %v1847_v32 = vmul.f32 %v4769_v36, %v4586_v23  ;;  %v1915_v3 = vmul.f32 %v4771_v9, %v4591_v54 }
 0x164   : > { %v1673_v17 = vadd.f32 %v4579_v45, %v1636_v19  ;;  %v2446_v5 = vadd.f32 %v2414_v28, %v2345_v39  ;;  %v2314_v18 = vmul.f32 %v4809_v62, %v4628_v11  ;;  %v1749_v43 = vmax.f32 %v1674_v34, 0.0 }
 0x165   : > { %3392 = vmatmul.mubr.msk.f32.gmra.mrb[6].mxu1 %vm277_vm1, %v2645_v46  ;;  %v2246_v6 = vadd.f32 %v2214_v59, %v2146_v30  ;;  %v1947_v51 = vadd.f32 %v1915_v3, %v1847_v32  ;;  %v2015_v36 = vmul.f32 %v4773_v25, %v4600_v60  ;;  %v2115_v9 = vmul.f32 %v4817_v21, %v4614_v15 }
 0x166   : > { %v1748_v33 = vmax.f32 %v1673_v17, 0.0  ;;  %v2546_v29 = vadd.f32 %v2514_v57, %v2446_v5  ;;  %v2415_v44 = vmul.f32 %v4639_v10, %v4841_v13  ;;  %1782 = vst.msk [vmem:[#allocation3 + $0xc9] sm:$0xff] %vm277_vm1, %v1749_v43  ;;  %v2515_v50 = vmul.f32 %v4648_v37, %v4851_v61  ;;  %v4899_v30 = vld [vmem:[#allocation3 + $0xb1] sm:$0xff] }
 0x167   : > { %v2346_v53 = vadd.f32 %v2314_v18, %v2246_v6  ;;  %v2047_v7 = vadd.f32 %v2015_v36, %v1947_v51  ;;  %v4864_v26 = vld [vmem:[#allocation3 + $0xa8] sm:$0xff]  ;;  %v1848_v25 = vmul.f32 %v4784_v1, %v4586_v23  ;;  %v1916_v0 = vmul.f32 %v4765_v8, %v4591_v54  ;;  %v4892_v57 = vld [vmem:[#allocation3 + $0xb0] sm:$0xff] }
 0x168   : > { %1781 = vst.msk [vmem:[#allocation3 + $0xc1] sm:$0xff] %vm277_vm1, %v1748_v33  ;;  %v2646_v38 = vadd.f32 %v2614_v41, %v2546_v29  ;;  %v2615_v55 = vmul.f32 %v4654_v31, %v4853_v52  ;;  %v2215_v20 = vmul.f32 %v4819_v58, %v4620_v35  ;;  %v4875_v49 = vld [vmem:[#allocation3 + $0xa9] sm:$0xff]  ;;  %v2016_v8 = vmul.f32 %v4809_v62, %v4600_v60  ;;  %v4902_v3 = vld [vmem:[#allocation3 + $0xb2] sm:$0xff] }
 0x169   : > { %v2447_v47 = vadd.f32 %v2415_v44, %v2346_v53  ;;  %v3358_v40 = vpop.f32.mrb[16].mxu0  ;;  %v2147_v12 = vadd.f32 %v2115_v9, %v2047_v7  ;;  %v4877_v27 = vld [vmem:[#allocation3 + $0xaa] sm:$0xff]  ;;  %v1948_v1 = vadd.f32 %v1916_v0, %v1848_v25  ;;  %v2116_v48 = vmul.f32 %v4841_v13, %v4614_v15 }
 0x16a   : > { %v1639_v63 = vmul.f32 %v3358_v40, %v4569_v2  ;;  %v1538_v4 = vpop.f32.mrb[17].mxu0  ;;  %3394 = vmatprep.mubr.msk.f32.mxu1 %vm277_vm1, %v2646_v38  ;;  %v2315_v56 = vmul.f32 %v4827_v16, %v4628_v11  ;;  %v2416_v14 = vmul.f32 %v4639_v10, %v4864_v26  ;;  %v2516_v62 = vmul.f32 %v4648_v37, %v4875_v49 }
 0x16b   : > { %v2547_v42 = vadd.f32 %v2515_v50, %v2447_v47  ;;  %v1638_v22 = vmul.f32 %v4569_v2, %v1538_v4  ;;  %v2247_v24 = vadd.f32 %v2215_v20, %v2147_v12  ;;  %v2048_v28 = vadd.f32 %v2016_v8, %v1948_v1 }
 0x16c   : > { %v1676_v59 = vadd.f32 %v4579_v45, %v1639_v63  ;;  %v2616_v46 = vmul.f32 %v4654_v31, %v4877_v27  ;;  %v2216_v39 = vmul.f32 %v4851_v61, %v4620_v35  ;;  %v1849_v17 = vmul.f32 %v4817_v21, %v4586_v23 }
 0x16d   : > { %v2647_v19 = vadd.f32 %v2615_v55, %v2547_v42  ;;  %v1675_v34 = vadd.f32 %v4579_v45, %v1638_v22  ;;  %v2347_v41 = vadd.f32 %v2315_v56, %v2247_v24  ;;  %v2148_v32 = vadd.f32 %v2116_v48, %v2048_v28 }
 0x16e   : > { %v1751_v5 = vmax.f32 %v1676_v59, 0.0  ;;  %v2316_v6 = vmul.f32 %v4853_v52, %v4628_v11  ;;  %v2417_v18 = vmul.f32 %v4639_v10, %v4892_v57  ;;  %v1917_v43 = vmul.f32 %v4819_v58, %v4591_v54 }
 0x16f   : > { %3395 = vmatmul.mubr.msk.f32.gmra.mrb[8].mxu1 %vm277_vm1, %v2647_v19  ;;  %v1750_v51 = vmax.f32 %v1675_v34, 0.0  ;;  %v2448_v36 = vadd.f32 %v2416_v14, %v2347_v41  ;;  %v2248_v9 = vadd.f32 %v2216_v39, %v2148_v32  ;;  %v2517_v33 = vmul.f32 %v4648_v37, %v4899_v30  ;;  %v4930_v20 = vld [vmem:[#allocation3 + $0xc0] sm:$0xff]  ;;  %v4954_v39 = vld [vmem:[#allocation3 + $0xc9] sm:$0xff] }
 0x170   : > { %1784 = vst.msk [vmem:[#allocation3 + $0xe1] sm:$0xff] %vm277_vm1, %v1751_v5  ;;  %v2617_v21 = vmul.f32 %v4654_v31, %v4902_v3  ;;  %v1949_v29 = vadd.f32 %v1917_v43, %v1849_v17  ;;  %v2017_v53 = vmul.f32 %v4827_v16, %v4600_v60  ;;  %v2117_v44 = vmul.f32 %v4864_v26, %v4614_v15  ;;  %v4932_v40 = vld [vmem:[#allocation3 + $0xc1] sm:$0xff]  ;;  %v4963_v43 = vld [vmem:[#allocation3 + $0xca] sm:$0xff] }
 0x171   : > { %1783 = vst.msk [vmem:[#allocation3 + $0xd9] sm:$0xff] %vm277_vm1, %v1750_v51  ;;  %v3361_v58 = vpop.f32.mrb[18].mxu0  ;;  %v2548_v50 = vadd.f32 %v2516_v62, %v2448_v36  ;;  %v2348_v7 = vadd.f32 %v2316_v6, %v2248_v9  ;;  %v2217_v25 = vmul.f32 %v4875_v49, %v4620_v35  ;;  %v1850_v0 = vmul.f32 %v4841_v13, %v4586_v23  ;;  %v4937_v63 = vld [vmem:[#allocation3 + $0xc2] sm:$0xff] }
 0x172   : > { %v1641_v38 = vmul.f32 %v3361_v58, %v4569_v2  ;;  %v1548_v47 = vpop.f32.mrb[19].mxu0  ;;  %v2049_v55 = vadd.f32 %v2017_v53, %v1949_v29  ;;  %v2317_v16 = vmul.f32 %v4877_v27, %v4628_v11  ;;  %v1918_v12 = vmul.f32 %v4851_v61, %v4591_v54 }
 0x173   : > { %v1640_v1 = vmul.f32 %v4569_v2, %v1548_v47  ;;  %v2648_v8 = vadd.f32 %v2616_v46, %v2548_v50  ;;  %v2449_v48 = vadd.f32 %v2417_v18, %v2348_v7  ;;  %v2018_v13 = vmul.f32 %v4853_v52, %v4600_v60  ;;  %v4952_v46 = vld [vmem:[#allocation3 + $0xc8] sm:$0xff] }
 0x174   : > { %v1678_v4 = vadd.f32 %v4579_v45, %v1641_v38  ;;  %v2149_v42 = vadd.f32 %v2117_v44, %v2049_v55  ;;  %v1950_v56 = vadd.f32 %v1918_v12, %v1850_v0  ;;  %v2118_v14 = vmul.f32 %v4892_v57, %v4614_v15 }
 0x175   : > { %v1677_v22 = vadd.f32 %v4579_v45, %v1640_v1  ;;  %3397 = vmatprep.mubr.msk.f32.mxu1 %vm277_vm1, %v2648_v8  ;;  %v2549_v61 = vadd.f32 %v2517_v33, %v2449_v48  ;;  %v2418_v24 = vmul.f32 %v4639_v10, %v4930_v20  ;;  %v2518_v62 = vmul.f32 %v4648_v37, %v4932_v40 }
 0x176   : > { %v1753_v28 = vmax.f32 %v1678_v4, 0.0  ;;  %v2249_v52 = vadd.f32 %v2217_v25, %v2149_v42  ;;  %v2618_v59 = vmul.f32 %v4654_v31, %v4937_v63  ;;  %v2050_v19 = vadd.f32 %v2018_v13, %v1950_v56 }
 0x177   : > { %v1752_v34 = vmax.f32 %v1677_v22, 0.0  ;;  %v2649_v41 = vadd.f32 %v2617_v21, %v2549_v61  ;;  %v2218_v32 = vmul.f32 %v4899_v30, %v4620_v35  ;;  %v1851_v17 = vmul.f32 %v4864_v26, %v4586_v23 }
 0x178   : > { %1786 = vst.msk [vmem:[#allocation3 + $0xf9] sm:$0xff] %vm277_vm1, %v1753_v28  ;;  %v2349_v5 = vadd.f32 %v2317_v16, %v2249_v52  ;;  %v2150_v6 = vadd.f32 %v2118_v14, %v2050_v19  ;;  %v2318_v18 = vmul.f32 %v4902_v3, %v4628_v11  ;;  %v1919_v51 = vmul.f32 %v4875_v49, %v4591_v54  ;;  %v4978_v50 = vld [vmem:[#allocation3 + $0xd8] sm:$0xff]  ;;  %v5003_v28 = vld [vmem:[#allocation3 + $0xe0] sm:$0xff] }
 0x179   : > { %1785 = vst.msk [vmem:[#allocation3 + $0xf1] sm:$0xff] %vm277_vm1, %v1752_v34  ;;  %v3364_v36 = vpop.f32.mrb[20].mxu0  ;;  %3398 = vmatmul.mubr.msk.f32.gmra.mrb[10].mxu1 %vm277_vm1, %v2649_v41  ;;  %v2419_v26 = vmul.f32 %v4639_v10, %v4952_v46  ;;  %v2519_v9 = vmul.f32 %v4648_v37, %v4954_v39  ;;  %v2019_v33 = vmul.f32 %v4877_v27, %v4600_v60  ;;  %v4993_v48 = vld [vmem:[#allocation3 + $0xd9] sm:$0xff]  ;;  %v5014_v41 = vld [vmem:[#allocation3 + $0xe1] sm:$0xff] }
 0x17a   : > { %v2119_v21 = vmul.f32 %v4930_v20, %v4614_v15  ;;  %v1643_v29 = vmul.f32 %v3364_v36, %v4569_v2  ;;  %v1558_v49 = vpop.f32.mrb[21].mxu0  ;;  %v2450_v53 = vadd.f32 %v2418_v24, %v2349_v5  ;;  %v2250_v44 = vadd.f32 %v2218_v32, %v2150_v6  ;;  %v4995_v13 = vld [vmem:[#allocation3 + $0xda] sm:$0xff]  ;;  %v5016_v32 = vld [vmem:[#allocation3 + $0xe2] sm:$0xff] }
 0x17b   : > { %v1951_v58 = vadd.f32 %v1919_v51, %v1851_v17  ;;  %v1642_v7 = vmul.f32 %v4569_v2, %v1558_v49  ;;  %v2619_v25 = vmul.f32 %v4654_v31, %v4963_v43  ;;  %v2219_v0 = vmul.f32 %v4932_v40, %v4620_v35 }
 0x17c   : > { %v1852_v27 = vmul.f32 %v4892_v57, %v4586_v23  ;;  %v1680_v38 = vadd.f32 %v4579_v45, %v1643_v29  ;;  %v2550_v47 = vadd.f32 %v2518_v62, %v2450_v53  ;;  %v2350_v55 = vadd.f32 %v2318_v18, %v2250_v44 }
 0x17d   : > { %v2051_v16 = vadd.f32 %v2019_v33, %v1951_v58  ;;  %v1679_v12 = vadd.f32 %v4579_v45, %v1642_v7  ;;  %v2319_v1 = vmul.f32 %v4937_v63, %v4628_v11  ;;  %v2420_v8 = vmul.f32 %v4639_v10, %v4978_v50 }
 0x17e   : > { %v1920_v57 = vmul.f32 %v4899_v30, %v4591_v54  ;;  %v1755_v4 = vmax.f32 %v1680_v38, 0.0  ;;  %v2650_v42 = vadd.f32 %v2618_v59, %v2550_v47  ;;  %v2451_v56 = vadd.f32 %v2419_v26, %v2350_v55 }
 0x17f   : > { %v2151_v14 = vadd.f32 %v2119_v21, %v2051_v16  ;;  %v1754_v22 = vmax.f32 %v1679_v12, 0.0  ;;  %v2020_v24 = vmul.f32 %v4902_v3, %v4600_v60  ;;  %v2120_v62 = vmul.f32 %v4952_v46, %v4614_v15 }
 0x180   : > { %v1952_v61 = vadd.f32 %v1920_v57, %v1852_v27  ;;  %1788 = vst.msk [vmem:[#allocation3 + $0x111] sm:$0xff] %vm277_vm1, %v1755_v4  ;;  %3400 = vmatprep.mubr.msk.f32.mxu1 %vm277_vm1, %v2650_v42  ;;  %v2551_v52 = vadd.f32 %v2519_v9, %v2451_v56  ;;  %v2520_v59 = vmul.f32 %v4648_v37, %v4993_v48  ;;  %v5049_v57 = vld [vmem:[#allocation3 + $0xf2] sm:$0xff] }
 0x181   : > { %v2251_v30 = vadd.f32 %v2219_v0, %v2151_v14  ;;  %v2620_v19 = vmul.f32 %v4654_v31, %v4995_v13  ;;  %1787 = vst.msk [vmem:[#allocation3 + $0x109] sm:$0xff] %vm277_vm1, %v1754_v22  ;;  %v2220_v34 = vmul.f32 %v4954_v39, %v4620_v35  ;;  %v1853_v17 = vmul.f32 %v4930_v20, %v4586_v23 }
 0x182   : > { %v2052_v3 = vadd.f32 %v2020_v24, %v1952_v61  ;;  %v1921_v5 = vmul.f32 %v4932_v40, %v4591_v54  ;;  %v2651_v6 = vadd.f32 %v2619_v25, %v2551_v52  ;;  %v2320_v51 = vmul.f32 %v4963_v43, %v4628_v11  ;;  %v3367_v26 = vpop.f32.mrb[22].mxu0 }
 0x183   : > { %v2351_v18 = vadd.f32 %v2319_v1, %v2251_v30  ;;  %v2421_v36 = vmul.f32 %v4639_v10, %v5003_v28  ;;  %v2021_v21 = vmul.f32 %v4937_v63, %v4600_v60  ;;  %v2121_v20 = vmul.f32 %v4978_v50, %v4614_v15  ;;  %v1568_v40 = vpop.f32.mrb[23].mxu0  ;;  %v5045_v1 = vld [vmem:[#allocation3 + $0xf0] sm:$0xff] }
 0x184   : > { %v2152_v9 = vadd.f32 %v2120_v62, %v2052_v3  ;;  %v1953_v33 = vadd.f32 %v1921_v5, %v1853_v17  ;;  %v1645_v29 = vmul.f32 %v3367_v26, %v4569_v2  ;;  %3401 = vmatmul.mubr.msk.f32.gmra.mrb[12].mxu1 %vm277_vm1, %v2651_v6  ;;  %v2521_v53 = vmul.f32 %v4648_v37, %v5014_v41 }
 0x185   : > { %v2452_v49 = vadd.f32 %v2420_v8, %v2351_v18  ;;  %v2621_v44 = vmul.f32 %v4654_v31, %v5016_v32  ;;  %v1644_v58 = vmul.f32 %v4569_v2, %v1568_v40  ;;  %v2221_v63 = vmul.f32 %v4993_v48, %v4620_v35  ;;  %v5047_v8 = vld [vmem:[#allocation3 + $0xf1] sm:$0xff] }
 0x186   : > { %v2252_v7 = vadd.f32 %v2220_v34, %v2152_v9  ;;  %v2053_v25 = vadd.f32 %v2021_v21, %v1953_v33  ;;  %v1682_v0 = vadd.f32 %v4579_v45, %v1645_v29  ;;  %v1854_v38 = vmul.f32 %v4952_v46, %v4586_v23  ;;  %v5087_v29 = vld [vmem:[%s5530_s3 + $0x1] ss:$0 sm:$0xff] }
 0x187   : > { %v2552_v27 = vadd.f32 %v2520_v59, %v2452_v49  ;;  %v1922_v47 = vmul.f32 %v4954_v39, %v4591_v54  ;;  %v1681_v55 = vadd.f32 %v4579_v45, %v1644_v58  ;;  %v2022_v4 = vmul.f32 %v4963_v43, %v4600_v60 }
 0x188   : > { %v2352_v16 = vadd.f32 %v2320_v51, %v2252_v7  ;;  %v2153_v12 = vadd.f32 %v2121_v20, %v2053_v25  ;;  %v1757_v42 = vmax.f32 %v1682_v0, 0.0  ;;  %v2122_v46 = vmul.f32 %v5003_v28, %v4614_v15  ;;  %v5073_v51 = vld [vmem:[#allocation3 + $0xf8] sm:$0xff] }
 0x189   : > { %v2652_v56 = vadd.f32 %v2620_v19, %v2552_v27  ;;  %v1954_v14 = vadd.f32 %v1922_v47, %v1854_v38  ;;  %v1756_v39 = vmax.f32 %v1681_v55, 0.0  ;;  %v2321_v61 = vmul.f32 %v4995_v13, %v4628_v11  ;;  %v5080_v20 = vld [vmem:[#allocation3 + $0xfa] sm:$0xff]  ;;  %v5100_v27 = vld [vmem:[#allocation3 + $0x108] sm:$0xff] }
 0x18a   : > { %v2453_v22 = vadd.f32 %v2421_v36, %v2352_v16  ;;  %v2253_v45 = vadd.f32 %v2221_v63, %v2153_v12  ;;  %1790 = vst.msk [vmem:[#allocation3 + $0x129] sm:$0xff] %vm277_vm1, %v1757_v42  ;;  %v2422_v24 = vmul.f32 %v4639_v10, %v5045_v1  ;;  %v2522_v43 = vmul.f32 %v4648_v37, %v5047_v8  ;;  %v5075_v36 = vld [vmem:[#allocation3 + $0xf9] sm:$0xff]  ;;  %v5102_v38 = vld [vmem:[#allocation3 + $0x109] sm:$0xff] }
 0x18b   : > { %3403 = vmatprep.mubr.msk.f32.mxu1 %vm277_vm1, %v2652_v56  ;;  %v2622_v62 = vmul.f32 %v4654_v31, %v5049_v57  ;;  %v2054_v52 = vadd.f32 %v2022_v4, %v1954_v14  ;;  %1789 = vst.msk [vmem:[#allocation3 + $0x121] sm:$0xff] %vm277_vm1, %v1756_v39  ;;  %v3370_v30 = vpop.f32.mrb[24].mxu0  ;;  %v2222_v3 = vmul.f32 %v5014_v41, %v4620_v35  ;;  %v5104_v47 = vld [vmem:[#allocation3 + $0x10a] sm:$0xff] }
 0x18c   : > { %v2553_v59 = vadd.f32 %v2521_v53, %v2453_v22  ;;  %v2353_v19 = vadd.f32 %v2321_v61, %v2253_v45  ;;  %v1855_v34 = vmul.f32 %v4978_v50, %v4586_v23  ;;  %v1647_v17 = vmul.f32 %v3370_v30, %v4569_v2  ;;  %v1578_v5 = vpop.f32.mrb[25].mxu0 }
 0x18d   : > { %v2154_v6 = vadd.f32 %v2122_v46, %v2054_v52  ;;  %v2322_v18 = vmul.f32 %v5016_v32, %v4628_v11  ;;  %v1923_v26 = vmul.f32 %v4993_v48, %v4591_v54  ;;  %v1646_v9 = vmul.f32 %v4569_v2, %v1578_v5  ;;  %v5130_v52 = vld [vmem:[%s5530_s3] ss:$0 sm:$0xff] }
 0x18e   : > { %v2653_v33 = vadd.f32 %v2621_v44, %v2553_v59  ;;  %v2454_v21 = vadd.f32 %v2422_v24, %v2353_v19  ;;  %v2023_v50 = vmul.f32 %v4995_v13, %v4600_v60  ;;  %v1684_v40 = vadd.f32 %v5087_v29, %v1647_v17 }
 0x18f   : > { %v2254_v49 = vadd.f32 %v2222_v3, %v2154_v6  ;;  %v1955_v53 = vadd.f32 %v1923_v26, %v1855_v34  ;;  %v2123_v48 = vmul.f32 %v5045_v1, %v4614_v15  ;;  %v1683_v2 = vadd.f32 %v5087_v29, %v1646_v9  ;;  %v5142_v26 = vld [vmem:[#allocation3 + $0x111] sm:$0xff] }
 0x190   : > { %3404 = vmatmul.mubr.msk.f32.gmra.mrb[14].mxu1 %vm277_vm1, %v2653_v33  ;;  %v2554_v44 = vadd.f32 %v2522_v43, %v2454_v21  ;;  %v2423_v13 = vmul.f32 %v4639_v10, %v5073_v51  ;;  %v2523_v58 = vmul.f32 %v4648_v37, %v5075_v36  ;;  %v1759_v7 = vmax.f32 %v1684_v40, 0.0  ;;  %v5145_v33 = vld [vmem:[#allocation3 + $0x112] sm:$0xff] }
 0x191   : > { %v2354_v25 = vadd.f32 %v2322_v18, %v2254_v49  ;;  %v2623_v63 = vmul.f32 %v4654_v31, %v5080_v20  ;;  %v2055_v0 = vadd.f32 %v2023_v50, %v1955_v53  ;;  %v1758_v55 = vmax.f32 %v1683_v2, 0.0  ;;  %v5140_v18 = vld [vmem:[#allocation3 + $0x110] sm:$0xff] }
 0x192   : > { %v2654_v16 = vadd.f32 %v2622_v62, %v2554_v44  ;;  %v2223_v12 = vmul.f32 %v5047_v8, %v4620_v35  ;;  %v1856_v4 = vmul.f32 %v5003_v28, %v4586_v23  ;;  %1792 = vst.msk [vmem:[#allocation3 + $0x141] sm:$0xff] %vm277_vm1, %v1759_v7  ;;  %v2323_v14 = vmul.f32 %v5049_v57, %v4628_v11 }
 0x193   : > { %v2455_v42 = vadd.f32 %v2423_v13, %v2354_v25  ;;  %v2155_v56 = vadd.f32 %v2123_v48, %v2055_v0  ;;  %v1924_v46 = vmul.f32 %v5014_v41, %v4591_v54  ;;  %1791 = vst.msk [vmem:[#allocation3 + $0x139] sm:$0xff] %vm277_vm1, %v1758_v55  ;;  %v2424_v39 = vmul.f32 %v4639_v10, %v5100_v27  ;;  %v5159_v13 = vld [vmem:[#allocation3 + $0x120] sm:$0xff] }
 0x194   : > { %3406 = vmatprep.mubr.msk.f32.mxu1 %vm277_vm1, %v2654_v16  ;;  %v2524_v28 = vmul.f32 %v4648_v37, %v5102_v38  ;;  %v2624_v22 = vmul.f32 %v4654_v31, %v5104_v47  ;;  %v2024_v45 = vmul.f32 %v5016_v32, %v4600_v60  ;;  %v3373_v61 = vpop.f32.mrb[26].mxu0  ;;  %v2124_v62 = vmul.f32 %v5073_v51, %v4614_v15  ;;  %v5166_v16 = vld [vmem:[#allocation3 + $0x121] sm:$0xff] }
 0x195   : > { %v2555_v24 = vadd.f32 %v2523_v58, %v2455_v42  ;;  %v2255_v43 = vadd.f32 %v2223_v12, %v2155_v56  ;;  %v1956_v41 = vadd.f32 %v1924_v46, %v1856_v4  ;;  %v1649_v30 = vmul.f32 %v5130_v52, %v3373_v61  ;;  %v1588_v59 = vpop.f32.mrb[27].mxu0  ;;  %v5168_v12 = vld [vmem:[#allocation3 + $0x122] sm:$0xff] }
 0x196   : > { %v2224_v19 = vmul.f32 %v5075_v36, %v4620_v35  ;;  %v1857_v32 = vmul.f32 %v5045_v1, %v4586_v23  ;;  %v1925_v3 = vmul.f32 %v5047_v8, %v4591_v54  ;;  %v1648_v34 = vmul.f32 %v5130_v52, %v1588_v59 }
 0x197   : > { %v2655_v17 = vadd.f32 %v2623_v63, %v2555_v24  ;;  %v2355_v5 = vadd.f32 %v2323_v14, %v2255_v43  ;;  %v2056_v6 = vadd.f32 %v2024_v45, %v1956_v41  ;;  %v1686_v9 = vadd.f32 %v5087_v29, %v1649_v30  ;;  %v5190_v41 = vld [vmem:[%s5531_s4 + $0x8] ss:$0 sm:$0xff] }
 0x198   : > { %v1957_v21 = vadd.f32 %v1925_v3, %v1857_v32  ;;  %v2025_v1 = vmul.f32 %v5049_v57, %v4600_v60  ;;  %v2125_v8 = vmul.f32 %v5100_v27, %v4614_v15  ;;  %v1685_v50 = vadd.f32 %v5087_v29, %v1648_v34 }
 0x199   : > { %3407 = vmatmul.mubr.msk.f32.gmra.mrb[16].mxu1 %vm277_vm1, %v2655_v17  ;;  %v2456_v40 = vadd.f32 %v2424_v39, %v2355_v5  ;;  %v2156_v49 = vadd.f32 %v2124_v62, %v2056_v6  ;;  %v2324_v53 = vmul.f32 %v5080_v20, %v4628_v11  ;;  %v1761_v48 = vmax.f32 %v1686_v9, 0.0 }
 0x19a   : > { %v2425_v2 = vmul.f32 %v4639_v10, %v5140_v18  ;;  %v2525_v44 = vmul.f32 %v4648_v37, %v5142_v26  ;;  %v2057_v57 = vadd.f32 %v2025_v1, %v1957_v21  ;;  %v1760_v58 = vmax.f32 %v1685_v50, 0.0  ;;  %v5205_v50 = vld [vmem:[#allocation3 + $0x128] sm:$0xff] }
 0x19b   : > { %v2556_v7 = vadd.f32 %v2524_v28, %v2456_v40  ;;  %v2256_v25 = vadd.f32 %v2224_v19, %v2156_v49  ;;  %v2625_v63 = vmul.f32 %v4654_v31, %v5145_v33  ;;  %1794 = vst.msk [vmem:[#allocation3 + $0x159] sm:$0xff] %vm277_vm1, %v1761_v48  ;;  %v2225_v55 = vmul.f32 %v5102_v38, %v4620_v35 }
 0x19c   : > { %v2157_v0 = vadd.f32 %v2125_v8, %v2057_v57  ;;  %v1858_v4 = vmul.f32 %v5073_v51, %v4586_v23  ;;  %v1926_v42 = vmul.f32 %v5075_v36, %v4591_v54  ;;  %1793 = vst.msk [vmem:[#allocation3 + $0x151] sm:$0xff] %vm277_vm1, %v1760_v58  ;;  %v2325_v14 = vmul.f32 %v5104_v47, %v4628_v11  ;;  %v3376_v39 = vpop.f32.mrb[28].mxu0 }
 0x19d   : > { %v2656_v56 = vadd.f32 %v2624_v22, %v2556_v7  ;;  %v2356_v31 = vadd.f32 %v2324_v53, %v2256_v25  ;;  %v2426_v46 = vmul.f32 %v4639_v10, %v5159_v13  ;;  %v2026_v61 = vmul.f32 %v5080_v20, %v4600_v60  ;;  %v1598_v24 = vpop.f32.mrb[29].mxu0 }
 0x19e   : > { %v2257_v28 = vadd.f32 %v2225_v55, %v2157_v0  ;;  %v1958_v45 = vadd.f32 %v1926_v42, %v1858_v4  ;;  %v2126_v51 = vmul.f32 %v5140_v18, %v4614_v15  ;;  %v1651_v36 = vmul.f32 %v5130_v52, %v3376_v39  ;;  %v2591_v0 = vld [vmem:[#allocation3 + $0x12a] sm:$0xff]  ;;  %v2392_v42 = vld [vmem:[#allocation3 + $0x138] sm:$0xff] }
 0x19f   : > { %3409 = vmatprep.mubr.msk.f32.mxu1 %vm277_vm1, %v2656_v56  ;;  %v2457_v22 = vadd.f32 %v2425_v2, %v2356_v31  ;;  %v2526_v43 = vmul.f32 %v4648_v37, %v5166_v16  ;;  %v2626_v20 = vmul.f32 %v5190_v41, %v5168_v12  ;;  %v1650_v62 = vmul.f32 %v5130_v52, %v1598_v24  ;;  %v2491_v2 = vld [vmem:[#allocation3 + $0x129] sm:$0xff] }
 0x1a0   : > { %v2357_v30 = vadd.f32 %v2325_v14, %v2257_v28  ;;  %v2058_v59 = vadd.f32 %v2026_v61, %v1958_v45  ;;  %v2226_v19 = vmul.f32 %v5142_v26, %v4620_v35  ;;  %v1688_v32 = vadd.f32 %v5087_v29, %v1651_v36  ;;  %v2492_v61 = vld [vmem:[#allocation3 + $0x139] sm:$0xff] }
 0x1a1   : > { %v2557_v3 = vadd.f32 %v2525_v44, %v2457_v22  ;;  %v1859_v34 = vmul.f32 %v5100_v27, %v4586_v23  ;;  %v1927_v17 = vmul.f32 %v5102_v38, %v4591_v54  ;;  %v1687_v5 = vadd.f32 %v5087_v29, %v1650_v62 }
 0x1a2   : > { %v2458_v6 = vadd.f32 %v2426_v46, %v2357_v30  ;;  %v2158_v9 = vadd.f32 %v2126_v51, %v2058_v59  ;;  %v2027_v21 = vmul.f32 %v5104_v47, %v4600_v60  ;;  %v1763_v1 = vmax.f32 %v1688_v32, 0.0  ;;  %v2592_v32 = vld [vmem:[#allocation3 + $0x13a] sm:$0xff] }
 0x1a3   : > { %v2657_v8 = vadd.f32 %v2625_v63, %v2557_v3  ;;  %v1959_v40 = vadd.f32 %v1927_v17, %v1859_v34  ;;  %v2127_v49 = vmul.f32 %v5159_v13, %v4614_v15  ;;  %v1762_v53 = vmax.f32 %v1687_v5, 0.0 }
 0x1a4   : > { %v2558_v27 = vadd.f32 %v2526_v43, %v2458_v6  ;;  %v2258_v48 = vadd.f32 %v2226_v19, %v2158_v9  ;;  %v2326_v38 = vmul.f32 %v5145_v33, %v4628_v11  ;;  %1796 = vst.msk [vmem:[#allocation3 + $0x171] sm:$0xff] %vm277_vm1, %v1763_v1  ;;  %v2427_v58 = vmul.f32 %v4639_v10, %v5205_v50  ;;  %v2393_v9 = vld [vmem:[#allocation3 + $0x140] sm:$0xff] }
 0x1a5   : > { %3410 = vmatmul.mubr.msk.f32.gmra.mrb[18].mxu1 %vm277_vm1, %v2657_v8  ;;  %v2059_v47 = vadd.f32 %v2027_v21, %v1959_v40  ;;  %1795 = vst.msk [vmem:[#allocation3 + $0x169] sm:$0xff] %vm277_vm1, %v1762_v53  ;;  %v1860_v7 = vmul.f32 %v5140_v18, %v4586_v23  ;;  %v2527_v63 = vmul.f32 %v4648_v37, %v2491_v2 }
 0x1a6   : > { %v2658_v44 = vadd.f32 %v2626_v20, %v2558_v27  ;;  %v2358_v57 = vadd.f32 %v2326_v38, %v2258_v48  ;;  %v3379_v25 = vpop.f32.mrb[30].mxu0  ;;  %v2227_v4 = vmul.f32 %v5166_v16, %v4620_v35  ;;  %v1928_v56 = vmul.f32 %v5142_v26, %v4591_v54  ;;  %v2593_v27 = vld [vmem:[#allocation3 + $0x142] sm:$0xff] }
 0x1a7   : > { %v2159_v55 = vadd.f32 %v2127_v49, %v2059_v47  ;;  %v1653_v31 = vmul.f32 %v5130_v52, %v3379_v25  ;;  %v1608_v14 = vpop.f32.mrb[31].mxu0  ;;  %v2327_v18 = vmul.f32 %v5168_v12, %v4628_v11  ;;  %v2028_v39 = vmul.f32 %v5145_v33, %v4600_v60 }
 0x1a8   : > { %3412 = vmatprep.mubr.msk.f32.mxu1 %vm277_vm1, %v2658_v44  ;;  %v2459_v46 = vadd.f32 %v2427_v58, %v2358_v57  ;;  %v1652_v28 = vmul.f32 %v5130_v52, %v1608_v14  ;;  %v1960_v51 = vadd.f32 %v1928_v56, %v1860_v7  ;;  %v2128_v26 = vmul.f32 %v5205_v50, %v4614_v15  ;;  %v2394_v7 = vld [vmem:[#allocation3 + $0x150] sm:$0xff] }
 0x1a9   : > { %v2259_v45 = vadd.f32 %v2227_v4, %v2159_v55  ;;  %v1690_v36 = vadd.f32 %v5087_v29, %v1653_v31  ;;  %v2627_v22 = vmul.f32 %v5190_v41, %v2591_v0  ;;  %v2428_v43 = vmul.f32 %v4639_v10, %v2392_v42 }
 0x1aa   : > { %v2559_v24 = vadd.f32 %v2527_v63, %v2459_v46  ;;  %v1689_v20 = vadd.f32 %v5087_v29, %v1652_v28  ;;  %v2060_v30 = vadd.f32 %v2028_v39, %v1960_v51  ;;  %v1861_v52 = vmul.f32 %v5159_v13, %v4586_v23  ;;  %v2493_v29 = vld [vmem:[#allocation3 + $0x141] sm:$0xff]  ;;  %v2494_v63 = vld [vmem:[#allocation3 + $0x151] sm:$0xff] }
 0x1ab   : > { %v2359_v62 = vadd.f32 %v2327_v18, %v2259_v45  ;;  %v1765_v33 = vmax.f32 %v1690_v36, 0.0  ;;  %v2528_v19 = vmul.f32 %v4648_v37, %v2492_v61  ;;  %v1929_v3 = vmul.f32 %v5166_v16, %v4591_v54  ;;  %v2594_v39 = vld [vmem:[#allocation3 + $0x152] sm:$0xff] }
 0x1ac   : > { %v2659_v59 = vadd.f32 %v2627_v22, %v2559_v24  ;;  %v1764_v34 = vmax.f32 %v1689_v20, 0.0  ;;  %v2160_v5 = vadd.f32 %v2128_v26, %v2060_v30  ;;  %v2228_v6 = vmul.f32 %v2491_v2, %v4620_v35 }
 0x1ad   : > { %v2460_v17 = vadd.f32 %v2428_v43, %v2359_v62  ;;  %1798 = vst.msk [vmem:[#allocation3 + $0x189] sm:$0xff] %vm277_vm1, %v1765_v33  ;;  %v1961_v13 = vadd.f32 %v1929_v3, %v1861_v52  ;;  %v2029_v21 = vmul.f32 %v5168_v12, %v4600_v60  ;;  %v2129_v1 = vmul.f32 %v2392_v42, %v4614_v15  ;;  %v2395_v43 = vld [vmem:[#allocation3 + $0x158] sm:$0xff] }
 0x1ae   : > { %3413 = vmatmul.mubr.msk.f32.gmra.mrb[20].mxu1 %vm277_vm1, %v2659_v59  ;;  %1797 = vst.msk [vmem:[#allocation3 + $0x181] sm:$0xff] %vm277_vm1, %v1764_v34  ;;  %v2628_v8 = vmul.f32 %v5190_v41, %v2592_v32  ;;  %v2260_v40 = vadd.f32 %v2228_v6, %v2160_v5  ;;  %v2328_v49 = vmul.f32 %v2591_v0, %v4628_v11  ;;  %v2595_v3 = vld [vmem:[#allocation3 + $0x15a] sm:$0xff] }
 0x1af   : > { %v2560_v16 = vadd.f32 %v2528_v19, %v2460_v17  ;;  %v2429_v53 = vmul.f32 %v4639_v10, %v2393_v9  ;;  %v2061_v48 = vadd.f32 %v2029_v21, %v1961_v13  ;;  %v1862_v38 = vmul.f32 %v5205_v50, %v4586_v23  ;;  %v2495_v19 = vld [vmem:[#allocation3 + $0x159] sm:$0xff] }
 0x1b0   : > { %v1930_v47 = vmul.f32 %v2491_v2, %v4591_v54  ;;  %v2360_v44 = vadd.f32 %v2328_v49, %v2260_v40  ;;  %v2529_v57 = vmul.f32 %v4648_v37, %v2493_v29  ;;  %v2229_v58 = vmul.f32 %v2492_v61, %v4620_v35  ;;  %v2596_v40 = vld [vmem:[#allocation3 + $0x16a] sm:$0xff] }
 0x1b1   : > { %v2660_v12 = vadd.f32 %v2628_v8, %v2560_v16  ;;  %v2161_v25 = vadd.f32 %v2129_v1, %v2061_v48  ;;  %v2030_v4 = vmul.f32 %v2591_v0, %v4600_v60  ;;  %v2130_v56 = vmul.f32 %v2393_v9, %v4614_v15  ;;  %v2396_v16 = vld [vmem:[#allocation3 + $0x168] sm:$0xff] }
 0x1b2   : > { %v1962_v55 = vadd.f32 %v1930_v47, %v1862_v38  ;;  %v2461_v31 = vadd.f32 %v2429_v53, %v2360_v44  ;;  %v2629_v50 = vmul.f32 %v5190_v41, %v2593_v27  ;;  %v2329_v2 = vmul.f32 %v2592_v32, %v4628_v11  ;;  %v2496_v8 = vld [vmem:[#allocation3 + $0x169] sm:$0xff] }
 0x1b3   : > { %3415 = vmatprep.mubr.msk.f32.mxu1 %vm277_vm1, %v2660_v12  ;;  %v1863_v14 = vmul.f32 %v2392_v42, %v4586_v23  ;;  %v2261_v46 = vadd.f32 %v2229_v58, %v2161_v25  ;;  %v2430_v18 = vmul.f32 %v4639_v10, %v2394_v7  ;;  %v1931_v45 = vmul.f32 %v2492_v61, %v4591_v54 }
 0x1b4   : > { %v2062_v28 = vadd.f32 %v2030_v4, %v1962_v55  ;;  %v2561_v51 = vadd.f32 %v2529_v57, %v2461_v31  ;;  %v2530_v0 = vmul.f32 %v4648_v37, %v2494_v63  ;;  %v2230_v26 = vmul.f32 %v2493_v29, %v4620_v35 }
 0x1b5   : > { %v2031_v36 = vmul.f32 %v2592_v32, %v4600_v60  ;;  %v2361_v24 = vadd.f32 %v2329_v2, %v2261_v46  ;;  %v1963_v20 = vadd.f32 %v1931_v45, %v1863_v14  ;;  %v2131_v42 = vmul.f32 %v2394_v7, %v4614_v15  ;;  %v2497_v2 = vld [vmem:[#allocation3 + $0x171] sm:$0xff] }
 0x1b6   : > { %v2162_v22 = vadd.f32 %v2130_v56, %v2062_v28  ;;  %v2661_v62 = vadd.f32 %v2629_v50, %v2561_v51  ;;  %v2630_v30 = vmul.f32 %v5190_v41, %v2594_v39  ;;  %v2330_v52 = vmul.f32 %v2593_v27, %v4628_v11  ;;  %v2597_v46 = vld [vmem:[#allocation3 + $0x172] sm:$0xff] }
 0x1b7   : > { %v1864_v61 = vmul.f32 %v2393_v9, %v4586_v23  ;;  %v2462_v33 = vadd.f32 %v2430_v18, %v2361_v24  ;;  %v2063_v34 = vadd.f32 %v2031_v36, %v1963_v20  ;;  %v1932_v32 = vmul.f32 %v2493_v29, %v4591_v54 }
 0x1b8   : > { %v2262_v59 = vadd.f32 %v2230_v26, %v2162_v22  ;;  %3416 = vmatmul.mubr.msk.f32.gmra.mrb[22].mxu1 %vm277_vm1, %v2661_v62  ;;  %v2431_v17 = vmul.f32 %v4639_v10, %v2395_v43  ;;  %v2231_v5 = vmul.f32 %v2494_v63, %v4620_v35  ;;  %v2032_v6 = vmul.f32 %v2593_v27, %v4600_v60 }
 0x1b9   : > { %v2132_v13 = vmul.f32 %v2395_v43, %v4614_v15  ;;  %v2562_v21 = vadd.f32 %v2530_v0, %v2462_v33  ;;  %v2163_v9 = vadd.f32 %v2131_v42, %v2063_v34  ;;  %v1964_v49 = vadd.f32 %v1932_v32, %v1864_v61  ;;  %v2498_v33 = vld [vmem:[#allocation3 + $0x181] sm:$0xff] }
 0x1ba   : > { %v2362_v1 = vadd.f32 %v2330_v52, %v2262_v59  ;;  %v2531_v53 = vmul.f32 %v4648_v37, %v2495_v19  ;;  %v2631_v29 = vmul.f32 %v5190_v41, %v2595_v3  ;;  %v2331_v48 = vmul.f32 %v2594_v39, %v4628_v11  ;;  %v2398_v52 = vld [vmem:[#allocation3 + $0x180] sm:$0xff] }
 0x1bb   : > { %v1865_v38 = vmul.f32 %v2394_v7, %v4586_v23  ;;  %v2662_v47 = vadd.f32 %v2630_v30, %v2562_v21  ;;  %v2263_v27 = vadd.f32 %v2231_v5, %v2163_v9  ;;  %v2064_v44 = vadd.f32 %v2032_v6, %v1964_v49  ;;  %v2397_v7 = vld [vmem:[#allocation3 + $0x170] sm:$0xff]  ;;  %v2598_v21 = vld [vmem:[#allocation3 + $0x182] sm:$0xff] }
 0x1bc   : > { %v2463_v12 = vadd.f32 %v2431_v17, %v2362_v1  ;;  %v2432_v57 = vmul.f32 %v4639_v10, %v2396_v16  ;;  %v2532_v58 = vmul.f32 %v4648_v37, %v2496_v8  ;;  %v2632_v25 = vmul.f32 %v5190_v41, %v2596_v40 }
 0x1bd   : > { %v1933_v55 = vmul.f32 %v2494_v63, %v4591_v54  ;;  %3418 = vmatprep.mubr.msk.f32.mxu1 %vm277_vm1, %v2662_v47  ;;  %v2363_v56 = vadd.f32 %v2331_v48, %v2263_v27  ;;  %v2164_v31 = vadd.f32 %v2132_v13, %v2064_v44  ;;  %v2232_v50 = vmul.f32 %v2495_v19, %v4620_v35  ;;  %v2399_v47 = vld [vmem:[#allocation3 + $0x188] sm:$0xff] }
 0x1be   : > { %v2563_v4 = vadd.f32 %v2531_v53, %v2463_v12  ;;  %v2332_v14 = vmul.f32 %v2595_v3, %v4628_v11  ;;  %v2033_v28 = vmul.f32 %v2594_v39, %v4600_v60  ;;  %v2133_v45 = vmul.f32 %v2396_v16, %v4614_v15 }
 0x1bf   : > { %v1965_v18 = vadd.f32 %v1933_v55, %v1865_v38  ;;  %v2464_v0 = vadd.f32 %v2432_v57, %v2363_v56  ;;  %v2264_v63 = vadd.f32 %v2232_v50, %v2164_v31  ;;  %v1866_v26 = vmul.f32 %v2395_v43, %v4586_v23  ;;  %v2499_v55 = vld [vmem:[#allocation3 + $0x189] sm:$0xff]  ;;  %v2400_v56 = vld [vmem:[#allocation3 + $0x198] sm:$0xff] }
 0x1c0   : > { %v2663_v51 = vadd.f32 %v2631_v29, %v2563_v4  ;;  %v2433_v36 = vmul.f32 %v4639_v10, %v2397_v7  ;;  %v2533_v24 = vmul.f32 %v4648_v37, %v2497_v2  ;;  %v1934_v20 = vmul.f32 %v2495_v19, %v4591_v54 }
 0x1c1   : > { %v2065_v22 = vadd.f32 %v2033_v28, %v1965_v18  ;;  %v2564_v42 = vadd.f32 %v2532_v58, %v2464_v0  ;;  %v2364_v62 = vadd.f32 %v2332_v14, %v2264_v63  ;;  %v2633_v39 = vmul.f32 %v5190_v41, %v2597_v46 }
 0x1c2   : > { %3419 = vmatmul.mubr.msk.f32.gmra.mrb[24].mxu1 %vm277_vm1, %v2663_v51  ;;  %v2233_v30 = vmul.f32 %v2496_v8, %v4620_v35  ;;  %v1966_v59 = vadd.f32 %v1934_v20, %v1866_v26  ;;  %v2034_v43 = vmul.f32 %v2595_v3, %v4600_v60  ;;  %v2134_v34 = vmul.f32 %v2397_v7, %v4614_v15  ;;  %v2500_v51 = vld [vmem:[#allocation3 + $0x199] sm:$0xff] }
 0x1c3   : > { %v2165_v61 = vadd.f32 %v2133_v45, %v2065_v22  ;;  %v2664_v32 = vadd.f32 %v2632_v25, %v2564_v42  ;;  %v2465_v17 = vadd.f32 %v2433_v36, %v2364_v62  ;;  %v2333_v19 = vmul.f32 %v2596_v40, %v4628_v11  ;;  %v2600_v22 = vld [vmem:[#allocation3 + $0x19a] sm:$0xff] }
 0x1c4   : > { %v1867_v5 = vmul.f32 %v2396_v16, %v4586_v23  ;;  %v2434_v13 = vmul.f32 %v4639_v10, %v2398_v52  ;;  %v2066_v1 = vadd.f32 %v2034_v43, %v1966_v59  ;;  %v1935_v9 = vmul.f32 %v2496_v8, %v4591_v54 }
 0x1c5   : > { %v2265_v6 = vadd.f32 %v2233_v30, %v2165_v61  ;;  %3421 = vmatprep.mubr.msk.f32.mxu1 %vm277_vm1, %v2664_v32  ;;  %v2565_v49 = vadd.f32 %v2533_v24, %v2465_v17  ;;  %v2534_v3 = vmul.f32 %v4648_v37, %v2498_v33  ;;  %v2234_v53 = vmul.f32 %v2497_v2, %v4620_v35  ;;  %v2601_v17 = vld [vmem:[#allocation3 + $0x1a2] sm:$0xff] }
 0x1c6   : > { %v2035_v29 = vmul.f32 %v2596_v40, %v4600_v60  ;;  %v2166_v38 = vadd.f32 %v2134_v34, %v2066_v1  ;;  %v1967_v16 = vadd.f32 %v1935_v9, %v1867_v5  ;;  %v2135_v12 = vmul.f32 %v2398_v52, %v4614_v15 }
 0x1c7   : > { %v2365_v48 = vadd.f32 %v2333_v19, %v2265_v6  ;;  %v2665_v27 = vadd.f32 %v2633_v39, %v2565_v49  ;;  %v2634_v44 = vmul.f32 %v5190_v41, %v2598_v21  ;;  %v2334_v8 = vmul.f32 %v2597_v46, %v4628_v11 }
 0x1c8   : > { %v1868_v57 = vmul.f32 %v2397_v7, %v4586_v23  ;;  %v2266_v25 = vadd.f32 %v2234_v53, %v2166_v38  ;;  %v2067_v4 = vadd.f32 %v2035_v29, %v1967_v16  ;;  %v1936_v40 = vmul.f32 %v2497_v2, %v4591_v54  ;;  %v2599_v23 = vld [vmem:[#allocation3 + $0x18a] sm:$0xff] }
 0x1c9   : > { %v2466_v58 = vadd.f32 %v2434_v13, %v2365_v48  ;;  %3422 = vmatmul.mubr.msk.f32.gmra.mrb[26].mxu1 %vm277_vm1, %v2665_v27  ;;  %v2435_v31 = vmul.f32 %v4639_v10, %v2399_v47  ;;  %v2235_v50 = vmul.f32 %v2498_v33, %v4620_v35  ;;  %v2036_v14 = vmul.f32 %v2597_v46, %v4600_v60  ;;  %v2401_v46 = vld [vmem:[#allocation3 + $0x1a0] sm:$0xff] }
 0x1ca   : > { %v2136_v18 = vmul.f32 %v2399_v47, %v4614_v15  ;;  %v2366_v45 = vadd.f32 %v2334_v8, %v2266_v25  ;;  %v2167_v7 = vadd.f32 %v2135_v12, %v2067_v4  ;;  %v1968_v0 = vadd.f32 %v1936_v40, %v1868_v57  ;;  %v2501_v33 = vld [vmem:[#allocation3 + $0x1a1] sm:$0xff] }
 0x1cb   : > { %v2566_v28 = vadd.f32 %v2534_v3, %v2466_v58  ;;  %v2535_v63 = vmul.f32 %v4648_v37, %v2499_v55  ;;  %v2335_v54 = vmul.f32 %v2598_v21, %v4628_v11  ;;  %v2436_v2 = vmul.f32 %v4639_v10, %v2400_v56 }
 0x1cc   : > { %v2467_v36 = vadd.f32 %v2435_v31, %v2366_v45  ;;  %v2267_v24 = vadd.f32 %v2235_v50, %v2167_v7  ;;  %v2068_v20 = vadd.f32 %v2036_v14, %v1968_v0  ;;  %v2635_v60 = vmul.f32 %v5190_v41, %v2599_v23 }
 0x1cd   : > { %v2666_v26 = vadd.f32 %v2634_v44, %v2566_v28  ;;  %v2536_v15 = vmul.f32 %v4648_v37, %v2500_v51  ;;  %v2236_v30 = vmul.f32 %v2499_v55, %v4620_v35  ;;  %v2636_v52 = vmul.f32 %v5190_v41, %v2600_v22 }
 0x1ce   : > { %v2567_v42 = vadd.f32 %v2535_v63, %v2467_v36  ;;  %v2367_v62 = vadd.f32 %v2335_v54, %v2267_v24  ;;  %v2168_v39 = vadd.f32 %v2136_v18, %v2068_v20  ;;  %v2336_v61 = vmul.f32 %v2599_v23, %v4628_v11 }
 0x1cf   : > { %3424 = vmatprep.mubr.msk.f32.mxu1 %vm277_vm1, %v2666_v26  ;;  %v2437_v32 = vmul.f32 %v4639_v10, %v2401_v46  ;;  %v2537_v6 = vmul.f32 %v4648_v37, %v2501_v33  ;;  %v2637_v21 = vmul.f32 %v5190_v41, %v2601_v17  ;;  %v5336_v10 = vld [vmem:[%s5533_s6] ss:$0 sm:$0xff]  ;;  %v5343_v37 = vld [vmem:[%s5533_s6 + $0x1] ss:$0 sm:$0xff] }
 0x1d0   : > { %v2667_v59 = vadd.f32 %v2635_v60, %v2567_v42  ;;  %v2468_v43 = vadd.f32 %v2436_v2, %v2367_v62  ;;  %v2268_v34 = vadd.f32 %v2236_v30, %v2168_v39 }
 0x1d2   : > { %3425 = vmatmul.mubr.msk.f32.gmra.mrb[28].mxu1 %vm277_vm1, %v2667_v59  ;;  %v2568_v19 = vadd.f32 %v2536_v15, %v2468_v43  ;;  %v2368_v5 = vadd.f32 %v2336_v61, %v2268_v34 }
 0x1d4   : > { %v2668_v35 = vadd.f32 %v2636_v52, %v2568_v19  ;;  %v2469_v13 = vadd.f32 %v2437_v32, %v2368_v5 }
 0x1d6   : > { %3427 = vmatprep.mubr.msk.f32.mxu1 %vm277_vm1, %v2668_v35  ;;  %v2569_v11 = vadd.f32 %v2537_v6, %v2469_v13 }
 0x1d8   : > { %v2669_v1 = vadd.f32 %v2637_v21, %v2569_v11 }
 0x1da   : > { %3428 = vmatmul.mubr.msk.f32.gmra.mrb[30].mxu1 %vm277_vm1, %v2669_v1 }
 0x21b   : > { %v3384_v9 = vpop.f32.mrb[0].mxu1 }
 0x21c   : > { %v3001_v41 = vmul.f32 %v3384_v9, %v5336_v10  ;;  %v2836_v49 = vpop.f32.mrb[1].mxu1 }
 0x21d   : > { %v3000_v3 = vmul.f32 %v5336_v10, %v2836_v49 }
 0x21e   : > { %v3038_v53 = vadd.f32 %v5343_v37, %v3001_v41 }
 0x21f   : > { %v3037_v29 = vadd.f32 %v5343_v37, %v3000_v3 }
 0x220   : > { %3071 = vst.msk [vmem:[%s5349_s20 + $0x8] sm:$0xff] %vm3069_vm4, %v3038_v53 }
 0x221   : > { %3070 = vst.msk [vmem:[%s5349_s20] sm:$0xff] %vm3069_vm4, %v3037_v29 }
 0x222   : > { %v3387_v48 = vpop.f32.mrb[2].mxu1 }
 0x223   : > { %v3003_v38 = vmul.f32 %v3387_v48, %v5336_v10  ;;  %v2846_v47 = vpop.f32.mrb[3].mxu1 }
 0x224   : > { %v3002_v16 = vmul.f32 %v5336_v10, %v2846_v47 }
 0x225   : > { %v3040_v12 = vadd.f32 %v5343_v37, %v3003_v38 }
 0x226   : > { %v3039_v27 = vadd.f32 %v5343_v37, %v3002_v16 }
 0x227   : > { %3073 = vst.msk [vmem:[%s5349_s20 + $0x18] sm:$0xff] %vm3069_vm4, %v3040_v12 }
 0x228   : > { %3072 = vst.msk [vmem:[%s5349_s20 + $0x10] sm:$0xff] %vm3069_vm4, %v3039_v27 }
 0x22b   : > { %v3390_v44 = vpop.f32.mrb[4].mxu1 }
 0x22c   : > { %v3005_v8 = vmul.f32 %v3390_v44, %v5336_v10  ;;  %v2856_v57 = vpop.f32.mrb[5].mxu1 }
 0x22d   : > { %v3004_v58 = vmul.f32 %v5336_v10, %v2856_v57 }
 0x22e   : > { %v3042_v25 = vadd.f32 %v5343_v37, %v3005_v8 }
 0x22f   : > { %v3041_v55 = vadd.f32 %v5343_v37, %v3004_v58 }
 0x230   : > { %3075 = vst.msk [vmem:[%s5349_s20 + $0x28] sm:$0xff] %vm3069_vm4, %v3042_v25 }
 0x231   : > { %3074 = vst.msk [vmem:[%s5349_s20 + $0x20] sm:$0xff] %vm3069_vm4, %v3041_v55 }
 0x238   : > { %v3393_v4 = vpop.f32.mrb[6].mxu1 }
 0x239   : > { %v3007_v56 = vmul.f32 %v3393_v4, %v5336_v10  ;;  %v2866_v40 = vpop.f32.mrb[7].mxu1 }
 0x23a   : > { %v3006_v31 = vmul.f32 %v5336_v10, %v2866_v40 }
 0x23b   : > { %v3044_v50 = vadd.f32 %v5343_v37, %v3007_v56 }
 0x23c   : > { %v3043_v14 = vadd.f32 %v5343_v37, %v3006_v31 }
 0x23d   : > { %3077 = vst.msk [vmem:[%s5349_s20 + $0x38] sm:$0xff] %vm3069_vm4, %v3044_v50 }
 0x23e   : > { %3076 = vst.msk [vmem:[%s5349_s20 + $0x30] sm:$0xff] %vm3069_vm4, %v3043_v14 }
 0x242   : > { %v3396_v18 = vpop.f32.mrb[8].mxu1 }
 0x243   : > { %v3009_v28 = vmul.f32 %v3396_v18, %v5336_v10  ;;  %v2876_v45 = vpop.f32.mrb[9].mxu1 }
 0x244   : > { %v3008_v23 = vmul.f32 %v5336_v10, %v2876_v45 }
 0x245   : > { %v3046_v7 = vadd.f32 %v5343_v37, %v3009_v28 }
 0x246   : > { %v3045_v51 = vadd.f32 %v5343_v37, %v3008_v23 }
 0x247   : > { %3079 = vst.msk [vmem:[%s5349_s20 + $0x48] sm:$0xff] %vm3069_vm4, %v3046_v7 }
 0x248   : > { %3078 = vst.msk [vmem:[%s5349_s20 + $0x40] sm:$0xff] %vm3069_vm4, %v3045_v51 }
 0x24c   : > { %v3399_v0 = vpop.f32.mrb[10].mxu1 }
 0x24d   : > { %v3011_v63 = vmul.f32 %v3399_v0, %v5336_v10  ;;  %v2886_v54 = vpop.f32.mrb[11].mxu1 }
 0x24e   : > { %v3010_v2 = vmul.f32 %v5336_v10, %v2886_v54 }
 0x24f   : > { %v3048_v26 = vadd.f32 %v5343_v37, %v3011_v63 }
 0x250   : > { %v3047_v36 = vadd.f32 %v5343_v37, %v3010_v2 }
 0x251   : > { %3081 = vst.msk [vmem:[%s5349_s20 + $0x58] sm:$0xff] %vm3069_vm4, %v3048_v26 }
 0x252   : > { %3080 = vst.msk [vmem:[%s5349_s20 + $0x50] sm:$0xff] %vm3069_vm4, %v3047_v36 }
 0x257   : > { %v3402_v24 = vpop.f32.mrb[12].mxu1 }
 0x258   : > { %v3013_v22 = vmul.f32 %v3402_v24, %v5336_v10  ;;  %v2896_v20 = vpop.f32.mrb[13].mxu1 }
 0x259   : > { %v3012_v60 = vmul.f32 %v5336_v10, %v2896_v20 }
 0x25a   : > { %v3050_v15 = vadd.f32 %v5343_v37, %v3013_v22 }
 0x25b   : > { %v3049_v46 = vadd.f32 %v5343_v37, %v3012_v60 }
 0x25c   : > { %3083 = vst.msk [vmem:[%s5349_s20 + $0x68] sm:$0xff] %vm3069_vm4, %v3050_v15 }
 0x25d   : > { %3082 = vst.msk [vmem:[%s5349_s20 + $0x60] sm:$0xff] %vm3069_vm4, %v3049_v46 }
 0x263   : > { %v3405_v42 = vpop.f32.mrb[14].mxu1 }
 0x264   : > { %v3015_v62 = vmul.f32 %v3405_v42, %v5336_v10  ;;  %v2906_v39 = vpop.f32.mrb[15].mxu1 }
 0x265   : > { %v3014_v30 = vmul.f32 %v5336_v10, %v2906_v39 }
 0x266   : > { %v3052_v52 = vadd.f32 %v5343_v37, %v3015_v62 }
 0x267   : > { %v3051_v61 = vadd.f32 %v5343_v37, %v3014_v30 }
 0x268   : > { %3085 = vst.msk [vmem:[%s5349_s20 + $0x78] sm:$0xff] %vm3069_vm4, %v3052_v52 }
 0x269   : > { %3084 = vst.msk [vmem:[%s5349_s20 + $0x70] sm:$0xff] %vm3069_vm4, %v3051_v61 }
 0x26c   : > { %v3408_v33 = vpop.f32.mrb[16].mxu1 }
 0x26d   : > { %v3017_v59 = vmul.f32 %v3408_v33, %v5336_v10  ;;  %v2916_v43 = vpop.f32.mrb[17].mxu1 }
 0x26e   : > { %v3016_v34 = vmul.f32 %v5336_v10, %v2916_v43 }
 0x26f   : > { %v3054_v32 = vadd.f32 %v5343_v37, %v3017_v59 }
 0x270   : > { %v3053_v17 = vadd.f32 %v5343_v37, %v3016_v34 }
 0x271   : > { %3087 = vst.msk [vmem:[%s5349_s20 + $0x88] sm:$0xff] %vm3069_vm4, %v3054_v32 }
 0x272   : > { %3086 = vst.msk [vmem:[%s5349_s20 + $0x80] sm:$0xff] %vm3069_vm4, %v3053_v17 }
 0x278   : > { %v3411_v19 = vpop.f32.mrb[18].mxu1 }
 0x279   : > { %v3019_v5 = vmul.f32 %v3411_v19, %v5336_v10  ;;  %v2926_v6 = vpop.f32.mrb[19].mxu1 }
 0x27a   : > { %v3018_v35 = vmul.f32 %v5336_v10, %v2926_v6 }
 0x27b   : > { %v3056_v13 = vadd.f32 %v5343_v37, %v3019_v5 }
 0x27c   : > { %v3055_v21 = vadd.f32 %v5343_v37, %v3018_v35 }
 0x27d   : > { %3089 = vst.msk [vmem:[%s5349_s20 + $0x98] sm:$0xff] %vm3069_vm4, %v3056_v13 }
 0x27e   : > { %3088 = vst.msk [vmem:[%s5349_s20 + $0x90] sm:$0xff] %vm3069_vm4, %v3055_v21 }
 0x281   : > { %v3414_v11 = vpop.f32.mrb[20].mxu1 }
 0x282   : > { %v3021_v1 = vmul.f32 %v3414_v11, %v5336_v10  ;;  %v2936_v9 = vpop.f32.mrb[21].mxu1 }
 0x283   : > { %v3020_v41 = vmul.f32 %v5336_v10, %v2936_v9 }
 0x284   : > { %v3058_v49 = vadd.f32 %v5343_v37, %v3021_v1 }
 0x285   : > { %v3057_v3 = vadd.f32 %v5343_v37, %v3020_v41 }
 0x286   : > { %3091 = vst.msk [vmem:[%s5349_s20 + $0xa8] sm:$0xff] %vm3069_vm4, %v3058_v49 }
 0x287   : > { %3090 = vst.msk [vmem:[%s5349_s20 + $0xa0] sm:$0xff] %vm3069_vm4, %v3057_v3 }
 0x28b   : > { %v3417_v53 = vpop.f32.mrb[22].mxu1 }
 0x28c   : > { %v3023_v29 = vmul.f32 %v3417_v53, %v5336_v10  ;;  %v2946_v48 = vpop.f32.mrb[23].mxu1 }
 0x28d   : > { %v3022_v38 = vmul.f32 %v5336_v10, %v2946_v48 }
 0x28e   : > { %v3060_v47 = vadd.f32 %v5343_v37, %v3023_v29 }
 0x28f   : > { %v3059_v16 = vadd.f32 %v5343_v37, %v3022_v38 }
 0x290   : > { %3093 = vst.msk [vmem:[%s5349_s20 + $0xb8] sm:$0xff] %vm3069_vm4, %v3060_v47 }
 0x291   : > { %3092 = vst.msk [vmem:[%s5349_s20 + $0xb0] sm:$0xff] %vm3069_vm4, %v3059_v16 }
 0x295   : > { %v3420_v12 = vpop.f32.mrb[24].mxu1 }
 0x296   : > { %v3025_v27 = vmul.f32 %v3420_v12, %v5336_v10  ;;  %v2956_v44 = vpop.f32.mrb[25].mxu1 }
 0x297   : > { %v3024_v8 = vmul.f32 %v5336_v10, %v2956_v44 }
 0x298   : > { %v3062_v57 = vadd.f32 %v5343_v37, %v3025_v27 }
 0x299   : > { %v3061_v58 = vadd.f32 %v5343_v37, %v3024_v8 }
 0x29a   : > { %3095 = vst.msk [vmem:[%s5349_s20 + $0xc8] sm:$0xff] %vm3069_vm4, %v3062_v57 }
 0x29b   : > { %3094 = vst.msk [vmem:[%s5349_s20 + $0xc0] sm:$0xff] %vm3069_vm4, %v3061_v58 }
 0x29c   : > { %v3423_v25 = vpop.f32.mrb[26].mxu1 }
 0x29d   : > { %v3027_v55 = vmul.f32 %v3423_v25, %v5336_v10  ;;  %v2966_v4 = vpop.f32.mrb[27].mxu1 }
 0x29e   : > { %v3026_v56 = vmul.f32 %v5336_v10, %v2966_v4 }
 0x29f   : > { %v3064_v40 = vadd.f32 %v5343_v37, %v3027_v55 }
 0x2a0   : > { %v3063_v31 = vadd.f32 %v5343_v37, %v3026_v56 }
 0x2a1   : > { %3097 = vst.msk [vmem:[%s5349_s20 + $0xd8] sm:$0xff] %vm3069_vm4, %v3064_v40 }
 0x2a2   : > { %3096 = vst.msk [vmem:[%s5349_s20 + $0xd0] sm:$0xff] %vm3069_vm4, %v3063_v31 }
 0x2a5   : > { %v3426_v50 = vpop.f32.mrb[28].mxu1 }
 0x2a6   : > { %v3029_v14 = vmul.f32 %v3426_v50, %v5336_v10  ;;  %v2976_v18 = vpop.f32.mrb[29].mxu1 }
 0x2a7   : > { %v3028_v28 = vmul.f32 %v5336_v10, %v2976_v18 }
 0x2a8   : > { %v3066_v45 = vadd.f32 %v5343_v37, %v3029_v14 }
 0x2a9   : > { %v3065_v23 = vadd.f32 %v5343_v37, %v3028_v28 }
 0x2aa   : > { %3099 = vst.msk [vmem:[%s5349_s20 + $0xe8] sm:$0xff] %vm3069_vm4, %v3066_v45 }
 0x2ab   : > { %3098 = vst.msk [vmem:[%s5349_s20 + $0xe0] sm:$0xff] %vm3069_vm4, %v3065_v23 }
 0x2ad   : > { %v3429_v7 = vpop.f32.mrb[30].mxu1 }
 0x2ae   : > { %v3031_v51 = vmul.f32 %v3429_v7, %v5336_v10  ;;  %v2986_v0 = vpop.f32.mrb[31].mxu1 }
 0x2af   : > { %v3030_v63 = vmul.f32 %v5336_v10, %v2986_v0 }
 0x2b0   : > { %v3068_v54 = vadd.f32 %v5343_v37, %v3031_v51 }
 0x2b1   : > { %v3067_v2 = vadd.f32 %v5343_v37, %v3030_v63 }
 0x2b2   : > { %3101 = vst.msk [vmem:[%s5349_s20 + $0xf8] sm:$0xff] %vm3069_vm4, %v3068_v54 }
 0x2b3   : > { %3100 = vst.msk [vmem:[%s5349_s20 + $0xf0] sm:$0xff] %vm3069_vm4, %v3067_v2 }
 0x2b4   : > { %3489 = shalt.err (!%p3486_p3)
}
 0x2b5   : > { %s3490_s14 = scalar_lea.hbm %s5475_s8, 4096  ;;  %s3494_s19 = scalar_lea.hbm %s5534_s7, 8192 }
 0x2b6   : > { %p3491_p4 = scmp.ne.s32.totalorder %s5475_s8, %s3490_s14  ;;  %p3495_p9 = scmp.lt.u32.totalorder %s5475_s8, %s5534_s7 }
 0x2b7   : > { %p3496_p10 = scmp.lt.u32.totalorder %s3494_s19, %s3490_s14  ;;  %p3498_p12 = scmp.lt.u32.totalorder %s3490_s14, %s5475_s8 }
 0x2b8   : > { %p3492_p7 = pnand %p3491_p4, %p3622_p5 }
 0x2b9   : > { %p3497_p11 = por %p3496_p10, %p3495_p9 }
 0x2ba   : > { %p3493_p8 = pneg %p3492_p7 }
 0x2bb   : > { %p3499_p13 = por %p3498_p12, %p3497_p11 }
 0x2bd   : > { %p3500_p0 = pnand %p3499_p13, %p3493_p8 }
 0x2bf   : > { %3503 = shalt.err (!%p3500_p0)
}
 0x2c0   : > { %s3542_s23 = smov 128   ;;  %s3543_s29 = smov 8  }
 0x2c1   : > { %3430 = dma.vmem_to_hbm [thread:$0]  (%p3622_p5), %s5477_s22, 4096, %s5475_s8, %s5486_s28, %s3542_s23, %s3542_s23, %s3543_s29  }
 0x2c2 PF: > { %p3436_p1 = scmp.ge.s32.totalorder %s3538_s27, 2  ;;  %s3131_s9 = sand.u32 1, %s3526_s24  }
 0x2c3   : > { %s3132_s13 = scalar_lea.sflag [#allocation5], %s3131_s9 }
 0x2c4   : > { %p3433_p2 = pnand %p3436_p1, %p3626_p6 }
 0x2c6   : > { %3521 = dma.done.wait (!%p3433_p2), %s3132_s13, 4096  }
 0x2c7   : > { %3523 = vsyncadd (!%p3433_p2), %s3132_s13, 4294963200  ;;  %p17_p3 = scmp.ge.s32.totalorder %s3609_s30, 4   ;;  %s5537_s24 = smov %s3530_s25 }
 0x2c8   : > { %s5538_s25 = smov %s3534_s26  ;;  %s5539_s26 = smov %s3620_s10 }
 0x2c9   : > { %s5540_s27 = smov %s3609_s30  ;;  %19 = sbr.rel (!%p17_p3) target bundleno = 3 (0x3), region = 89 }
 0x2d0   :  { %3137 = vsyncpa [#allocation5], 1 }
 0x2d1   :  { %3139 = vsyncpa [#allocation5 + $0x1], 1 }

</bundles_post_ra>
